<compile_context>
chip_gen: v6e
topology: v6e:2x2x1
jax: 0.10.0
libtpu: 0.0.40
codegen_flags: <defaults>
</compile_context>

<pallas_src>
import jax
import jax.numpy as jnp
from jax.experimental import pallas as pl
from jax.experimental.pallas import tpu as pltpu


def _pick_row_tile(H, W, Wp, B, c_mid, c_out, ck, budget_bytes=20 * 1024 * 1024):
    """Pick the output-row tile TH: a multiple of 8 dividing H with TH*W a
    multiple of 128 (dense lane stores), whose lane-padded per-step VMEM
    working set fits the budget.  Falls back to TH = H."""
    lp = lambda n: -(-n // 128) * 128          # lane pad
    sp = lambda n: -(-n // 8) * 8              # sublane pad

    cands = []
    for th in range(8, H + 1, 8):
        if H % th:
            continue
        if (th * W) % 128 != 0 and th * W != H * W:
            continue
        cands.append(th)

    def est(th):
        th4 = th + 4
        return 4 * (2 * th4 * Wp * lp(ck)            # input slab (double-buffered)
                    + th4 * W * lp(5 * ck)           # kx-im2col of the input
                    + th4 * W * lp(5 * c_mid)        # wide x_1 (K-concat LHS)
                    + th * W * lp(c_mid)             # accumulator
                    + 2 * sp(c_mid) * th * W         # fea output block (dbuf)
                    + 2 * sp(c_out) * th * W)        # map output block (dbuf)

    ok = [t for t in cands if est(t) <= budget_bytes]
    pool = ok if ok else cands
    th = max(pool) if pool else H
    # keep >= 2 independent grid units (megacore / v7x 2-TC sharding)
    if B * (H // th) < 2:
        smaller = [t for t in (pool or cands) if t < th]
        if smaller:
            th = max(smaller)
    return th


def illumination_estimator(img, params):
    """img: (B, C_img, H, W) float32 NCHW.  params in torch layouts:
       w1 (C_mid, C_img+1, 1, 1), b1 (C_mid,), wd (C_mid, C_mid//groups, 5, 5),
       bd (C_mid,), w2 (C_out, C_mid, 1, 1), b2 (C_out,), groups = C_img + 1."""
    w1, b1, wd, bd, w2, b2 = params
    B, C_img, H, W = img.shape
    C_mid = w1.shape[0]
    C_in = w1.shape[1]                  # = C_img + 1 (image channels + mean channel)
    C_out = w2.shape[0]
    groups = C_in
    cpg = C_mid // groups
    assert C_in == C_img + 1
    assert wd.shape == (C_mid, cpg, 5, 5)
    assert W % 8 == 0, "fast path assumes W % 8 == 0"
    # TODO(synk): support W % 8 != 0 (needs relayout-tolerant in-kernel reshapes).

    f32 = jnp.float32
    Ck = C_img + 1                      # kernel input channels: img + ones channel
    CW = 5 * Ck                         # kx-im2col channels feeding the wide conv1
    CM5 = 5 * C_mid                     # K of the grouped-conv matmuls

    # ---- weight prep (tiny, exact algebra, XLA-side) ------------------------
    w1t = jnp.transpose(w1[:, :, 0, 0]).astype(f32)                  # (C_in, C_mid)
    # fold the mean channel into the image-channel weights (mean = sum/C_img)
    w1_img = w1t[:C_img] + w1t[C_img:C_img + 1] / float(C_img)       # (C_img, C_mid)
    # the ones-channel row carries conv1's bias; being zero-padded in the halo
    # it reproduces torch's zero padding of conv1's *output* exactly.
    w1e = jnp.concatenate([w1_img, b1[None, :].astype(f32)], axis=0)  # (Ck, C_mid)
    # block-diagonal over the 5 kx taps -> one matmul emits the 5 kx-shifted
    # copies of x_1 side by side (the K-concat LHS for the grouped conv).
    w1w = jnp.kron(jnp.eye(5, dtype=f32), w1e)                        # (5*Ck, 5*C_mid)

    # grouped 5x5 weights: per-tap block-diagonal (C_mid x C_mid), then packed
    # per ky as a (5*C_mid, C_mid) matrix (kx-major to match the LHS lanes).
    wdt = jnp.transpose(wd.astype(f32), (2, 3, 1, 0)).reshape(25, cpg, C_mid)
    ic = jnp.arange(C_mid)[None, :, None]
    oc = jnp.arange(C_mid)[None, None, :]
    jg = jnp.arange(cpg)[:, None, None]
    sel = (ic == (oc // cpg) * cpg + jg).astype(f32)                  # (cpg, C_mid, C_mid)
    wbd = jnp.einsum('jio,tjo->tio', sel, wdt)                        # (25, ic, oc)
    wg = wbd.reshape(5, CM5, C_mid)                                   # [ky, kx*C_mid+ic, oc]

    w2t = w2[:, :, 0, 0].astype(f32)                                  # (C_out, C_mid)
    bd_col = bd.reshape(C_mid, 1).astype(f32)
    b2_col = b2.reshape(C_out, 1).astype(f32)

    # ---- input prep: NHWC, ones channel, zero halo, duplicated row slabs -----
    Wp = ((W + 4 + 7) // 8) * 8
    TH = _pick_row_tile(H, W, Wp, B, C_mid, C_out, Ck)
    nH = H // TH
    TH4 = TH + 4

    x = jnp.transpose(img.astype(f32), (0, 2, 3, 1))                  # (B, H, W, C_img)
    onesc = jnp.ones((B, H, W, 1), f32)
    x4 = jnp.concatenate([x, onesc], axis=-1)                         # (B, H, W, Ck)
    xp = jnp.pad(x4, ((0, 0), (2, 2), (2, Wp - W - 2), (0, 0)))       # (B, H+4, Wp, Ck)
    rows = jnp.arange(nH)[:, None] * TH + jnp.arange(TH4)[None, :]    # (nH, TH4)
    slabs = xp[:, rows]                                               # (B, nH, TH4, Wp, Ck)

    def kernel(xs_ref, w1w_ref, wg_ref, bd_ref, w2_ref, b2_ref, fea_ref, map_ref):
        xs = xs_ref[...]                                              # (TH4, Wp, Ck)
        # im2col over the 5 kx taps -> (TH4, W, 5*Ck); halo columns drop out.
        xs_wide = jnp.concatenate([xs[:, kx:kx + W, :] for kx in range(5)],
                                  axis=-1)
        # fused conv1: one matmul produces the 5 kx-shifted x_1 copies at once
        # (bias folded via the ones channel; halo rows/cols are exactly zero).
        x1w = jnp.dot(xs_wide.reshape(TH4 * W, CW), w1w_ref[...],
                      preferred_element_type=f32)                     # (TH4*W, 5*C_mid)
        x1w = x1w.reshape(TH4, W, CM5)

        # grouped 5x5 conv: 5 matmuls of K = 5*C_mid (kx already concatenated
        # along lanes; ky shifts are free outer-dim slices).
        acc = jnp.zeros((TH * W, C_mid), f32)
        for ky in range(5):
            lhs = x1w[ky:ky + TH].reshape(TH * W, CM5)
            acc = acc + jnp.dot(lhs, wg_ref[ky], preferred_element_type=f32)

        # channel-major, lane-dense epilogue: unmasked (C, TH*W) stores, and the
        # wrapper's NCHW conversion becomes a pure reshape.
        fea_t = jnp.transpose(acc) + bd_ref[...]                      # (C_mid, TH*W)
        fea_ref[...] = fea_t
        map_ref[...] = jnp.dot(w2_ref[...], fea_t,
                               preferred_element_type=f32) + b2_ref[...]

    flops = 2 * B * H * W * (25 * cpg * C_mid + 5 * Ck * C_mid + C_mid * C_out)
    bytes_accessed = (slabs.size + B * H * W * (C_mid + C_out)) * 4

    fea_cm, map_cm = pl.pallas_call(
        kernel,
        out_shape=(jax.ShapeDtypeStruct((B, C_mid, H * W), f32),
                   jax.ShapeDtypeStruct((B, C_out, H * W), f32)),
        grid=(B, nH),
        in_specs=[
            pl.BlockSpec((None, None, TH4, Wp, Ck), lambda b, h: (b, h, 0, 0, 0)),
            pl.BlockSpec((CW, CM5), lambda b, h: (0, 0)),
            pl.BlockSpec((5, CM5, C_mid), lambda b, h: (0, 0, 0)),
            pl.BlockSpec((C_mid, 1), lambda b, h: (0, 0)),
            pl.BlockSpec((C_out, C_mid), lambda b, h: (0, 0)),
            pl.BlockSpec((C_out, 1), lambda b, h: (0, 0)),
        ],
        out_specs=(
            pl.BlockSpec((None, C_mid, TH * W), lambda b, h: (b, 0, h)),
            pl.BlockSpec((None, C_out, TH * W), lambda b, h: (b, 0, h)),
        ),
        compiler_params=pltpu.CompilerParams(
            dimension_semantics=("parallel", "parallel"),
            vmem_limit_bytes=48 * 1024 * 1024),
        cost_estimate=pl.CostEstimate(flops=flops, transcendentals=0,
                                      bytes_accessed=bytes_accessed),
    )(slabs, w1w, wg, bd_col, w2t, b2_col)

    # NCHW interface: pure reshapes (no HBM transpose pass).
    illu_fea = fea_cm.reshape(B, C_mid, H, W)
    illu_map = map_cm.reshape(B, C_out, H, W)
    return illu_fea, illu_map


# ---------------------------------------------------------------------------
# Parameters (torch layouts) and a pure-JAX reference for verification.
# ---------------------------------------------------------------------------
def init_params(key, n_fea_middle=32, n_fea_in=4, n_fea_out=3):
    cpg = n_fea_middle // n_fea_in
    ks = jax.random.split(key, 6)
    w1 = jax.random.normal(ks[0], (n_fea_middle, n_fea_in, 1, 1), jnp.float32) * 0.1
    b1 = jax.random.normal(ks[1], (n_fea_middle,), jnp.float32) * 0.01
    wd = jax.random.normal(ks[2], (n_fea_middle, cpg, 5, 5), jnp.float32) * 0.1
    bd = jax.random.normal(ks[3], (n_fea_middle,), jnp.float32) * 0.01
    w2 = jax.random.normal(ks[4], (n_fea_out, n_fea_middle, 1, 1), jnp.float32) * 0.1
    b2 = jax.random.normal(ks[5], (n_fea_out,), jnp.float32) * 0.01
    return (w1, b1, wd, bd, w2, b2)


def reference_forward(img, params):
    w1, b1, wd, bd, w2, b2 = params
    groups = w1.shape[1]
    dn = ('NCHW', 'OIHW', 'NCHW')
    hp = jax.lax.Precision.HIGHEST
    mean_c = jnp.mean(img, axis=1, keepdims=True)
    inp = jnp.concatenate([img, mean_c], axis=1)
    x1 = jax.lax.conv_general_dilated(inp, w1, (1, 1), 'VALID',
                                      dimension_numbers=dn, precision=hp)
    x1 = x1 + b1[None, :, None, None]
    fea = jax.lax.conv_general_dilated(x1, wd, (1, 1), ((2, 2), (2, 2)),
                                       dimension_numbers=dn,
                                       feature_group_count=groups, precision=hp)
    fea = fea + bd[None, :, None, None]
    mp = jax.lax.conv_general_dilated(fea, w2, (1, 1), 'VALID',
                                      dimension_numbers=dn, precision=hp)
    mp = mp + b2[None, :, None, None]
    return fea, mp


if __name__ == "__main__":
    key = jax.random.PRNGKey(0)
    k_img, k_par = jax.random.split(key)
    img = jax.random.uniform(k_img, (2, 3, 16, 16), jnp.float32)   # B=2, 3ch, 16x16
    params = init_params(k_par, n_fea_middle=32, n_fea_in=4, n_fea_out=3)

    fwd = jax.jit(illumination_estimator)
    illu_fea, illu_map = fwd(img, params)
    jax.block_until_ready((illu_fea, illu_map))

    assert illu_fea.shape == (2, 32, 16, 16)
    assert illu_map.shape == (2, 3, 16, 16)

    ref_fea, ref_map = reference_forward(img, params)
    err_fea = float(jnp.max(jnp.abs(illu_fea - ref_fea)))
    err_map = float(jnp.max(jnp.abs(illu_map - ref_map)))
    assert err_fea < 1e-3 and err_map < 1e-3, (err_fea, err_map)

    print("KERNEL_OK")
</pallas_src>

<mosaic_0001>
module attributes {stable_mosaic.version = 11 : i64} {
  func.func @kernel(%arg0: i32, %arg1: i32, %arg2: memref<1x1x20x24x4xf32, #tpu.memory_space<vmem>>, %arg3: memref<20x160xf32, #tpu.memory_space<vmem>>, %arg4: memref<5x160x32xf32, #tpu.memory_space<vmem>>, %arg5: memref<32x1xf32, #tpu.memory_space<vmem>>, %arg6: memref<3x32xf32, #tpu.memory_space<vmem>>, %arg7: memref<3x1xf32, #tpu.memory_space<vmem>>, %arg8: memref<1x32x256xf32, #tpu.memory_space<vmem>>, %arg9: memref<1x3x256xf32, #tpu.memory_space<vmem>>) attributes {dimension_semantics = [#tpu.dimension_semantics<parallel>, #tpu.dimension_semantics<parallel>], iteration_bounds = array<i64: 2, 1>, scalar_prefetch = 0 : i64, scratch_operands = 0 : i64, tpu.core_type = #tpu.core_type<tc>, window_params = [{transform_indices = @transform_0, window_bounds = array<i64: 1, 1, 20, 24, 4>}, {pipeline_mode = #tpu.pipeline_mode<synchronous>, transform_indices = @transform_1, window_bounds = array<i64: 20, 160>}, {pipeline_mode = #tpu.pipeline_mode<synchronous>, transform_indices = @transform_2, window_bounds = array<i64: 5, 160, 32>}, {pipeline_mode = #tpu.pipeline_mode<synchronous>, transform_indices = @transform_3, window_bounds = array<i64: 32, 1>}, {pipeline_mode = #tpu.pipeline_mode<synchronous>, transform_indices = @transform_4, window_bounds = array<i64: 3, 32>}, {pipeline_mode = #tpu.pipeline_mode<synchronous>, transform_indices = @transform_5, window_bounds = array<i64: 3, 1>}, {transform_indices = @transform_6, window_bounds = array<i64: 1, 32, 256>}, {transform_indices = @transform_7, window_bounds = array<i64: 1, 3, 256>}]} {
    %c0 = arith.constant 0 : index
    %c0_0 = arith.constant 0 : index
    %c0_1 = arith.constant 0 : index
    %c0_2 = arith.constant 0 : index
    %c0_3 = arith.constant 0 : index
    %0 = vector.load %arg2[%c0, %c0_0, %c0_1, %c0_2, %c0_3] : memref<1x1x20x24x4xf32, #tpu.memory_space<vmem>>, vector<1x1x20x24x4xf32>
    %1 = vector.shape_cast %0 : vector<1x1x20x24x4xf32> to vector<20x24x4xf32>
    %2 = vector.extract_strided_slice %1 {offsets = [0, 0, 0], sizes = [20, 16, 4], strides = [1, 1, 1]} : vector<20x24x4xf32> to vector<20x16x4xf32>
    %3 = vector.extract_strided_slice %1 {offsets = [0, 1, 0], sizes = [20, 16, 4], strides = [1, 1, 1]} : vector<20x24x4xf32> to vector<20x16x4xf32>
    %4 = vector.extract_strided_slice %1 {offsets = [0, 2, 0], sizes = [20, 16, 4], strides = [1, 1, 1]} : vector<20x24x4xf32> to vector<20x16x4xf32>
    %5 = vector.extract_strided_slice %1 {offsets = [0, 3, 0], sizes = [20, 16, 4], strides = [1, 1, 1]} : vector<20x24x4xf32> to vector<20x16x4xf32>
    %6 = vector.extract_strided_slice %1 {offsets = [0, 4, 0], sizes = [20, 16, 4], strides = [1, 1, 1]} : vector<20x24x4xf32> to vector<20x16x4xf32>
    %7 = tpu.concatenate %2, %3, %4, %5, %6 in 2 : vector<20x16x4xf32>, vector<20x16x4xf32>, vector<20x16x4xf32>, vector<20x16x4xf32>, vector<20x16x4xf32> -> vector<20x16x20xf32>
    %8 = vector.shape_cast %7 : vector<20x16x20xf32> to vector<320x20xf32>
    %c0_4 = arith.constant 0 : index
    %c0_5 = arith.constant 0 : index
    %9 = vector.load %arg3[%c0_4, %c0_5] : memref<20x160xf32, #tpu.memory_space<vmem>>, vector<20x160xf32>
    %cst = arith.constant dense<0.000000e+00> : vector<320x160xf32>
    %10 = tpu.matmul %8, %9, %cst {dimension_numbers = #tpu.dot_dimension_numbers<[1], [0], [0], [1], [0, 0, 1, 1], [], []>} : vector<320x20xf32>, vector<20x160xf32>, vector<320x160xf32> -> vector<320x160xf32>
    %11 = vector.shape_cast %10 : vector<320x160xf32> to vector<20x16x160xf32>
    %cst_6 = arith.constant 0.000000e+00 : f32
    %12 = vector.broadcast %cst_6 : f32 to vector<256x32xf32>
    %13 = vector.extract_strided_slice %11 {offsets = [0, 0, 0], sizes = [16, 16, 160], strides = [1, 1, 1]} : vector<20x16x160xf32> to vector<16x16x160xf32>
    %14 = vector.shape_cast %13 : vector<16x16x160xf32> to vector<256x160xf32>
    %c0_7 = arith.constant 0 : index
    %c0_8 = arith.constant 0 : index
    %c0_9 = arith.constant 0 : index
    %15 = vector.load %arg4[%c0_7, %c0_8, %c0_9] : memref<5x160x32xf32, #tpu.memory_space<vmem>>, vector<1x160x32xf32>
    %16 = vector.shape_cast %15 : vector<1x160x32xf32> to vector<160x32xf32>
    %cst_10 = arith.constant dense<0.000000e+00> : vector<256x32xf32>
    %17 = tpu.matmul %14, %16, %cst_10 {dimension_numbers = #tpu.dot_dimension_numbers<[1], [0], [0], [1], [0, 0, 1, 1], [], []>} : vector<256x160xf32>, vector<160x32xf32>, vector<256x32xf32> -> vector<256x32xf32>
    %18 = arith.addf %12, %17 : vector<256x32xf32>
    %19 = vector.extract_strided_slice %11 {offsets = [1, 0, 0], sizes = [16, 16, 160], strides = [1, 1, 1]} : vector<20x16x160xf32> to vector<16x16x160xf32>
    %20 = vector.shape_cast %19 : vector<16x16x160xf32> to vector<256x160xf32>
    %c1 = arith.constant 1 : index
    %c0_11 = arith.constant 0 : index
    %c0_12 = arith.constant 0 : index
    %21 = vector.load %arg4[%c1, %c0_11, %c0_12] : memref<5x160x32xf32, #tpu.memory_space<vmem>>, vector<1x160x32xf32>
    %22 = vector.shape_cast %21 : vector<1x160x32xf32> to vector<160x32xf32>
    %cst_13 = arith.constant dense<0.000000e+00> : vector<256x32xf32>
    %23 = tpu.matmul %20, %22, %cst_13 {dimension_numbers = #tpu.dot_dimension_numbers<[1], [0], [0], [1], [0, 0, 1, 1], [], []>} : vector<256x160xf32>, vector<160x32xf32>, vector<256x32xf32> -> vector<256x32xf32>
    %24 = arith.addf %18, %23 : vector<256x32xf32>
    %25 = vector.extract_strided_slice %11 {offsets = [2, 0, 0], sizes = [16, 16, 160], strides = [1, 1, 1]} : vector<20x16x160xf32> to vector<16x16x160xf32>
    %26 = vector.shape_cast %25 : vector<16x16x160xf32> to vector<256x160xf32>
    %c2 = arith.constant 2 : index
    %c0_14 = arith.constant 0 : index
    %c0_15 = arith.constant 0 : index
    %27 = vector.load %arg4[%c2, %c0_14, %c0_15] : memref<5x160x32xf32, #tpu.memory_space<vmem>>, vector<1x160x32xf32>
    %28 = vector.shape_cast %27 : vector<1x160x32xf32> to vector<160x32xf32>
    %cst_16 = arith.constant dense<0.000000e+00> : vector<256x32xf32>
    %29 = tpu.matmul %26, %28, %cst_16 {dimension_numbers = #tpu.dot_dimension_numbers<[1], [0], [0], [1], [0, 0, 1, 1], [], []>} : vector<256x160xf32>, vector<160x32xf32>, vector<256x32xf32> -> vector<256x32xf32>
    %30 = arith.addf %24, %29 : vector<256x32xf32>
    %31 = vector.extract_strided_slice %11 {offsets = [3, 0, 0], sizes = [16, 16, 160], strides = [1, 1, 1]} : vector<20x16x160xf32> to vector<16x16x160xf32>
    %32 = vector.shape_cast %31 : vector<16x16x160xf32> to vector<256x160xf32>
    %c3 = arith.constant 3 : index
    %c0_17 = arith.constant 0 : index
    %c0_18 = arith.constant 0 : index
    %33 = vector.load %arg4[%c3, %c0_17, %c0_18] : memref<5x160x32xf32, #tpu.memory_space<vmem>>, vector<1x160x32xf32>
    %34 = vector.shape_cast %33 : vector<1x160x32xf32> to vector<160x32xf32>
    %cst_19 = arith.constant dense<0.000000e+00> : vector<256x32xf32>
    %35 = tpu.matmul %32, %34, %cst_19 {dimension_numbers = #tpu.dot_dimension_numbers<[1], [0], [0], [1], [0, 0, 1, 1], [], []>} : vector<256x160xf32>, vector<160x32xf32>, vector<256x32xf32> -> vector<256x32xf32>
    %36 = arith.addf %30, %35 : vector<256x32xf32>
    %37 = vector.extract_strided_slice %11 {offsets = [4, 0, 0], sizes = [16, 16, 160], strides = [1, 1, 1]} : vector<20x16x160xf32> to vector<16x16x160xf32>
    %38 = vector.shape_cast %37 : vector<16x16x160xf32> to vector<256x160xf32>
    %c4 = arith.constant 4 : index
    %c0_20 = arith.constant 0 : index
    %c0_21 = arith.constant 0 : index
    %39 = vector.load %arg4[%c4, %c0_20, %c0_21] : memref<5x160x32xf32, #tpu.memory_space<vmem>>, vector<1x160x32xf32>
    %40 = vector.shape_cast %39 : vector<1x160x32xf32> to vector<160x32xf32>
    %cst_22 = arith.constant dense<0.000000e+00> : vector<256x32xf32>
    %41 = tpu.matmul %38, %40, %cst_22 {dimension_numbers = #tpu.dot_dimension_numbers<[1], [0], [0], [1], [0, 0, 1, 1], [], []>} : vector<256x160xf32>, vector<160x32xf32>, vector<256x32xf32> -> vector<256x32xf32>
    %42 = arith.addf %36, %41 : vector<256x32xf32>
    %43 = tpu.transpose %42, [1, 0] : vector<256x32xf32> -> vector<32x256xf32>
    %c0_23 = arith.constant 0 : index
    %c0_24 = arith.constant 0 : index
    %44 = vector.load %arg5[%c0_23, %c0_24] : memref<32x1xf32, #tpu.memory_space<vmem>>, vector<32x1xf32>
    %45 = vector.broadcast %44 : vector<32x1xf32> to vector<32x256xf32>
    %46 = arith.addf %43, %45 : vector<32x256xf32>
    %c0_25 = arith.constant 0 : index
    %c0_26 = arith.constant 0 : index
    %c0_27 = arith.constant 0 : index
    %47 = vector.load %arg8[%c0_25, %c0_26, %c0_27] : memref<1x32x256xf32, #tpu.memory_space<vmem>>, vector<1x32x256xf32>
    %48 = vector.shape_cast %47 : vector<1x32x256xf32> to vector<32x256xf32>
    %49 = vector.shape_cast %46 : vector<32x256xf32> to vector<1x32x256xf32>
    tpu.vector_store %arg8[%c0_25, %c0_26, %c0_27], %49 {strides = array<i32>} : memref<1x32x256xf32, #tpu.memory_space<vmem>>, vector<1x32x256xf32>,
    %c0_28 = arith.constant 0 : index
    %c0_29 = arith.constant 0 : index
    %50 = vector.load %arg6[%c0_28, %c0_29] : memref<3x32xf32, #tpu.memory_space<vmem>>, vector<3x32xf32>
    %cst_30 = arith.constant dense<0.000000e+00> : vector<3x256xf32>
    %51 = tpu.matmul %50, %46, %cst_30 {dimension_numbers = #tpu.dot_dimension_numbers<[1], [0], [0], [1], [0, 0, 1, 1], [], []>} : vector<3x32xf32>, vector<32x256xf32>, vector<3x256xf32> -> vector<3x256xf32>
    %c0_31 = arith.constant 0 : index
    %c0_32 = arith.constant 0 : index
    %52 = vector.load %arg7[%c0_31, %c0_32] : memref<3x1xf32, #tpu.memory_space<vmem>>, vector<3x1xf32>
    %53 = vector.broadcast %52 : vector<3x1xf32> to vector<3x256xf32>
    %54 = arith.addf %51, %53 : vector<3x256xf32>
    %c0_33 = arith.constant 0 : index
    %c0_34 = arith.constant 0 : index
    %c0_35 = arith.constant 0 : index
    %55 = vector.load %arg9[%c0_33, %c0_34, %c0_35] : memref<1x3x256xf32, #tpu.memory_space<vmem>>, vector<1x3x256xf32>
    %56 = vector.shape_cast %55 : vector<1x3x256xf32> to vector<3x256xf32>
    %57 = vector.shape_cast %54 : vector<3x256xf32> to vector<1x3x256xf32>
    tpu.vector_store %arg9[%c0_33, %c0_34, %c0_35], %57 {strides = array<i32>} : memref<1x3x256xf32, #tpu.memory_space<vmem>>, vector<1x3x256xf32>,
    return
  }
  func.func @transform_0(%arg0: i32, %arg1: i32) -> (i32, i32, i32, i32, i32) {
    %c0_i32 = arith.constant 0 : i32
    %c0_i32_0 = arith.constant 0 : i32
    %c0_i32_1 = arith.constant 0 : i32
    %c0_i32_2 = arith.constant 0 : i32
    return %arg0, %arg1, %c0_i32, %c0_i32_0, %c0_i32_1 : i32, i32, i32, i32, i32
  }
  func.func @transform_1(%arg0: i32, %arg1: i32) -> (i32, i32) {
    %c0_i32 = arith.constant 0 : i32
    %c0_i32_0 = arith.constant 0 : i32
    %c0_i32_1 = arith.constant 0 : i32
    return %c0_i32, %c0_i32_0 : i32, i32
  }
  func.func @transform_2(%arg0: i32, %arg1: i32) -> (i32, i32, i32) {
    %c0_i32 = arith.constant 0 : i32
    %c0_i32_0 = arith.constant 0 : i32
    %c0_i32_1 = arith.constant 0 : i32
    %c0_i32_2 = arith.constant 0 : i32
    return %c0_i32, %c0_i32_0, %c0_i32_1 : i32, i32, i32
  }
  func.func @transform_3(%arg0: i32, %arg1: i32) -> (i32, i32) {
    %c0_i32 = arith.constant 0 : i32
    %c0_i32_0 = arith.constant 0 : i32
    %c0_i32_1 = arith.constant 0 : i32
    return %c0_i32, %c0_i32_0 : i32, i32
  }
  func.func @transform_4(%arg0: i32, %arg1: i32) -> (i32, i32) {
    %c0_i32 = arith.constant 0 : i32
    %c0_i32_0 = arith.constant 0 : i32
    %c0_i32_1 = arith.constant 0 : i32
    return %c0_i32, %c0_i32_0 : i32, i32
  }
  func.func @transform_5(%arg0: i32, %arg1: i32) -> (i32, i32) {
    %c0_i32 = arith.constant 0 : i32
    %c0_i32_0 = arith.constant 0 : i32
    %c0_i32_1 = arith.constant 0 : i32
    return %c0_i32, %c0_i32_0 : i32, i32
  }
  func.func @transform_6(%arg0: i32, %arg1: i32) -> (i32, i32, i32) {
    %c0_i32 = arith.constant 0 : i32
    %c0_i32_0 = arith.constant 0 : i32
    return %arg0, %c0_i32, %arg1 : i32, i32, i32
  }
  func.func @transform_7(%arg0: i32, %arg1: i32) -> (i32, i32, i32) {
    %c0_i32 = arith.constant 0 : i32
    %c0_i32_0 = arith.constant 0 : i32
    return %arg0, %c0_i32, %arg1 : i32, i32, i32
  }
}

</mosaic_0001>

<bundles_post_ra>
// kernel: illumination_estimator.1
= control target key start
LH: loop header
LB: loop body
LE: loop exit
PB: predicated region body
PF: predicated region fallthrough
CT: control target
= control target key end

     0   :  { %s4124_s24 = smov 0   ;;  %s4126_s25 = smov 0   ;;  %s6396_s0 = inlined_call_operand.vmem [shape: f32[2,1,20,24,4], index: 0, kind: input, shape index: {}]   ;;  %s6397_s1 = inlined_call_operand.vmem [shape: f32[20,160], index: 1, kind: input, shape index: {}]   ;;  %s6398_s2 = inlined_call_operand.vmem [shape: f32[5,160,32], index: 2, kind: input, shape index: {}]   ;;  %s6399_s3 = inlined_call_operand.vmem [shape: f32[32,1], index: 3, kind: input, shape index: {}]   ;;  %s6400_s4 = inlined_call_operand.vmem [shape: f32[3,32], index: 4, kind: input, shape index: {}]   ;;  %s6401_s5 = inlined_call_operand.vmem [shape: f32[3,1], index: 5, kind: input, shape index: {}]   ;;  %s6402_s6 = inlined_call_operand.vmem [shape: f32[2,32,256], index: 6, kind: output, shape index: {0}]   ;;  %s6403_s7 = inlined_call_operand.vmem [shape: f32[2,3,256], index: 7, kind: output, shape index: {1}]  }
   0x1   :  { %s4128_s26 = smov 0  }
   0x2 LB: > { %s30_s27 = sadd.s32 1, %s4072_s25  ;;  %p3726_p0 = scmp.ge.s32.totalorder %s4076_s26, 1  ;;  %s4076_s26 = sphi %s4128_s26, %s18_s26   ;;  %s4072_s25 = sphi %s4126_s25, %s6508_s25   ;;  %s4068_s24 = sphi %s4124_s24, %s6507_s24  }
   0x3   : > { %p32_p1 = scmp.ge.s32.totalorder %s30_s27, 2  ;;  %p262_p2 = scmp.lt.s32.totalorder %s4076_s26, 3 }
   0x5   : > { %s6510_s27 = smov (%p32_p1, %s30_s27), 0  ;;  %p263_p3 = pnand %p3726_p0, %p262_p2 }
   0x7   : > { %266 = sbr.rel (%p263_p3) target bundleno = 1341 (0x53d), region = 44 }
   0xc   : > { %p311_p4 = scmp.lt.s32.totalorder %s4068_s24, 1  ;;  %vm1123_vm0 = vcmask 1043456   ;;  %v1513_v0 = vld [vmem:[%s6397_s1 + $0x28] sm:$0xf]  ;;  %v1511_v1 = vld [vmem:[%s6397_s1 + $0x18] sm:$0xff]  ;;  %v1510_v3 = vld [vmem:[%s6397_s1 + $0x10] sm:$0xff] }
   0xd   : > { %3732 = vmatprep.subr.msk.mxu0 %vm1123_vm0, %v1513_v0  ;;  %v1512_v2 = vld [vmem:[%s6397_s1 + $0x20] sm:$0xf]  ;;  %v1509_v4 = vld [vmem:[%s6397_s1 + $0x8] sm:$0xff]  ;;  %v6404_v6 = vmov 0.0   ;;  %vm460_vm1 = vcmask 1046528   ;;  %vm902_vm2 = vcmask 1044480  }
   0xe   : > { %s6512_s24 = smov (!%p311_p4, %s4068_s24), 1  ;;  %3733 = vmatpush1.msk.msra.mxu0 %vm1123_vm0, %v1512_v2  ;;  %v1508_v5 = vld [vmem:[%s6397_s1] sm:$0xff]  ;;  %1705 = vmatprep.mubr.f32.mxu0 %v6404_v6  ;;  %vm681_vm3 = vcmask 1045504   ;;  %s4079_s21 = smov 4   ;;  %vm1344_vm4 = vcmask 31744   ;;  %vm1385_vm5 = vcmask 64512  }
   0xf   : > { %s4019_s15 = smul.u32 480, %s6512_s24  ;;  %1669 = vmatprep.subr.mxu0 %v1511_v1  ;;  %2084 = vmatprep.subr.mxu1 %v6404_v6  ;;  %s4080_s22 = smov 12   ;;  %vm1426_vm6 = vcmask 97280   ;;  %vm1467_vm7 = vcmask 130048   ;;  %vm1514_vm8 = vcmask 162816   ;;  %vm1987_vm9 = vcmask 261120  }
  0x10   : > { %1670 = vmatpush1.msra.mxu0 %v1510_v3  ;;  %s4081_s23 = smov 8   ;;  %s4082_s28 = smov 16  }
  0x11   : > { %s4170_s20 = scalar_lea.vmem %s6396_s0, %s4019_s15  ;;  %1671 = vmatprep.subr.mxu0 %v1509_v4  ;;  %s4018_s14 = sshll.u32 %s6512_s24, 3 }
  0x12   : > { %v4173_v7 = vld [vmem:[%s4170_s20] sm:$0xff]  ;;  %v4176_v8 = vld [vmem:[%s4170_s20 + $0x8] sm:$0xff]  ;;  %1672 = vmatpush1.msra.mxu0 %v1508_v5  ;;  %v342_v17 = vld [vmem:[%s4170_s20 + $0x10] sm:$0xff]  ;;  %s338_s17 = scalar_lea.vmem %s6403_s7, %s4018_s14 }
  0x13   : > { %v461_v9 = vrot.slane %v4173_v7, 1  ;;  %v462_v10 = vrot.slane %v4176_v8, 1  ;;  %v903_v11 = vrot.slane %v4173_v7, 3  ;;  %v904_v12 = vrot.slane %v4176_v8, 3  ;;  %2315 = vmatprep.subr.mxu0 %v6404_v6  ;;  %v4199_v28 = vld [vmem:[%s4170_s20 + $0x18] sm:$0xff]  ;;  %v4202_v29 = vld [vmem:[%s4170_s20 + $0x20] sm:$0xff] }
  0x14   : > { %v682_v13 = vrot.slane %v4173_v7, 2  ;;  %v683_v14 = vrot.slane %v4176_v8, 2  ;;  %v1124_v15 = vrot.slane %v4173_v7, 4  ;;  %v1125_v16 = vrot.slane %v4176_v8, 4  ;;  %v345_v42 = vld [vmem:[%s4170_s20 + $0x28] sm:$0xff]  ;;  %v4230_v51 = vld [vmem:[%s4170_s20 + $0x30] sm:$0xff] }
  0x15   : > { %v463_v18 = vsel %vm460_vm1, %v461_v9, %v462_v10  ;;  %v905_v19 = vsel %vm902_vm2, %v903_v11, %v904_v12  ;;  %v464_v22 = vrot.slane %v342_v17, 1  ;;  %v685_v23 = vrot.slane %v342_v17, 2  ;;  %v4233_v52 = vld [vmem:[%s4170_s20 + $0x38] sm:$0xff]  ;;  %v348_v1 = vld [vmem:[%s4170_s20 + $0x40] sm:$0xff] }
  0x16   : > { %561 = vrot.lane.b32.xlu0 %v463_v18, %s4079_s21  ;;  %1003 = vrot.lane.b32.xlu1 %v905_v19, %s4080_s22  ;;  %v684_v20 = vsel %vm681_vm3, %v682_v13, %v683_v14  ;;  %v1126_v21 = vsel %vm1123_vm0, %v1124_v15, %v1125_v16  ;;  %v906_v26 = vrot.slane %v342_v17, 3  ;;  %v1127_v27 = vrot.slane %v342_v17, 4  ;;  %v4261_v13 = vld [vmem:[%s4170_s20 + $0x48] sm:$0xff] }
  0x17   : > { %v465_v24 = vsel %vm460_vm1, %v462_v10, %v464_v22  ;;  %v686_v25 = vsel %vm681_vm3, %v683_v14, %v685_v23  ;;  %v466_v30 = vrot.slane %v4199_v28, 1  ;;  %v467_v31 = vrot.slane %v4202_v29, 1  ;;  %v4264_v14 = vld [vmem:[%s4170_s20 + $0x50] sm:$0xff] }
  0x18   : > { %v907_v32 = vsel %vm902_vm2, %v904_v12, %v906_v26  ;;  %v1128_v33 = vsel %vm1123_vm0, %v1125_v16, %v1127_v27  ;;  %v687_v34 = vrot.slane %v4199_v28, 2  ;;  %v688_v35 = vrot.slane %v4202_v29, 2  ;;  %v351_v27 = vld [vmem:[%s4170_s20 + $0x58] sm:$0xff] }
  0x19   : > { %v468_v36 = vsel %vm460_vm1, %v466_v30, %v467_v31  ;;  %v908_v37 = vrot.slane %v4199_v28, 3  ;;  %v909_v39 = vrot.slane %v4202_v29, 3  ;;  %v1129_v40 = vrot.slane %v4199_v28, 4 }
  0x1a   : > { %782 = vrot.lane.b32.xlu0 %v684_v20, %s4081_s23  ;;  %1224 = vrot.lane.b32.xlu1 %v1126_v21, %s4082_s28  ;;  %v689_v38 = vsel %vm681_vm3, %v687_v34, %v688_v35  ;;  %v1130_v41 = vrot.slane %v4202_v29, 4  ;;  %v469_v45 = vrot.slane %v345_v42, 1  ;;  %v690_v46 = vrot.slane %v345_v42, 2 }
  0x1b   : > { %v910_v43 = vsel %vm902_vm2, %v908_v37, %v909_v39  ;;  %v911_v49 = vrot.slane %v345_v42, 3  ;;  %v1132_v50 = vrot.slane %v345_v42, 4  ;;  %v471_v53 = vrot.slane %v4230_v51, 1 }
  0x1c   : > { %v1131_v44 = vsel %vm1123_vm0, %v1129_v40, %v1130_v41  ;;  %v470_v47 = vsel %vm460_vm1, %v467_v31, %v469_v45  ;;  %v691_v48 = vsel %vm681_vm3, %v688_v35, %v690_v46  ;;  %v472_v54 = vrot.slane %v4233_v52, 1 }
  0x1d   : > { %v912_v55 = vsel %vm902_vm2, %v909_v39, %v911_v49  ;;  %v1133_v56 = vsel %vm1123_vm0, %v1130_v41, %v1132_v50  ;;  %v692_v57 = vrot.slane %v4230_v51, 2  ;;  %v693_v58 = vrot.slane %v4233_v52, 2  ;;  %v4295_v39 = vld [vmem:[%s4170_s20 + $0x68] sm:$0xff] }
  0x1e   : > { %563 = vrot.lane.b32.xlu0 %v465_v24, %s4079_s21  ;;  %784 = vrot.lane.b32.xlu1 %v686_v25, %s4081_s23  ;;  %v473_v59 = vsel %vm460_vm1, %v471_v53, %v472_v54  ;;  %v913_v60 = vrot.slane %v4230_v51, 3  ;;  %v914_v62 = vrot.slane %v4233_v52, 3  ;;  %v1134_v63 = vrot.slane %v4230_v51, 4 }
  0x1f   : > { %v694_v61 = vsel %vm681_vm3, %v692_v57, %v693_v58  ;;  %v1135_v0 = vrot.slane %v4233_v52, 4  ;;  %v474_v4 = vrot.slane %v348_v1, 1  ;;  %v695_v5 = vrot.slane %v348_v1, 2 }
  0x20   : > { %v915_v2 = vsel %vm902_vm2, %v913_v60, %v914_v62  ;;  %v916_v11 = vrot.slane %v348_v1, 3  ;;  %v1137_v12 = vrot.slane %v348_v1, 4  ;;  %v476_v15 = vrot.slane %v4261_v13, 1 }
  0x21   : > { %v1136_v3 = vsel %vm1123_vm0, %v1134_v63, %v1135_v0  ;;  %v475_v9 = vsel %vm460_vm1, %v472_v54, %v474_v4  ;;  %v696_v10 = vsel %vm681_vm3, %v693_v58, %v695_v5  ;;  %v477_v16 = vrot.slane %v4264_v14, 1  ;;  %v354_v54 = vld [vmem:[%s4170_s20 + $0x70] sm:$0xff]  ;;  %v4323_v63 = vld [vmem:[%s4170_s20 + $0x78] sm:$0xff] }
  0x22   : > { %1005 = vrot.lane.b32.xlu0 %v907_v32, %s4080_s22  ;;  %1226 = vrot.lane.b32.xlu1 %v1128_v33, %s4082_s28  ;;  %v917_v17 = vsel %vm902_vm2, %v914_v62, %v916_v11  ;;  %v1138_v18 = vsel %vm1123_vm0, %v1135_v0, %v1137_v12  ;;  %v697_v19 = vrot.slane %v4261_v13, 2  ;;  %v698_v20 = vrot.slane %v4264_v14, 2  ;;  %v4326_v0 = vld [vmem:[%s4170_s20 + $0x80] sm:$0xff] }
  0x23   : > { %v478_v21 = vsel %vm460_vm1, %v476_v15, %v477_v16  ;;  %v918_v22 = vrot.slane %v4261_v13, 3  ;;  %v919_v24 = vrot.slane %v4264_v14, 3  ;;  %v1139_v25 = vrot.slane %v4261_v13, 4 }
  0x24   : > { %v699_v23 = vsel %vm681_vm3, %v697_v19, %v698_v20  ;;  %v1140_v26 = vrot.slane %v4264_v14, 4  ;;  %v479_v32 = vrot.slane %v351_v27, 1  ;;  %v700_v33 = vrot.slane %v351_v27, 2 }
  0x25   : > { %v920_v30 = vsel %vm902_vm2, %v918_v22, %v919_v24  ;;  %v1142_v37 = vrot.slane %v351_v27, 4  ;;  %v482_v41 = vrot.slane %v4295_v39, 1  ;;  %v703_v45 = vrot.slane %v4295_v39, 2 }
  0x26   : > { %565 = vrot.lane.b32.xlu0 %v468_v36, %s4079_s21  ;;  %786 = vrot.lane.b32.xlu1 %v689_v38, %s4081_s23  ;;  %v1141_v31 = vsel %vm1123_vm0, %v1139_v25, %v1140_v26  ;;  %v480_v34 = vsel %vm460_vm1, %v477_v16, %v479_v32  ;;  %v701_v35 = vsel %vm681_vm3, %v698_v20, %v700_v33  ;;  %v921_v36 = vrot.slane %v351_v27, 3  ;;  %v4292_v38 = vld [vmem:[%s4170_s20 + $0x60] sm:$0xff]  ;;  %v4354_v27 = vld [vmem:[%s4170_s20 + $0x90] sm:$0xff] }
  0x27   : > { %v481_v40 = vrot.slane %v4292_v38, 1  ;;  %v924_v49 = vrot.slane %v4295_v39, 3  ;;  %v1144_v50 = vrot.slane %v4292_v38, 4  ;;  %v1145_v53 = vrot.slane %v4295_v39, 4 }
  0x28   : > { %v922_v42 = vsel %vm902_vm2, %v919_v24, %v921_v36  ;;  %v484_v57 = vrot.slane %v354_v54, 1  ;;  %v705_v58 = vrot.slane %v354_v54, 2  ;;  %v1147_v62 = vrot.slane %v354_v54, 4 }
  0x29   : > { %v483_v46 = vsel %vm460_vm1, %v481_v40, %v482_v41  ;;  %v486_v1 = vrot.slane %v4323_v63, 1  ;;  %v707_v5 = vrot.slane %v4323_v63, 2  ;;  %v928_v11 = vrot.slane %v4323_v63, 3 }
  0x2a   : > { %1007 = vrot.lane.b32.xlu0 %v910_v43, %s4080_s22  ;;  %1228 = vrot.lane.b32.xlu1 %v1131_v44, %s4082_s28  ;;  %v1143_v43 = vsel %vm1123_vm0, %v1140_v26, %v1142_v37  ;;  %v702_v44 = vrot.slane %v4292_v38, 2  ;;  %v706_v60 = vsel %vm681_vm3, %v703_v45, %v705_v58  ;;  %v1148_v4 = vsel %vm1123_vm0, %v1145_v53, %v1147_v62 }
  0x2b   : > { %v929_v15 = vrot.slane %v4326_v0, 3  ;;  %v1149_v16 = vrot.slane %v4323_v63, 4  ;;  %v933_v40 = vrot.slane %v4354_v27, 3 }
  0x2d   : > { %v930_v19 = vsel %vm902_vm2, %v928_v11, %v929_v15  ;;  %v363_v11 = vld [vmem:[%s4170_s20 + $0xb8] sm:$0xff] }
  0x2e   : > { %567 = vrot.lane.b32.xlu0 %v470_v47, %s4079_s21  ;;  %788 = vrot.lane.b32.xlu1 %v691_v48, %s4081_s23  ;;  %v923_v47 = vrot.slane %v4292_v38, 3  ;;  %v704_v48 = vsel %vm681_vm3, %v702_v44, %v703_v45  ;;  %v360_v45 = vld [vmem:[%s4170_s20 + $0xa0] sm:$0xff] }
  0x32   : > { %1009 = vrot.lane.b32.xlu0 %v912_v55, %s4080_s22  ;;  %1230 = vrot.lane.b32.xlu1 %v1133_v56, %s4082_s28  ;;  %v925_v55 = vsel %vm902_vm2, %v923_v47, %v924_v49  ;;  %v1146_v56 = vsel %vm1123_vm0, %v1144_v50, %v1145_v53 }
  0x36   : > { %569 = vrot.lane.b32.xlu0 %v473_v59, %s4079_s21  ;;  %790 = vrot.lane.b32.xlu1 %v694_v61, %s4081_s23  ;;  %v485_v59 = vsel %vm460_vm1, %v482_v41, %v484_v57  ;;  %v926_v61 = vrot.slane %v354_v54, 3  ;;  %v936_v54 = vrot.slane %v360_v45, 3  ;;  %v4388_v57 = vld [vmem:[%s4170_s20 + $0xb0] sm:$0xff] }
  0x3a   : > { %1011 = vrot.lane.b32.xlu0 %v915_v2, %s4080_s22  ;;  %1232 = vrot.lane.b32.xlu1 %v1136_v3, %s4082_s28  ;;  %v487_v2 = vrot.slane %v4326_v0, 1  ;;  %v927_v3 = vsel %vm902_vm2, %v924_v49, %v926_v61  ;;  %v715_v49 = vrot.slane %v360_v45, 2 }
  0x3e   : > { %571 = vrot.lane.b32.xlu0 %v475_v9, %s4079_s21  ;;  %792 = vrot.lane.b32.xlu1 %v696_v10, %s4081_s23  ;;  %v708_v9 = vrot.slane %v4326_v0, 2  ;;  %v488_v10 = vsel %vm460_vm1, %v486_v1, %v487_v2  ;;  %v718_v1 = vrot.slane %v4388_v57, 2 }
  0x40   : > { %v709_v12 = vsel %vm681_vm3, %v707_v5, %v708_v9  ;;  %v939_v5 = vrot.slane %v4388_v57, 3 }
  0x42   : > { %1013 = vrot.lane.b32.xlu0 %v917_v17, %s4080_s22  ;;  %1234 = vrot.lane.b32.xlu1 %v1138_v18, %s4082_s28  ;;  %v1150_v17 = vrot.slane %v4326_v0, 4  ;;  %v357_v18 = vld [vmem:[%s4170_s20 + $0x88] sm:$0xff] }
  0x43   : > { %v710_v22 = vrot.slane %v357_v18, 2  ;;  %v931_v25 = vrot.slane %v357_v18, 3  ;;  %v1152_v26 = vrot.slane %v357_v18, 4 }
  0x44   : > { %v1151_v20 = vsel %vm1123_vm0, %v1149_v16, %v1150_v17  ;;  %v499_v16 = vrot.slane %v363_v11, 1 }
  0x45   : > { %v711_v24 = vsel %vm681_vm3, %v708_v9, %v710_v22  ;;  %v932_v33 = vsel %vm902_vm2, %v929_v15, %v931_v25  ;;  %v4419_v25 = vld [vmem:[%s4170_s20 + $0xc8] sm:$0xff] }
  0x46   : > { %573 = vrot.lane.b32.xlu0 %v478_v21, %s4079_s21  ;;  %794 = vrot.lane.b32.xlu1 %v699_v23, %s4081_s23  ;;  %v489_v21 = vrot.slane %v357_v18, 1 }
  0x48   : > { %v490_v23 = vsel %vm460_vm1, %v487_v2, %v489_v21 }
  0x4a   : > { %1015 = vrot.lane.b32.xlu0 %v920_v30, %s4080_s22  ;;  %1236 = vrot.lane.b32.xlu1 %v1141_v31, %s4082_s28  ;;  %v4357_v30 = vld [vmem:[%s4170_s20 + $0x98] sm:$0xff]  ;;  %v491_v31 = vrot.slane %v4354_v27, 1 }
  0x4b   : > { %v492_v32 = vrot.slane %v4357_v30, 1  ;;  %v713_v36 = vrot.slane %v4357_v30, 2  ;;  %v1155_v44 = vrot.slane %v4357_v30, 4 }
  0x4d   : > { %v493_v37 = vsel %vm460_vm1, %v491_v31, %v492_v32  ;;  %v716_v53 = vsel %vm681_vm3, %v713_v36, %v715_v49  ;;  %v944_v49 = vrot.slane %v4419_v25, 3 }
  0x4e   : > { %575 = vrot.lane.b32.xlu0 %v480_v34, %s4079_s21  ;;  %796 = vrot.lane.b32.xlu1 %v701_v35, %s4081_s23  ;;  %v1153_v34 = vsel %vm1123_vm0, %v1150_v17, %v1152_v26  ;;  %v712_v35 = vrot.slane %v4354_v27, 2  ;;  %v720_v17 = vrot.slane %v363_v11, 2 }
  0x50   : > { %v714_v41 = vsel %vm681_vm3, %v712_v35, %v713_v36  ;;  %v721_v22 = vsel %vm681_vm3, %v718_v1, %v720_v17 }
  0x52   : > { %1017 = vrot.lane.b32.xlu0 %v922_v42, %s4080_s22  ;;  %1238 = vrot.lane.b32.xlu1 %v1143_v43, %s4082_s28  ;;  %v934_v42 = vrot.slane %v4357_v30, 3  ;;  %v1154_v43 = vrot.slane %v4354_v27, 4 }
  0x54   : > { %v1156_v47 = vsel %vm1123_vm0, %v1154_v43, %v1155_v44 }
  0x56   : > { %577 = vrot.lane.b32.xlu0 %v483_v46, %s4079_s21  ;;  %798 = vrot.lane.b32.xlu1 %v704_v48, %s4081_s23  ;;  %v935_v46 = vsel %vm902_vm2, %v933_v40, %v934_v42  ;;  %v494_v48 = vrot.slane %v360_v45, 1 }
  0x58   : > { %v495_v50 = vsel %vm460_vm1, %v492_v32, %v494_v48 }
  0x5a   : > { %1019 = vrot.lane.b32.xlu0 %v925_v55, %s4080_s22  ;;  %1240 = vrot.lane.b32.xlu1 %v1146_v56, %s4082_s28  ;;  %v1157_v55 = vrot.slane %v360_v45, 4  ;;  %v4385_v56 = vld [vmem:[%s4170_s20 + $0xa8] sm:$0xff] }
  0x5b   : > { %v496_v58 = vrot.slane %v4385_v56, 1  ;;  %v717_v62 = vrot.slane %v4385_v56, 2  ;;  %v1159_v9 = vrot.slane %v4385_v56, 4 }
  0x5c   : > { %v1158_v61 = vsel %vm1123_vm0, %v1155_v44, %v1157_v55 }
  0x5e   : > { %579 = vrot.lane.b32.xlu0 %v485_v59, %s4079_s21  ;;  %800 = vrot.lane.b32.xlu1 %v706_v60, %s4081_s23  ;;  %v497_v59 = vrot.slane %v4388_v57, 1  ;;  %v937_v60 = vsel %vm902_vm2, %v934_v42, %v936_v54  ;;  %v723_v42 = vrot.slane %v4419_v25, 2 }
  0x60   : > { %v498_v2 = vsel %vm460_vm1, %v496_v58, %v497_v59  ;;  %v500_v21 = vsel %vm460_vm1, %v497_v59, %v499_v16  ;;  %v366_v58 = vld [vmem:[%s4170_s20 + $0xd0] sm:$0xff]  ;;  %v4466_v16 = vld [vmem:[%s4170_s20 + $0xe0] sm:$0xff] }
  0x62   : > { %1021 = vrot.lane.b32.xlu0 %v927_v3, %s4080_s22  ;;  %1242 = vrot.lane.b32.xlu1 %v1148_v4, %s4082_s28  ;;  %v938_v3 = vrot.slane %v4385_v56, 3  ;;  %v719_v4 = vsel %vm681_vm3, %v717_v62, %v718_v1  ;;  %v504_v1 = vrot.slane %v366_v58, 1 }
  0x66   : > { %581 = vrot.lane.b32.xlu0 %v488_v10, %s4079_s21  ;;  %802 = vrot.lane.b32.xlu1 %v709_v12, %s4081_s23  ;;  %v1160_v10 = vrot.slane %v4388_v57, 4  ;;  %v940_v12 = vsel %vm902_vm2, %v938_v3, %v939_v5 }
  0x68   : > { %v1161_v15 = vsel %vm1123_vm0, %v1159_v9, %v1160_v10 }
  0x6a   : > { %1023 = vrot.lane.b32.xlu0 %v930_v19, %s4080_s22  ;;  %1244 = vrot.lane.b32.xlu1 %v1151_v20, %s4082_s28  ;;  %v941_v20 = vrot.slane %v363_v11, 3 }
  0x6c   : > { %v942_v35 = vsel %vm902_vm2, %v939_v5, %v941_v20 }
  0x6e   : > { %583 = vrot.lane.b32.xlu0 %v490_v23, %s4079_s21  ;;  %804 = vrot.lane.b32.xlu1 %v711_v24, %s4081_s23  ;;  %v1162_v23 = vrot.slane %v363_v11, 4  ;;  %v4416_v24 = vld [vmem:[%s4170_s20 + $0xc0] sm:$0xff]  ;;  %v946_v11 = vrot.slane %v366_v58, 3 }
  0x6f   : > { %v501_v36 = vrot.slane %v4416_v24, 1 }
  0x70   : > { %v1163_v40 = vsel %vm1123_vm0, %v1160_v10, %v1162_v23  ;;  %v947_v23 = vsel %vm902_vm2, %v944_v49, %v946_v11 }
  0x72   : > { %1025 = vrot.lane.b32.xlu0 %v932_v33, %s4080_s22  ;;  %1246 = vrot.lane.b32.xlu1 %v1153_v34, %s4082_s28 }
  0x76   : > { %585 = vrot.lane.b32.xlu0 %v493_v37, %s4079_s21  ;;  %806 = vrot.lane.b32.xlu1 %v714_v41, %s4081_s23  ;;  %v502_v37 = vrot.slane %v4419_v25, 1  ;;  %v722_v41 = vrot.slane %v4416_v24, 2 }
  0x78   : > { %v724_v48 = vsel %vm681_vm3, %v722_v41, %v723_v42  ;;  %v505_v9 = vsel %vm460_vm1, %v502_v37, %v504_v1  ;;  %v4511_v1 = vld [vmem:[%s4170_s20 + $0xf8] sm:$0xff] }
  0x7a   : > { %1027 = vrot.lane.b32.xlu0 %v935_v46, %s4080_s22  ;;  %1248 = vrot.lane.b32.xlu1 %v1156_v47, %s4082_s28  ;;  %v503_v46 = vsel %vm460_vm1, %v501_v36, %v502_v37  ;;  %v943_v47 = vrot.slane %v4416_v24, 3 }
  0x7e   : > { %587 = vrot.lane.b32.xlu0 %v495_v50, %s4079_s21  ;;  %808 = vrot.lane.b32.xlu1 %v716_v53, %s4081_s23  ;;  %v1164_v50 = vrot.slane %v4416_v24, 4  ;;  %v1165_v53 = vrot.slane %v4419_v25, 4 }
  0x80   : > { %v1166_v62 = vsel %vm1123_vm0, %v1164_v50, %v1165_v53 }
  0x82   : > { %1029 = vrot.lane.b32.xlu0 %v937_v60, %s4080_s22  ;;  %1250 = vrot.lane.b32.xlu1 %v1158_v61, %s4082_s28  ;;  %v945_v61 = vsel %vm902_vm2, %v943_v47, %v944_v49 }
  0x86   : > { %589 = vrot.lane.b32.xlu0 %v498_v2, %s4079_s21  ;;  %810 = vrot.lane.b32.xlu1 %v719_v4, %s4081_s23  ;;  %v725_v2 = vrot.slane %v366_v58, 2 }
  0x88   : > { %v562_v18 = vpop.permute.xlu0 %561  ;;  %v1004_v19 = vpop.permute.xlu1 %1003  ;;  %v726_v10 = vsel %vm681_vm3, %v723_v42, %v725_v2  ;;  %v1170_v42 = vrot.slane %v4466_v16, 4 }
  0x89   : > { %v1345_v26 = vsel %vm1344_vm4, %v4173_v7, %v562_v18 }
  0x8a   : > { %1031 = vrot.lane.b32.xlu0 %v940_v12, %s4080_s22  ;;  %1252 = vrot.lane.b32.xlu1 %v1161_v15, %s4082_s28  ;;  %v1167_v12 = vrot.slane %v366_v58, 4  ;;  %v4463_v15 = vld [vmem:[%s4170_s20 + $0xd8] sm:$0xff] }
  0x8b   : > { %v948_v37 = vrot.slane %v4463_v15, 3  ;;  %v1169_v41 = vrot.slane %v4463_v15, 4 }
  0x8c   : > { %v783_v31 = vpop.permute.xlu0 %782  ;;  %v1225_v32 = vpop.permute.xlu1 %1224 }
  0x8d   : > { %v1386_v33 = vsel %vm1385_vm5, %v1345_v26, %v783_v31  ;;  %v1168_v26 = vsel %vm1123_vm0, %v1165_v53, %v1167_v12  ;;  %v727_v31 = vrot.slane %v4463_v15, 2  ;;  %v1171_v49 = vsel %vm1123_vm0, %v1169_v41, %v1170_v42 }
  0x8e   : > { %v1427_v34 = vsel %vm1426_vm6, %v1386_v33, %v1004_v19  ;;  %591 = vrot.lane.b32.xlu0 %v500_v21, %s4079_s21  ;;  %812 = vrot.lane.b32.xlu1 %v721_v22, %s4081_s23  ;;  %v506_v21 = vrot.slane %v4463_v15, 1  ;;  %v507_v22 = vrot.slane %v4466_v16, 1 }
  0x8f   : > { %v1468_v7 = vsel %vm1467_vm7, %v1427_v34, %v1225_v32  ;;  %v728_v32 = vrot.slane %v4466_v16, 2 }
  0x90   : > { %3734 = vmatmul.mubr.msk.f32.vlgmr.msra.gmra.mxu0 %vm1514_vm8, %v1468_v7  ;;  %v564_v43 = vpop.permute.xlu0 %563  ;;  %v785_v44 = vpop.permute.xlu1 %784  ;;  %v508_v36 = vsel %vm460_vm1, %v506_v21, %v507_v22 }
  0x91   : > { %v1346_v45 = vsel %vm1344_vm4, %v4176_v8, %v564_v43  ;;  %1711 = vmatprep.mubr.f32.mxu0 %v6404_v6  ;;  %v729_v7 = vsel %vm681_vm3, %v727_v31, %v728_v32 }
  0x92   : > { %1033 = vrot.lane.b32.xlu0 %v942_v35, %s4080_s22  ;;  %1254 = vrot.lane.b32.xlu1 %v1163_v40, %s4082_s28  ;;  %v1387_v8 = vsel %vm1385_vm5, %v1346_v45, %v785_v44  ;;  %v949_v40 = vrot.slane %v4466_v16, 3  ;;  %v369_v45 = vld [vmem:[%s4170_s20 + $0xe8] sm:$0xff] }
  0x93   : > { %v509_v50 = vrot.slane %v369_v45, 1  ;;  %v730_v53 = vrot.slane %v369_v45, 2 }
  0x94   : > { %v1006_v54 = vpop.permute.xlu0 %1005  ;;  %v1227_v55 = vpop.permute.xlu1 %1226 }
  0x95   : > { %v1428_v59 = vsel %vm1426_vm6, %v1387_v8, %v1006_v54  ;;  %v510_v58 = vsel %vm460_vm1, %v507_v22, %v509_v50  ;;  %v4556_v50 = vld [vmem:[%s4170_s20 + $0x108] sm:$0xff] }
  0x96   : > { %v1469_v60 = vsel %vm1467_vm7, %v1428_v59, %v1227_v55  ;;  %593 = vrot.lane.b32.xlu0 %v503_v46, %s4079_s21  ;;  %814 = vrot.lane.b32.xlu1 %v724_v48, %s4081_s23  ;;  %v950_v48 = vsel %vm902_vm2, %v948_v37, %v949_v40  ;;  %v731_v59 = vsel %vm681_vm3, %v728_v32, %v730_v53  ;;  %v1175_v32 = vrot.slane %v4511_v1, 4  ;;  %v4559_v53 = vld [vmem:[%s4170_s20 + $0x110] sm:$0xff] }
  0x97   : > { %3735 = vmatmul.mubr.msk.f32.gmra.mxu0 %vm1514_vm8, %v1469_v60  ;;  %v951_v60 = vrot.slane %v369_v45, 3 }
  0x98   : > { %v566_v3 = vpop.permute.xlu0 %565  ;;  %v787_v4 = vpop.permute.xlu1 %786  ;;  %1717 = vmatprep.mubr.f32.mxu0 %v6404_v6 }
  0x99   : > { %v1347_v5 = vsel %vm1344_vm4, %v4199_v28, %v566_v3  ;;  %v952_v11 = vsel %vm902_vm2, %v949_v40, %v951_v60  ;;  %v516_v60 = vrot.slane %v4556_v50, 1 }
  0x9a   : > { %1035 = vrot.lane.b32.xlu0 %v945_v61, %s4080_s22  ;;  %1256 = vrot.lane.b32.xlu1 %v1166_v62, %s4082_s28  ;;  %v1388_v17 = vsel %vm1385_vm5, %v1347_v5, %v787_v4  ;;  %v1172_v61 = vrot.slane %v369_v45, 4  ;;  %v4508_v62 = vld [vmem:[%s4170_s20 + $0xf0] sm:$0xff]  ;;  %v3789_v45 = vld [vmem:[%s6398_s2 + $0x118] sm:$0xff] }
  0x9b   : > { %v953_v22 = vrot.slane %v4508_v62, 3  ;;  %v1174_v31 = vrot.slane %v4508_v62, 4  ;;  %2085 = vmatpush1.msra.mxu1 %v3789_v45 }
  0x9c   : > { %v1008_v18 = vpop.permute.xlu0 %1007  ;;  %v1229_v19 = vpop.permute.xlu1 %1228  ;;  %v1173_v12 = vsel %vm1123_vm0, %v1170_v42, %v1172_v61  ;;  %2086 = vmatprep.subr.mxu1 %v6404_v6  ;;  %v517_v61 = vrot.slane %v4559_v53, 1 }
  0x9d   : > { %v1429_v28 = vsel %vm1426_vm6, %v1388_v17, %v1008_v18  ;;  %v732_v17 = vrot.slane %v4508_v62, 2  ;;  %v733_v18 = vrot.slane %v4511_v1, 2  ;;  %v1176_v40 = vsel %vm1123_vm0, %v1174_v31, %v1175_v32  ;;  %v3785_v31 = vld [vmem:[%s6398_s2 + $0xf8] sm:$0xff] }
  0x9e   : > { %v1470_v20 = vsel %vm1467_vm7, %v1429_v28, %v1229_v19  ;;  %595 = vrot.lane.b32.xlu0 %v505_v9, %s4079_s21  ;;  %816 = vrot.lane.b32.xlu1 %v726_v10, %s4081_s23  ;;  %v511_v9 = vrot.slane %v4508_v62, 1  ;;  %v512_v10 = vrot.slane %v4511_v1, 1 }
  0x9f   : > { %3736 = vmatmul.mubr.msk.f32.gmra.mxu0 %vm1514_vm8, %v1470_v20 }
  0xa0   : > { %v568_v33 = vpop.permute.xlu0 %567  ;;  %v789_v34 = vpop.permute.xlu1 %788  ;;  %1723 = vmatprep.mubr.f32.mxu0 %v6404_v6  ;;  %v513_v21 = vsel %vm460_vm1, %v511_v9, %v512_v10 }
  0xa1   : > { %v1348_v35 = vsel %vm1344_vm4, %v4202_v29, %v568_v33 }
  0xa2   : > { %1037 = vrot.lane.b32.xlu0 %v947_v23, %s4080_s22  ;;  %1258 = vrot.lane.b32.xlu1 %v1168_v26, %s4082_s28  ;;  %v1389_v43 = vsel %vm1385_vm5, %v1348_v35, %v789_v34  ;;  %v734_v23 = vsel %vm681_vm3, %v732_v17, %v733_v18  ;;  %v954_v26 = vrot.slane %v4511_v1, 3  ;;  %v372_v35 = vld [vmem:[%s4170_s20 + $0x100] sm:$0xff]  ;;  %v518_v17 = vsel %vm460_vm1, %v516_v60, %v517_v61  ;;  %v3781_v60 = vld [vmem:[%s6398_s2 + $0xd8] sm:$0xff] }
  0xa3   : > { %v514_v41 = vrot.slane %v372_v35, 1  ;;  %v735_v42 = vrot.slane %v372_v35, 2 }
  0xa4   : > { %v1010_v44 = vpop.permute.xlu0 %1009  ;;  %v1231_v29 = vpop.permute.xlu1 %1230 }
  0xa5   : > { %v1430_v46 = vsel %vm1426_vm6, %v1389_v43, %v1010_v44 }
  0xa6   : > { %v1471_v47 = vsel %vm1467_vm7, %v1430_v46, %v1231_v29  ;;  %597 = vrot.lane.b32.xlu0 %v508_v36, %s4079_s21  ;;  %818 = vrot.lane.b32.xlu1 %v729_v7, %s4081_s23  ;;  %v955_v7 = vsel %vm902_vm2, %v953_v22, %v954_v26  ;;  %v515_v46 = vsel %vm460_vm1, %v512_v10, %v514_v41 }
  0xa7   : > { %3737 = vmatmul.mubr.msk.f32.gmra.mxu0 %vm1514_vm8, %v1471_v47  ;;  %v736_v47 = vsel %vm681_vm3, %v733_v18, %v735_v42  ;;  %v958_v18 = vrot.slane %v4556_v50, 3  ;;  %v3783_v42 = vld [vmem:[%s6398_s2 + $0xe8] sm:$0xff] }
  0xa8   : > { %v570_v8 = vpop.permute.xlu0 %569  ;;  %v791_v54 = vpop.permute.xlu1 %790  ;;  %1729 = vmatprep.mubr.f32.mxu0 %v6404_v6 }
  0xa9   : > { %v1349_v55 = vsel %vm1344_vm4, %v4230_v51, %v570_v8 }
  0xaa   : > { %1039 = vrot.lane.b32.xlu0 %v950_v48, %s4080_s22  ;;  %1260 = vrot.lane.b32.xlu1 %v1171_v49, %s4082_s28  ;;  %v1390_v2 = vsel %vm1385_vm5, %v1349_v55, %v791_v54  ;;  %v956_v48 = vrot.slane %v372_v35, 3  ;;  %v1177_v49 = vrot.slane %v372_v35, 4 }
  0xac   : > { %v1012_v3 = vpop.permute.xlu0 %1011  ;;  %v1233_v4 = vpop.permute.xlu1 %1232 }
  0xad   : > { %v1431_v51 = vsel %vm1426_vm6, %v1390_v2, %v1012_v3  ;;  %v957_v2 = vsel %vm902_vm2, %v954_v26, %v956_v48  ;;  %v1178_v3 = vsel %vm1123_vm0, %v1175_v32, %v1177_v49  ;;  %v375_v26 = vld [vmem:[%s4170_s20 + $0x118] sm:$0xff] }
  0xae   : > { %v1472_v5 = vsel %vm1467_vm7, %v1431_v51, %v1233_v4  ;;  %599 = vrot.lane.b32.xlu0 %v510_v58, %s4079_s21  ;;  %820 = vrot.lane.b32.xlu1 %v731_v59, %s4081_s23  ;;  %v3788_v58 = vld [vmem:[%s6398_s2 + $0x110] sm:$0xff]  ;;  %v737_v4 = vrot.slane %v4556_v50, 2  ;;  %v738_v51 = vrot.slane %v4559_v53, 2  ;;  %v961_v45 = vrot.slane %v375_v26, 3 }
  0xaf   : > { %3738 = vmatmul.mubr.msk.f32.gmra.mxu0 %vm1514_vm8, %v1472_v5  ;;  %2087 = vmatpush1.msra.mxu1 %v3788_v58  ;;  %v3787_v5 = vld [vmem:[%s6398_s2 + $0x108] sm:$0xff] }
  0xb0   : > { %v572_v19 = vpop.permute.xlu0 %571  ;;  %v793_v28 = vpop.permute.xlu1 %792  ;;  %1735 = vmatprep.mubr.f32.mxu0 %v6404_v6  ;;  %2088 = vmatprep.subr.mxu1 %v6404_v6 }
  0xb1   : > { %v1350_v20 = vsel %vm1344_vm4, %v4233_v52, %v572_v19  ;;  %2089 = vmatpush1.msra.mxu1 %v3787_v5  ;;  %v739_v19 = vsel %vm681_vm3, %v737_v4, %v738_v51  ;;  %v3780_v5 = vld [vmem:[%s6398_s2 + $0xd0] sm:$0xff] }
  0xb2   : > { %1041 = vrot.lane.b32.xlu0 %v952_v11, %s4080_s22  ;;  %1262 = vrot.lane.b32.xlu1 %v1173_v12, %s4082_s28  ;;  %v1391_v33 = vsel %vm1385_vm5, %v1350_v20, %v793_v28  ;;  %v3786_v12 = vld [vmem:[%s6398_s2 + $0x100] sm:$0xff]  ;;  %v959_v28 = vrot.slane %v4559_v53, 3  ;;  %v1179_v20 = vrot.slane %v4556_v50, 4 }
  0xb3   : > { %2090 = vmatprep.subr.mxu1 %v6404_v6 }
  0xb4   : > { %v1014_v34 = vpop.permute.xlu0 %1013  ;;  %v1235_v52 = vpop.permute.xlu1 %1234  ;;  %2091 = vmatpush1.msra.mxu1 %v3786_v12 }
  0xb5   : > { %v1432_v36 = vsel %vm1426_vm6, %v1391_v33, %v1014_v34  ;;  %2092 = vmatprep.subr.mxu1 %v6404_v6  ;;  %v3784_v34 = vld [vmem:[%s6398_s2 + $0xf0] sm:$0xff] }
  0xb6   : > { %v1473_v37 = vsel %vm1467_vm7, %v1432_v36, %v1235_v52  ;;  %601 = vrot.lane.b32.xlu0 %v513_v21, %s4079_s21  ;;  %822 = vrot.lane.b32.xlu1 %v734_v23, %s4081_s23  ;;  %v960_v52 = vsel %vm902_vm2, %v958_v18, %v959_v28  ;;  %v519_v36 = vrot.slane %v375_v26, 1 }
  0xb7   : > { %3739 = vmatmul.mubr.msk.f32.gmra.mxu0 %vm1514_vm8, %v1473_v37  ;;  %v740_v37 = vrot.slane %v375_v26, 2  ;;  %2093 = vmatpush1.msra.mxu1 %v3785_v31 }
  0xb8   : > { %v574_v43 = vpop.permute.xlu0 %573  ;;  %v795_v44 = vpop.permute.xlu1 %794  ;;  %1741 = vmatprep.mubr.f32.mxu0 %v6404_v6  ;;  %2094 = vmatprep.subr.mxu1 %v6404_v6 }
  0xb9   : > { %v1351_v29 = vsel %vm1344_vm4, %v4261_v13, %v574_v43  ;;  %2095 = vmatpush1.msra.mxu1 %v3784_v34  ;;  %v4622_v43 = vld [vmem:[%s4170_s20 + $0x120] sm:$0xff] }
  0xba   : > { %1043 = vrot.lane.b32.xlu0 %v955_v7, %s4080_s22  ;;  %1264 = vrot.lane.b32.xlu1 %v1176_v40, %s4082_s28  ;;  %v1392_v13 = vsel %vm1385_vm5, %v1351_v29, %v795_v44  ;;  %v520_v44 = vsel %vm460_vm1, %v517_v61, %v519_v36  ;;  %v741_v29 = vsel %vm681_vm3, %v738_v51, %v740_v37  ;;  %v742_v58 = vrot.slane %v4622_v43, 2  ;;  %v3777_v36 = vld [vmem:[%s6398_s2 + $0xb8] sm:$0xff] }
  0xbb   : > { %2096 = vmatprep.subr.mxu1 %v6404_v6  ;;  %v962_v61 = vsel %vm902_vm2, %v959_v28, %v961_v45  ;;  %v4691_v37 = vld [vmem:[%s4170_s20 + $0x138] sm:$0xff] }
  0xbc   : > { %v1016_v8 = vpop.permute.xlu0 %1015  ;;  %v1237_v54 = vpop.permute.xlu1 %1236  ;;  %2097 = vmatpush1.msra.mxu1 %v3783_v42 }
  0xbd   : > { %v1433_v55 = vsel %vm1426_vm6, %v1392_v13, %v1016_v8  ;;  %v521_v8 = vrot.slane %v4622_v43, 1  ;;  %2098 = vmatprep.subr.mxu1 %v6404_v6 }
  0xbe   : > { %v1474_v59 = vsel %vm1467_vm7, %v1433_v55, %v1237_v54  ;;  %603 = vrot.lane.b32.xlu0 %v515_v46, %s4079_s21  ;;  %824 = vrot.lane.b32.xlu1 %v736_v47, %s4081_s23  ;;  %v1182_v46 = vrot.slane %v375_v26, 4  ;;  %v4627_v47 = vld [vmem:[%s4170_s20 + $0x128] sm:$0xff] }
  0xbf   : > { %3740 = vmatmul.mubr.msk.f32.gmra.mxu0 %vm1514_vm8, %v1474_v59  ;;  %v522_v55 = vrot.slane %v4627_v47, 1  ;;  %v743_v59 = vrot.slane %v4627_v47, 2  ;;  %v964_v12 = vrot.slane %v4627_v47, 3 }
  0xc0   : > { %v576_v9 = vpop.permute.xlu0 %575  ;;  %v797_v10 = vpop.permute.xlu1 %796  ;;  %1747 = vmatprep.mubr.f32.mxu0 %v6404_v6 }
  0xc1   : > { %v1352_v11 = vsel %vm1344_vm4, %v4264_v14, %v576_v9  ;;  %v1180_v14 = vrot.slane %v4559_v53, 4  ;;  %v3782_v53 = vld [vmem:[%s6398_s2 + $0xe0] sm:$0xff]  ;;  %v523_v9 = vsel %vm460_vm1, %v521_v8, %v522_v55  ;;  %v3775_v8 = vld [vmem:[%s6398_s2 + $0xa8] sm:$0xff] }
  0xc2   : > { %1045 = vrot.lane.b32.xlu0 %v957_v2, %s4080_s22  ;;  %1266 = vrot.lane.b32.xlu1 %v1178_v3, %s4082_s28  ;;  %v1393_v21 = vsel %vm1385_vm5, %v1352_v11, %v797_v10  ;;  %v744_v10 = vsel %vm681_vm3, %v742_v58, %v743_v59  ;;  %v963_v11 = vrot.slane %v4622_v43, 3 }
  0xc3   : > { %v1181_v35 = vsel %vm1123_vm0, %v1179_v20, %v1180_v14  ;;  %v1183_v2 = vsel %vm1123_vm0, %v1180_v14, %v1182_v46  ;;  %2099 = vmatpush1.msra.mxu1 %v3782_v53  ;;  %v378_v20 = vld [vmem:[%s4170_s20 + $0x130] sm:$0xff]  ;;  %v3779_v14 = vld [vmem:[%s6398_s2 + $0xc8] sm:$0xff]  ;;  %v747_v53 = vrot.slane %v4691_v37, 2 }
  0xc4   : > { %v1018_v22 = vpop.permute.xlu0 %1017  ;;  %v1239_v23 = vpop.permute.xlu1 %1238  ;;  %2100 = vmatprep.subr.mxu1 %v6404_v6  ;;  %v965_v26 = vsel %vm902_vm2, %v963_v11, %v964_v12  ;;  %v1187_v42 = vrot.slane %v378_v20, 4  ;;  %v3776_v46 = vld [vmem:[%s6398_s2 + $0xb0] sm:$0xff] }
  0xc5   : > { %v1434_v32 = vsel %vm1426_vm6, %v1393_v21, %v1018_v22  ;;  %2101 = vmatpush1.msra.mxu1 %v3781_v60 }
  0xc6   : > { %v1475_v33 = vsel %vm1467_vm7, %v1434_v32, %v1239_v23  ;;  %605 = vrot.lane.b32.xlu0 %v518_v17, %s4079_s21  ;;  %826 = vrot.lane.b32.xlu1 %v739_v19, %s4081_s23  ;;  %v1184_v17 = vrot.slane %v4622_v43, 4  ;;  %v3778_v23 = vld [vmem:[%s6398_s2 + $0xc0] sm:$0xff]  ;;  %v524_v32 = vrot.slane %v378_v20, 1 }
  0xc7   : > { %3741 = vmatmul.mubr.msk.f32.gmra.mxu0 %vm1514_vm8, %v1475_v33  ;;  %2102 = vmatprep.subr.mxu1 %v6404_v6  ;;  %v745_v33 = vrot.slane %v378_v20, 2 }
  0xc8   : > { %v578_v7 = vpop.permute.xlu0 %577  ;;  %v799_v40 = vpop.permute.xlu1 %798  ;;  %1753 = vmatprep.mubr.f32.mxu0 %v6404_v6  ;;  %2103 = vmatpush1.msra.mxu1 %v3780_v5  ;;  %v1189_v5 = vrot.slane %v4691_v37, 4 }
  0xc9   : > { %v1353_v41 = vsel %vm1344_vm4, %v4292_v38, %v578_v7  ;;  %2104 = vmatprep.subr.mxu1 %v6404_v6  ;;  %v525_v7 = vsel %vm460_vm1, %v522_v55, %v524_v32  ;;  %v4760_v32 = vld [vmem:[%s4170_s20 + $0x150] sm:$0xff] }
  0xca   : > { %1047 = vrot.lane.b32.xlu0 %v960_v52, %s4080_s22  ;;  %1268 = vrot.lane.b32.xlu1 %v1181_v35, %s4082_s28  ;;  %v1394_v38 = vsel %vm1385_vm5, %v1353_v41, %v799_v40  ;;  %v746_v40 = vsel %vm681_vm3, %v743_v59, %v745_v33  ;;  %v966_v41 = vrot.slane %v378_v20, 3 }
  0xcb   : > { %2105 = vmatpush1.msra.mxu1 %v3779_v14 }
  0xcc   : > { %v1020_v48 = vpop.permute.xlu0 %1019  ;;  %v1241_v49 = vpop.permute.xlu1 %1240  ;;  %2106 = vmatprep.subr.mxu1 %v6404_v6 }
  0xcd   : > { %v1435_v13 = vsel %vm1426_vm6, %v1394_v38, %v1020_v48  ;;  %2107 = vmatpush1.msra.mxu1 %v3778_v23  ;;  %v526_v38 = vrot.slane %v4691_v37, 1 }
  0xce   : > { %v1476_v54 = vsel %vm1467_vm7, %v1435_v13, %v1241_v49  ;;  %607 = vrot.lane.b32.xlu0 %v520_v44, %s4079_s21  ;;  %828 = vrot.lane.b32.xlu1 %v741_v29, %s4081_s23  ;;  %v4696_v44 = vld [vmem:[%s4170_s20 + $0x140] sm:$0xff] }
  0xcf   : > { %3742 = vmatmul.mubr.msk.f32.gmra.mxu0 %vm1514_vm8, %v1476_v54  ;;  %2108 = vmatprep.subr.mxu1 %v6404_v6  ;;  %v527_v49 = vrot.slane %v4696_v44, 1  ;;  %v748_v13 = vrot.slane %v4696_v44, 2  ;;  %v967_v54 = vsel %vm902_vm2, %v964_v12, %v966_v41  ;;  %v381_v12 = vld [vmem:[%s4170_s20 + $0x148] sm:$0xff]  ;;  %v3790_v41 = vld [vmem:[%s6398_s2 + $0x120] sm:$0xff] }
  0xd0   : > { %v580_v3 = vpop.permute.xlu0 %579  ;;  %v801_v4 = vpop.permute.xlu1 %800  ;;  %1759 = vmatprep.mubr.f32.mxu0 %v6404_v6  ;;  %2109 = vmatpush1.msra.mxu1 %v3777_v36  ;;  %v529_v14 = vrot.slane %v381_v12, 1  ;;  %v4765_v36 = vld [vmem:[%s4170_s20 + $0x158] sm:$0xff] }
  0xd1   : > { %v1354_v51 = vsel %vm1344_vm4, %v4295_v39, %v580_v3  ;;  %v1185_v39 = vrot.slane %v4627_v47, 4  ;;  %2110 = vmatprep.subr.mxu1 %v6404_v6  ;;  %v749_v3 = vsel %vm681_vm3, %v747_v53, %v748_v13 }
  0xd2   : > { %1049 = vrot.lane.b32.xlu0 %v962_v61, %s4080_s22  ;;  %1270 = vrot.lane.b32.xlu1 %v1183_v2, %s4082_s28  ;;  %v1395_v18 = vsel %vm1385_vm5, %v1354_v51, %v801_v4  ;;  %v3774_v61 = vld [vmem:[%s6398_s2 + $0xa0] sm:$0xff]  ;;  %v528_v2 = vsel %vm460_vm1, %v526_v38, %v527_v49  ;;  %v968_v4 = vrot.slane %v4691_v37, 3  ;;  %v969_v51 = vrot.slane %v4696_v44, 3 }
  0xd3   : > { %v1186_v31 = vsel %vm1123_vm0, %v1184_v17, %v1185_v39  ;;  %v1188_v55 = vsel %vm1123_vm0, %v1185_v39, %v1187_v42  ;;  %2111 = vmatpush1.msra.mxu1 %v3776_v46  ;;  %v3793_v17 = vld [vmem:[%s6398_s2 + $0x138] sm:$0xff]  ;;  %v530_v33 = vsel %vm460_vm1, %v527_v49, %v529_v14  ;;  %v752_v46 = vrot.slane %v4760_v32, 2  ;;  %v4816_v14 = vld [vmem:[%s4170_s20 + $0x170] sm:$0xff] }
  0xd4   : > { %v1022_v19 = vpop.permute.xlu0 %1021  ;;  %v1243_v28 = vpop.permute.xlu1 %1242  ;;  %2112 = vmatprep.subr.mxu1 %v6404_v6 }
  0xd5   : > { %v1436_v21 = vsel %vm1426_vm6, %v1395_v18, %v1022_v19  ;;  %2113 = vmatpush1.msra.mxu1 %v3775_v8  ;;  %v3792_v19 = vld [vmem:[%s6398_s2 + $0x130] sm:$0xff] }
  0xd6   : > { %v1477_v22 = vsel %vm1467_vm7, %v1436_v21, %v1243_v28  ;;  %609 = vrot.lane.b32.xlu0 %v523_v9, %s4079_s21  ;;  %830 = vrot.lane.b32.xlu1 %v744_v10, %s4081_s23  ;;  %v970_v28 = vsel %vm902_vm2, %v968_v4, %v969_v51  ;;  %v750_v21 = vrot.slane %v381_v12, 2 }
  0xd7   : > { %3743 = vmatmul.mubr.msk.f32.gmra.mxu0 %vm1514_vm8, %v1477_v22  ;;  %2114 = vmatprep.subr.mxu1 %v6404_v6 }
  0xd8   : > { %v582_v34 = vpop.permute.xlu0 %581  ;;  %v803_v52 = vpop.permute.xlu1 %802  ;;  %1765 = vmatprep.mubr.f32.mxu0 %v6404_v6  ;;  %2115 = vmatpush1.msra.mxu1 %v3774_v61 }
  0xd9   : > { %v1355_v35 = vsel %vm1344_vm4, %v4323_v63, %v582_v34  ;;  %2140 = vmatprep.subr.mxu1 %v6404_v6  ;;  %v751_v34 = vsel %vm681_vm3, %v748_v13, %v750_v21 }
  0xda   : > { %1051 = vrot.lane.b32.xlu0 %v965_v26, %s4080_s22  ;;  %1272 = vrot.lane.b32.xlu1 %v1186_v31, %s4082_s28  ;;  %v1396_v63 = vsel %vm1385_vm5, %v1355_v35, %v803_v52  ;;  %v3791_v31 = vld [vmem:[%s6398_s2 + $0x128] sm:$0xff]  ;;  %v971_v52 = vrot.slane %v381_v12, 3  ;;  %v1192_v35 = vrot.slane %v381_v12, 4 }
  0xdb   : > { %2141 = vmatpush2.msra.mxu1 %v3793_v17 }
  0xdc   : > { %v1024_v29 = vpop.permute.xlu0 %1023  ;;  %v1245_v45 = vpop.permute.xlu1 %1244  ;;  %2142 = vmatprep.subr.mxu1 %v6404_v6  ;;  %v972_v38 = vsel %vm902_vm2, %v969_v51, %v971_v52  ;;  %v758_v52 = vrot.slane %v4816_v14, 2 }
  0xdd   : > { %v1437_v47 = vsel %vm1426_vm6, %v1396_v63, %v1024_v29  ;;  %2143 = vmatpush2.msra.mxu1 %v3792_v19  ;;  %v531_v63 = vrot.slane %v4760_v32, 1 }
  0xde   : > { %v1478_v48 = vsel %vm1467_vm7, %v1437_v47, %v1245_v45  ;;  %611 = vrot.lane.b32.xlu0 %v525_v7, %s4079_s21  ;;  %832 = vrot.lane.b32.xlu1 %v746_v40, %s4081_s23  ;;  %v532_v45 = vrot.slane %v4765_v36, 1  ;;  %v753_v47 = vrot.slane %v4765_v36, 2 }
  0xdf   : > { %3744 = vmatmul.mubr.msk.f32.gmra.mxu0 %vm1514_vm8, %v1478_v48  ;;  %2144 = vmatprep.subr.mxu1 %v6404_v6 }
  0xe0   : > { %v584_v58 = vpop.permute.xlu0 %583  ;;  %v805_v59 = vpop.permute.xlu1 %804  ;;  %1771 = vmatprep.mubr.f32.mxu0 %v6404_v6  ;;  %2145 = vmatpush2.msra.mxu1 %v3791_v31  ;;  %v533_v8 = vsel %vm460_vm1, %v531_v63, %v532_v45 }
  0xe1   : > { %v1356_v60 = vsel %vm1344_vm4, %v4326_v0, %v584_v58  ;;  %v1190_v0 = vrot.slane %v4696_v44, 4  ;;  %2146 = vmatprep.subr.mxu1 %v6404_v6  ;;  %v974_v58 = vrot.slane %v4765_v36, 3 }
  0xe2   : > { %1053 = vrot.lane.b32.xlu0 %v967_v54, %s4080_s22  ;;  %1274 = vrot.lane.b32.xlu1 %v1188_v55, %s4082_s28  ;;  %v1397_v9 = vsel %vm1385_vm5, %v1356_v60, %v805_v59  ;;  %v754_v54 = vsel %vm681_vm3, %v752_v46, %v753_v47  ;;  %v973_v55 = vrot.slane %v4760_v32, 3  ;;  %v1194_v59 = vrot.slane %v4760_v32, 4 }
  0xe3   : > { %v1191_v20 = vsel %vm1123_vm0, %v1189_v5, %v1190_v0  ;;  %v1193_v48 = vsel %vm1123_vm0, %v1190_v0, %v1192_v35  ;;  %2147 = vmatpush2.msra.mxu1 %v3790_v41  ;;  %v1195_v60 = vrot.slane %v4765_v36, 4 }
  0xe4   : > { %v1026_v10 = vpop.permute.xlu0 %1025  ;;  %v1247_v11 = vpop.permute.xlu1 %1246  ;;  %2567 = vmatprep.subr.mxu1 %v6404_v6  ;;  %v975_v5 = vsel %vm902_vm2, %v973_v55, %v974_v58 }
  0xe5   : > { %v1438_v39 = vsel %vm1426_vm6, %v1397_v9, %v1026_v10  ;;  %v1196_v0 = vsel %vm1123_vm0, %v1194_v59, %v1195_v60 }
  0xe6   : > { %v1479_v18 = vsel %vm1467_vm7, %v1438_v39, %v1247_v11  ;;  %613 = vrot.lane.b32.xlu0 %v528_v2, %s4079_s21  ;;  %834 = vrot.lane.b32.xlu1 %v749_v3, %s4081_s23  ;;  %v384_v3 = vld [vmem:[%s4170_s20 + $0x160] sm:$0xff]  ;;  %v4811_v39 = vld [vmem:[%s4170_s20 + $0x168] sm:$0xff] }
  0xe7   : > { %3745 = vmatmul.mubr.msk.f32.gmra.mxu0 %vm1514_vm8, %v1479_v18  ;;  %v534_v9 = vrot.slane %v384_v3, 1  ;;  %v755_v10 = vrot.slane %v384_v3, 2  ;;  %v1199_v46 = vrot.slane %v4811_v39, 4 }
  0xe8   : > { %v586_v22 = vpop.permute.xlu0 %585  ;;  %v807_v23 = vpop.permute.xlu1 %806  ;;  %1777 = vmatprep.mubr.f32.mxu0 %v6404_v6 }
  0xe9   : > { %v1357_v26 = vsel %vm1344_vm4, %v4354_v27, %v586_v22  ;;  %v535_v18 = vsel %vm460_vm1, %v532_v45, %v534_v9  ;;  %v756_v19 = vsel %vm681_vm3, %v753_v47, %v755_v10  ;;  %v979_v45 = vrot.slane %v4816_v14, 3 }
  0xea   : > { %1055 = vrot.lane.b32.xlu0 %v970_v28, %s4080_s22  ;;  %1276 = vrot.lane.b32.xlu1 %v1191_v20, %s4082_s28  ;;  %v1398_v27 = vsel %vm1385_vm5, %v1357_v26, %v807_v23  ;;  %v976_v28 = vrot.slane %v384_v3, 3  ;;  %v1197_v20 = vrot.slane %v384_v3, 4  ;;  %v536_v26 = vrot.slane %v4811_v39, 1 }
  0xeb   : > { %v1200_v47 = vrot.slane %v4816_v14, 4 }
  0xec   : > { %v1028_v7 = vpop.permute.xlu0 %1027  ;;  %v1249_v40 = vpop.permute.xlu1 %1248  ;;  %v977_v35 = vsel %vm902_vm2, %v974_v58, %v976_v28 }
  0xed   : > { %v1439_v42 = vsel %vm1426_vm6, %v1398_v27, %v1028_v7  ;;  %v1198_v27 = vsel %vm1123_vm0, %v1195_v60, %v1197_v20 }
  0xee   : > { %v1480_v29 = vsel %vm1467_vm7, %v1439_v42, %v1249_v40  ;;  %615 = vrot.lane.b32.xlu0 %v530_v33, %s4079_s21  ;;  %836 = vrot.lane.b32.xlu1 %v751_v34, %s4081_s23  ;;  %v537_v33 = vrot.slane %v4816_v14, 1  ;;  %v757_v34 = vrot.slane %v4811_v39, 2 }
  0xef   : > { %3746 = vmatmul.mubr.msk.f32.gmra.mxu0 %vm1514_vm8, %v1480_v29  ;;  %v978_v29 = vrot.slane %v4811_v39, 3 }
  0xf0   : > { %v588_v49 = vpop.permute.xlu0 %587  ;;  %v809_v53 = vpop.permute.xlu1 %808  ;;  %1783 = vmatprep.mubr.f32.mxu0 %v6404_v6  ;;  %v538_v42 = vsel %vm460_vm1, %v536_v26, %v537_v33  ;;  %v759_v63 = vsel %vm681_vm3, %v757_v34, %v758_v52 }
  0xf1   : > { %v1358_v13 = vsel %vm1344_vm4, %v4357_v30, %v588_v49  ;;  %v387_v49 = vld [vmem:[%s4170_s20 + $0x178] sm:$0xff] }
  0xf2   : > { %1057 = vrot.lane.b32.xlu0 %v972_v38, %s4080_s22  ;;  %1278 = vrot.lane.b32.xlu1 %v1193_v48, %s4082_s28  ;;  %v1399_v61 = vsel %vm1385_vm5, %v1358_v13, %v809_v53  ;;  %v539_v55 = vrot.slane %v387_v49, 1  ;;  %v760_v58 = vrot.slane %v387_v49, 2 }
  0xf4   : > { %v1030_v2 = vpop.permute.xlu0 %1029  ;;  %v1251_v30 = vpop.permute.xlu1 %1250  ;;  %v761_v3 = vsel %vm681_vm3, %v758_v52, %v760_v58 }
  0xf5   : > { %v1440_v4 = vsel %vm1426_vm6, %v1399_v61, %v1030_v2  ;;  %v4856_v2 = vld [vmem:[%s4170_s20 + $0x180] sm:$0xff] }
  0xf6   : > { %v1481_v51 = vsel %vm1467_vm7, %v1440_v4, %v1251_v30  ;;  %617 = vrot.lane.b32.xlu0 %v533_v8, %s4079_s21  ;;  %838 = vrot.lane.b32.xlu1 %v754_v54, %s4081_s23  ;;  %v980_v8 = vsel %vm902_vm2, %v978_v29, %v979_v45  ;;  %v1201_v54 = vsel %vm1123_vm0, %v1199_v46, %v1200_v47  ;;  %v981_v4 = vrot.slane %v387_v49, 3 }
  0xf7   : > { %3747 = vmatmul.mubr.msk.f32.gmra.mxu0 %vm1514_vm8, %v1481_v51  ;;  %v540_v30 = vsel %vm460_vm1, %v537_v33, %v539_v55  ;;  %v1202_v51 = vrot.slane %v387_v49, 4  ;;  %v1204_v34 = vrot.slane %v4856_v2, 4 }
  0xf8   : > { %v590_v11 = vpop.permute.xlu0 %589  ;;  %v811_v12 = vpop.permute.xlu1 %810  ;;  %1789 = vmatprep.mubr.f32.mxu0 %v6404_v6  ;;  %v982_v28 = vsel %vm902_vm2, %v979_v45, %v981_v4 }
  0xf9   : > { %v1359_v17 = vsel %vm1344_vm4, %v4385_v56, %v590_v11  ;;  %v541_v11 = vrot.slane %v4856_v2, 1  ;;  %v1203_v20 = vsel %vm1123_vm0, %v1200_v47, %v1202_v51 }
  0xfa   : > { %1059 = vrot.lane.b32.xlu0 %v975_v5, %s4080_s22  ;;  %1280 = vrot.lane.b32.xlu1 %v1196_v0, %s4082_s28  ;;  %v1400_v21 = vsel %vm1385_vm5, %v1359_v17, %v811_v12  ;;  %v4861_v5 = vld [vmem:[%s4170_s20 + $0x188] sm:$0xff] }
  0xfb   : > { %v542_v17 = vrot.slane %v4861_v5, 1  ;;  %v984_v33 = vrot.slane %v4861_v5, 3  ;;  %v1205_v52 = vrot.slane %v4861_v5, 4 }
  0xfc   : > { %v1032_v22 = vpop.permute.xlu0 %1031  ;;  %v1253_v23 = vpop.permute.xlu1 %1252 }
  0xfd   : > { %v1441_v56 = vsel %vm1426_vm6, %v1400_v21, %v1032_v22 }
  0xfe   : > { %v1482_v31 = vsel %vm1467_vm7, %v1441_v56, %v1253_v23  ;;  %619 = vrot.lane.b32.xlu0 %v535_v18, %s4079_s21  ;;  %840 = vrot.lane.b32.xlu1 %v756_v19, %s4081_s23  ;;  %v762_v18 = vrot.slane %v4856_v2, 2  ;;  %v763_v19 = vrot.slane %v4861_v5, 2  ;;  %v543_v56 = vsel %vm460_vm1, %v541_v11, %v542_v17 }
  0xff   : > { %3748 = vmatmul.mubr.msk.f32.gmra.mxu0 %vm1514_vm8, %v1482_v31  ;;  %v983_v31 = vrot.slane %v4856_v2, 3 }
 0x100   : > { %v592_v7 = vpop.permute.xlu0 %591  ;;  %v813_v40 = vpop.permute.xlu1 %812  ;;  %1795 = vmatprep.mubr.f32.mxu0 %v6404_v6  ;;  %v764_v26 = vsel %vm681_vm3, %v762_v18, %v763_v19 }
 0x101   : > { %v1360_v41 = vsel %vm1344_vm4, %v4388_v57, %v592_v7  ;;  %v390_v7 = vld [vmem:[%s4170_s20 + $0x190] sm:$0xff] }
 0x102   : > { %1061 = vrot.lane.b32.xlu0 %v977_v35, %s4080_s22  ;;  %1282 = vrot.lane.b32.xlu1 %v1198_v27, %s4082_s28  ;;  %v1401_v38 = vsel %vm1385_vm5, %v1360_v41, %v813_v40  ;;  %v544_v29 = vrot.slane %v390_v7, 1  ;;  %v765_v45 = vrot.slane %v390_v7, 2 }
 0x104   : > { %v1034_v48 = vpop.permute.xlu0 %1033  ;;  %v1255_v57 = vpop.permute.xlu1 %1254  ;;  %v766_v49 = vsel %vm681_vm3, %v763_v19, %v765_v45 }
 0x105   : > { %v1442_v53 = vsel %vm1426_vm6, %v1401_v38, %v1034_v48  ;;  %v4901_v48 = vld [vmem:[%s4170_s20 + $0x198] sm:$0xff] }
 0x106   : > { %v1483_v13 = vsel %vm1467_vm7, %v1442_v53, %v1255_v57  ;;  %621 = vrot.lane.b32.xlu0 %v538_v42, %s4079_s21  ;;  %842 = vrot.lane.b32.xlu1 %v759_v63, %s4081_s23  ;;  %v985_v42 = vsel %vm902_vm2, %v983_v31, %v984_v33  ;;  %v1206_v63 = vsel %vm1123_vm0, %v1204_v34, %v1205_v52  ;;  %v986_v53 = vrot.slane %v390_v7, 3 }
 0x107   : > { %3749 = vmatmul.mubr.msk.f32.gmra.mxu0 %vm1514_vm8, %v1483_v13  ;;  %v545_v57 = vsel %vm460_vm1, %v542_v17, %v544_v29  ;;  %v1207_v13 = vrot.slane %v390_v7, 4  ;;  %v1209_v18 = vrot.slane %v4901_v48, 4 }
 0x108   : > { %v594_v59 = vpop.permute.xlu0 %593  ;;  %v815_v60 = vpop.permute.xlu1 %814  ;;  %1801 = vmatprep.mubr.f32.mxu0 %v6404_v6  ;;  %v987_v4 = vsel %vm902_vm2, %v984_v33, %v986_v53  ;;  %v1957_v53 = vld [vmem:[%s6398_s2 + $0x58] sm:$0xff] }
 0x109   : > { %v1361_v61 = vsel %vm1344_vm4, %v4416_v24, %v594_v59  ;;  %v546_v59 = vrot.slane %v4901_v48, 1  ;;  %v1208_v51 = vsel %vm1123_vm0, %v1205_v52, %v1207_v13 }
 0x10a   : > { %1063 = vrot.lane.b32.xlu0 %v980_v8, %s4080_s22  ;;  %1284 = vrot.lane.b32.xlu1 %v1201_v54, %s4082_s28  ;;  %v1402_v0 = vsel %vm1385_vm5, %v1361_v61, %v815_v60  ;;  %v4906_v8 = vld [vmem:[%s4170_s20 + $0x1a0] sm:$0xff] }
 0x10b   : > { %v547_v61 = vrot.slane %v4906_v8, 1  ;;  %v989_v17 = vrot.slane %v4906_v8, 3  ;;  %v1210_v19 = vrot.slane %v4906_v8, 4 }
 0x10c   : > { %v1036_v9 = vpop.permute.xlu0 %1035  ;;  %v1257_v10 = vpop.permute.xlu1 %1256 }
 0x10d   : > { %v1443_v24 = vsel %vm1426_vm6, %v1402_v0, %v1036_v9  ;;  %v1211_v33 = vsel %vm1123_vm0, %v1209_v18, %v1210_v19  ;;  %v396_v18 = vld [vmem:[%s4170_s20 + $0x1c0] sm:$0xff] }
 0x10e   : > { %v1484_v12 = vsel %vm1467_vm7, %v1443_v24, %v1257_v10  ;;  %623 = vrot.lane.b32.xlu0 %v540_v30, %s4079_s21  ;;  %844 = vrot.lane.b32.xlu1 %v761_v3, %s4081_s23  ;;  %v767_v30 = vrot.slane %v4901_v48, 2  ;;  %v768_v3 = vrot.slane %v4906_v8, 2  ;;  %v548_v24 = vsel %vm460_vm1, %v546_v59, %v547_v61 }
 0x10f   : > { %3750 = vmatmul.mubr.msk.f32.gmra.mxu0 %vm1514_vm8, %v1484_v12  ;;  %v988_v12 = vrot.slane %v4901_v48, 3 }
 0x110   : > { %v596_v21 = vpop.permute.xlu0 %595  ;;  %v817_v22 = vpop.permute.xlu1 %816  ;;  %1807 = vmatprep.mubr.f32.mxu0 %v6404_v6  ;;  %v769_v11 = vsel %vm681_vm3, %v767_v30, %v768_v3  ;;  %v1956_v30 = vld [vmem:[%s6398_s2 + $0x50] sm:$0xff] }
 0x111   : > { %v1362_v23 = vsel %vm1344_vm4, %v4419_v25, %v596_v21  ;;  %v990_v31 = vsel %vm902_vm2, %v988_v12, %v989_v17 }
 0x112   : > { %1065 = vrot.lane.b32.xlu0 %v982_v28, %s4080_s22  ;;  %1286 = vrot.lane.b32.xlu1 %v1203_v20, %s4082_s28  ;;  %v1403_v35 = vsel %vm1385_vm5, %v1362_v23, %v817_v22  ;;  %v393_v22 = vld [vmem:[%s4170_s20 + $0x1a8] sm:$0xff] }
 0x113   : > { %v549_v34 = vrot.slane %v393_v22, 1  ;;  %v770_v52 = vrot.slane %v393_v22, 2  ;;  %v991_v29 = vrot.slane %v393_v22, 3  ;;  %v1212_v45 = vrot.slane %v393_v22, 4 }
 0x114   : > { %v1038_v27 = vpop.permute.xlu0 %1037  ;;  %v1259_v25 = vpop.permute.xlu1 %1258  ;;  %v554_v22 = vrot.slane %v396_v18, 1 }
 0x115   : > { %v1444_v40 = vsel %vm1426_vm6, %v1403_v35, %v1038_v27  ;;  %v1213_v59 = vsel %vm1123_vm0, %v1210_v19, %v1212_v45 }
 0x116   : > { %v1485_v41 = vsel %vm1467_vm7, %v1444_v40, %v1259_v25  ;;  %625 = vrot.lane.b32.xlu0 %v543_v56, %s4079_s21  ;;  %846 = vrot.lane.b32.xlu1 %v764_v26, %s4081_s23  ;;  %v1960_v56 = vld [vmem:[%s6398_s2 + $0x70] sm:$0xff]  ;;  %v1959_v25 = vld [vmem:[%s6398_s2 + $0x68] sm:$0xff] }
 0x117   : > { %3751 = vmatmul.mubr.msk.f32.gmra.mxu0 %vm1514_vm8, %v1485_v41  ;;  %v4957_v40 = vld [vmem:[%s4170_s20 + $0x1b0] sm:$0xff]  ;;  %v1958_v41 = vld [vmem:[%s6398_s2 + $0x60] sm:$0xff] }
 0x118   : > { %v598_v46 = vpop.permute.xlu0 %597  ;;  %v819_v47 = vpop.permute.xlu1 %818  ;;  %1813 = vmatprep.mubr.f32.mxu0 %v6404_v6 }
 0x119   : > { %v1363_v38 = vsel %vm1344_vm4, %v4463_v15, %v598_v46  ;;  %v4965_v46 = vld [vmem:[%s4170_s20 + $0x1b8] sm:$0xff] }
 0x11a   : > { %1067 = vrot.lane.b32.xlu0 %v985_v42, %s4080_s22  ;;  %1288 = vrot.lane.b32.xlu1 %v1206_v63, %s4082_s28  ;;  %v1404_v54 = vsel %vm1385_vm5, %v1363_v38, %v819_v47  ;;  %v550_v42 = vsel %vm460_vm1, %v547_v61, %v549_v34  ;;  %v771_v63 = vsel %vm681_vm3, %v768_v3, %v770_v52  ;;  %v5026_v34 = vld [vmem:[%s4170_s20 + $0x1c8] sm:$0xff]  ;;  %v1952_v52 = vld [vmem:[%s6398_s2 + $0x30] sm:$0xff] }
 0x11b   : > { %v556_v45 = vrot.slane %v5026_v34, 1 }
 0x11c   : > { %v1040_v55 = vpop.permute.xlu0 %1039  ;;  %v1261_v58 = vpop.permute.xlu1 %1260 }
 0x11d   : > { %v1445_v15 = vsel %vm1426_vm6, %v1404_v54, %v1040_v55  ;;  %v552_v54 = vrot.slane %v4965_v46, 1  ;;  %v772_v55 = vrot.slane %v4957_v40, 2 }
 0x11e   : > { %v1486_v60 = vsel %vm1467_vm7, %v1445_v15, %v1261_v58  ;;  %627 = vrot.lane.b32.xlu0 %v545_v57, %s4079_s21  ;;  %848 = vrot.lane.b32.xlu1 %v766_v49, %s4081_s23  ;;  %v551_v49 = vrot.slane %v4957_v40, 1  ;;  %v773_v58 = vrot.slane %v4965_v46, 2  ;;  %v992_v15 = vsel %vm902_vm2, %v989_v17, %v991_v29 }
 0x11f   : > { %3752 = vmatmul.mubr.msk.f32.gmra.mxu0 %vm1514_vm8, %v1486_v60 }
 0x120   : > { %v600_v0 = vpop.permute.xlu0 %599  ;;  %v821_v9 = vpop.permute.xlu1 %820  ;;  %1819 = vmatprep.mubr.f32.mxu0 %v6404_v6 }
 0x121   : > { %v1364_v10 = vsel %vm1344_vm4, %v4466_v16, %v600_v0  ;;  %v1961_v16 = vld [vmem:[%s6398_s2 + $0x78] sm:$0xff]  ;;  %v1955_v0 = vld [vmem:[%s6398_s2 + $0x48] sm:$0xff] }
 0x122   : > { %1069 = vrot.lane.b32.xlu0 %v987_v4, %s4080_s22  ;;  %1290 = vrot.lane.b32.xlu1 %v1208_v51, %s4082_s28  ;;  %v1405_v28 = vsel %vm1385_vm5, %v1364_v10, %v821_v9  ;;  %v553_v4 = vsel %vm460_vm1, %v551_v49, %v552_v54  ;;  %v774_v51 = vsel %vm681_vm3, %v772_v55, %v773_v58  ;;  %v993_v9 = vrot.slane %v4957_v40, 3 }
 0x123   : > { %2316 = vmatpush1.msra.mxu0 %v1961_v16  ;;  %v994_v10 = vrot.slane %v4965_v46, 3  ;;  %v1954_v16 = vld [vmem:[%s6398_s2 + $0x40] sm:$0xff] }
 0x124   : > { %v1042_v20 = vpop.permute.xlu0 %1041  ;;  %v1263_v21 = vpop.permute.xlu1 %1262  ;;  %2317 = vmatprep.subr.mxu0 %v6404_v6 }
 0x125   : > { %v1446_v23 = vsel %vm1426_vm6, %v1405_v28, %v1042_v20  ;;  %2318 = vmatpush1.msra.mxu0 %v1960_v56  ;;  %v995_v20 = vsel %vm902_vm2, %v993_v9, %v994_v10 }
 0x126   : > { %v1487_v26 = vsel %vm1467_vm7, %v1446_v23, %v1263_v21  ;;  %629 = vrot.lane.b32.xlu0 %v548_v24, %s4079_s21  ;;  %850 = vrot.lane.b32.xlu1 %v769_v11, %s4081_s23  ;;  %v1215_v24 = vrot.slane %v4965_v46, 4  ;;  %v775_v23 = vrot.slane %v396_v18, 2 }
 0x127   : > { %3753 = vmatmul.mubr.msk.f32.gmra.mxu0 %vm1514_vm8, %v1487_v26  ;;  %2319 = vmatprep.subr.mxu0 %v6404_v6 }
 0x128   : > { %v602_v35 = vpop.permute.xlu0 %601  ;;  %v823_v27 = vpop.permute.xlu1 %822  ;;  %1825 = vmatprep.mubr.f32.mxu0 %v6404_v6  ;;  %2320 = vmatpush1.msra.mxu0 %v1959_v25  ;;  %v996_v25 = vrot.slane %v396_v18, 3 }
 0x129   : > { %v1365_v7 = vsel %vm1344_vm4, %v4508_v62, %v602_v35  ;;  %2321 = vmatprep.subr.mxu0 %v6404_v6  ;;  %v555_v35 = vsel %vm460_vm1, %v552_v54, %v554_v22  ;;  %v1947_v22 = vld [vmem:[%s6398_s2 + $0x8] sm:$0xff] }
 0x12a   : > { %1071 = vrot.lane.b32.xlu0 %v990_v31, %s4080_s22  ;;  %1292 = vrot.lane.b32.xlu1 %v1211_v33, %s4082_s28  ;;  %v1406_v62 = vsel %vm1385_vm5, %v1365_v7, %v823_v27  ;;  %v1953_v31 = vld [vmem:[%s6398_s2 + $0x38] sm:$0xff]  ;;  %v776_v27 = vsel %vm681_vm3, %v773_v58, %v775_v23  ;;  %v1217_v7 = vrot.slane %v396_v18, 4  ;;  %v1950_v58 = vld [vmem:[%s6398_s2 + $0x20] sm:$0xff] }
 0x12b   : > { %2322 = vmatpush1.msra.mxu0 %v1958_v41  ;;  %v5034_v41 = vld [vmem:[%s4170_s20 + $0x1d0] sm:$0xff] }
 0x12c   : > { %v1044_v47 = vpop.permute.xlu0 %1043  ;;  %v1265_v38 = vpop.permute.xlu1 %1264  ;;  %2323 = vmatprep.subr.mxu0 %v6404_v6  ;;  %v778_v49 = vrot.slane %v5034_v41, 2 }
 0x12d   : > { %v1447_v57 = vsel %vm1426_vm6, %v1406_v62, %v1044_v47  ;;  %2324 = vmatpush1.msra.mxu0 %v1957_v53  ;;  %v1951_v62 = vld [vmem:[%s6398_s2 + $0x28] sm:$0xff]  ;;  %v997_v53 = vsel %vm902_vm2, %v994_v10, %v996_v25 }
 0x12e   : > { %v1488_v13 = vsel %vm1467_vm7, %v1447_v57, %v1265_v38  ;;  %631 = vrot.lane.b32.xlu0 %v550_v42, %s4079_s21  ;;  %852 = vrot.lane.b32.xlu1 %v771_v63, %s4081_s23  ;;  %v557_v38 = vrot.slane %v5034_v41, 1  ;;  %v777_v57 = vrot.slane %v5026_v34, 2 }
 0x12f   : > { %3754 = vmatmul.mubr.msk.f32.gmra.mxu0 %vm1514_vm8, %v1488_v13  ;;  %2325 = vmatprep.subr.mxu0 %v6404_v6  ;;  %v1218_v13 = vsel %vm1123_vm0, %v1215_v24, %v1217_v7  ;;  %v1965_v7 = vld [vmem:[%s6398_s2 + $0x98] sm:$0xff] }
 0x130   : > { %v604_v60 = vpop.permute.xlu0 %603  ;;  %v825_v61 = vpop.permute.xlu1 %824  ;;  %1831 = vmatprep.mubr.f32.mxu0 %v6404_v6  ;;  %2326 = vmatpush1.msra.mxu0 %v1956_v30  ;;  %v1949_v30 = vld [vmem:[%s6398_s2 + $0x18] sm:$0xff] }
 0x131   : > { %v1366_v3 = vsel %vm1344_vm4, %v4511_v1, %v604_v60  ;;  %v1214_v1 = vrot.slane %v4957_v40, 4  ;;  %2327 = vmatprep.subr.mxu0 %v6404_v6  ;;  %v558_v60 = vsel %vm460_vm1, %v556_v45, %v557_v38  ;;  %v1964_v45 = vld [vmem:[%s6398_s2 + $0x90] sm:$0xff] }
 0x132   : > { %1073 = vrot.lane.b32.xlu0 %v992_v15, %s4080_s22  ;;  %1294 = vrot.lane.b32.xlu1 %v1213_v59, %s4082_s28  ;;  %v1407_v11 = vsel %vm1385_vm5, %v1366_v3, %v825_v61  ;;  %v4052_v15 = vld [vmem:[%s4170_s20 + $0x110] sm:$0xff]  ;;  %v779_v61 = vsel %vm681_vm3, %v777_v57, %v778_v49  ;;  %v998_v3 = vrot.slane %v5026_v34, 3  ;;  %v1963_v57 = vld [vmem:[%s6398_s2 + $0x88] sm:$0xff] }
 0x133   : > { %2328 = vmatpush1.msra.mxu0 %v1955_v0  ;;  %v1216_v21 = vsel %vm1123_vm0, %v1214_v1, %v1215_v24  ;;  %v1220_v0 = vrot.slane %v5034_v41, 4  ;;  %v399_v24 = vld [vmem:[%s4170_s20 + $0x1d8] sm:$0xff] }
 0x134   : > { %v1046_v12 = vpop.permute.xlu0 %1045  ;;  %v1267_v17 = vpop.permute.xlu1 %1266  ;;  %2329 = vmatprep.subr.mxu0 %v6404_v6 }
 0x135   : > { %v1448_v19 = vsel %vm1426_vm6, %v1407_v11, %v1046_v12  ;;  %2330 = vmatpush1.msra.mxu0 %v1954_v16  ;;  %v1948_v12 = vld [vmem:[%s6398_s2 + $0x10] sm:$0xff]  ;;  %v559_v16 = vrot.slane %v399_v24, 1 }
 0x136   : > { %v1489_v28 = vsel %vm1467_vm7, %v1448_v19, %v1267_v17  ;;  %633 = vrot.lane.b32.xlu0 %v553_v4, %s4079_s21  ;;  %854 = vrot.lane.b32.xlu1 %v774_v51, %s4081_s23  ;;  %v999_v4 = vrot.slane %v5034_v41, 3  ;;  %v1219_v51 = vrot.slane %v5026_v34, 4 }
 0x137   : > { %3755 = vmatmul.mubr.msk.f32.gmra.mxu0 %vm1514_vm8, %v1489_v28  ;;  %2331 = vmatprep.subr.mxu0 %v6404_v6  ;;  %v780_v28 = vrot.slane %v399_v24, 2 }
 0x138   : > { %v606_v56 = vpop.permute.xlu0 %605  ;;  %v827_v26 = vpop.permute.xlu1 %826  ;;  %1837 = vmatprep.mubr.f32.mxu0 %v6404_v6  ;;  %2332 = vmatpush1.msra.mxu0 %v1953_v31  ;;  %v1000_v18 = vsel %vm902_vm2, %v998_v3, %v999_v4  ;;  %v1221_v19 = vsel %vm1123_vm0, %v1219_v51, %v1220_v0 }
 0x139   : > { %v1367_v33 = vsel %vm1344_vm4, %v4556_v50, %v606_v56  ;;  %2333 = vmatprep.subr.mxu0 %v6404_v6  ;;  %v1946_v56 = vld [vmem:[%s6398_s2] sm:$0xff]  ;;  %v781_v31 = vsel %vm681_vm3, %v778_v49, %v780_v28 }
 0x13a   : > { %1075 = vrot.lane.b32.xlu0 %v995_v20, %s4080_s22  ;;  %1296 = vrot.lane.b32.xlu1 %v1216_v21, %s4082_s28  ;;  %v1408_v50 = vsel %vm1385_vm5, %v1367_v33, %v827_v26  ;;  %v560_v26 = vsel %vm460_vm1, %v557_v38, %v559_v16  ;;  %v1001_v33 = vrot.slane %v399_v24, 3 }
 0x13b   : > { %2334 = vmatpush1.msra.mxu0 %v1952_v52  ;;  %v1222_v52 = vrot.slane %v399_v24, 4 }
 0x13c   : > { %v1048_v42 = vpop.permute.xlu0 %1047  ;;  %v1269_v63 = vpop.permute.xlu1 %1268  ;;  %2335 = vmatprep.subr.mxu0 %v6404_v6 }
 0x13d   : > { %v1449_v29 = vsel %vm1426_vm6, %v1408_v50, %v1048_v42  ;;  %2336 = vmatpush1.msra.mxu0 %v1951_v62  ;;  %v1002_v42 = vsel %vm902_vm2, %v999_v4, %v1001_v33  ;;  %v4053_v62 = vld [vmem:[%s4170_s20 + $0x128] sm:$0xff] }
 0x13e   : > { %v1490_v47 = vsel %vm1467_vm7, %v1449_v29, %v1269_v63  ;;  %635 = vrot.lane.b32.xlu0 %v555_v35, %s4079_s21  ;;  %856 = vrot.lane.b32.xlu1 %v776_v27, %s4081_s23  ;;  %v1223_v63 = vsel %vm1123_vm0, %v1220_v0, %v1222_v52 }
 0x13f   : > { %3756 = vmatmul.mubr.msk.f32.gmra.mxu0 %vm1514_vm8, %v1490_v47  ;;  %2337 = vmatprep.subr.mxu0 %v6404_v6 }
 0x140   : > { %v608_v54 = vpop.permute.xlu0 %607  ;;  %v829_v55 = vpop.permute.xlu1 %828  ;;  %1843 = vmatprep.mubr.f32.mxu0 %v6404_v6  ;;  %2338 = vmatpush1.msra.mxu0 %v1950_v58  ;;  %v1962_v58 = vld [vmem:[%s6398_s2 + $0x80] sm:$0xff] }
 0x141   : > { %v1368_v59 = vsel %vm1344_vm4, %v4052_v15, %v608_v54  ;;  %2339 = vmatprep.subr.mxu0 %v6404_v6 }
 0x142   : > { %1077 = vrot.lane.b32.xlu0 %v997_v53, %s4080_s22  ;;  %1298 = vrot.lane.b32.xlu1 %v1218_v13, %s4082_s28  ;;  %v1409_v9 = vsel %vm1385_vm5, %v1368_v59, %v829_v55 }
 0x143   : > { %2340 = vmatpush1.msra.mxu0 %v1949_v30 }
 0x144   : > { %v1050_v10 = vpop.permute.xlu0 %1049  ;;  %v1271_v1 = vpop.permute.xlu1 %1270  ;;  %2341 = vmatprep.subr.mxu0 %v6404_v6 }
 0x145   : > { %v1450_v11 = vsel %vm1426_vm6, %v1409_v9, %v1050_v10  ;;  %2342 = vmatpush1.msra.mxu0 %v1948_v12 }
 0x146   : > { %v1491_v17 = vsel %vm1467_vm7, %v1450_v11, %v1271_v1  ;;  %637 = vrot.lane.b32.xlu0 %v558_v60, %s4079_s21  ;;  %858 = vrot.lane.b32.xlu1 %v779_v61, %s4081_s23 }
 0x147   : > { %3757 = vmatmul.mubr.msk.f32.gmra.mxu0 %vm1514_vm8, %v1491_v17  ;;  %2343 = vmatprep.subr.mxu0 %v6404_v6 }
 0x148   : > { %v610_v20 = vpop.permute.xlu0 %609  ;;  %v831_v21 = vpop.permute.xlu1 %830  ;;  %1849 = vmatprep.mubr.f32.mxu0 %v6404_v6  ;;  %2344 = vmatpush1.msra.mxu0 %v1947_v22 }
 0x149   : > { %v1369_v23 = vsel %vm1344_vm4, %v4622_v43, %v610_v20  ;;  %2345 = vmatprep.subr.mxu0 %v6404_v6 }
 0x14a   : > { %1079 = vrot.lane.b32.xlu0 %v1000_v18, %s4080_s22  ;;  %1300 = vrot.lane.b32.xlu1 %v1221_v19, %s4082_s28  ;;  %v1410_v35 = vsel %vm1385_vm5, %v1369_v23, %v831_v21 }
 0x14b   : > { %2346 = vmatpush1.msra.mxu0 %v1946_v56 }
 0x14c   : > { %v1052_v43 = vpop.permute.xlu0 %1051  ;;  %v1273_v27 = vpop.permute.xlu1 %1272  ;;  %2371 = vmatprep.subr.mxu0 %v6404_v6 }
 0x14d   : > { %v1451_v25 = vsel %vm1426_vm6, %v1410_v35, %v1052_v43  ;;  %2372 = vmatpush2.msra.mxu0 %v1965_v7 }
 0x14e   : > { %v1492_v50 = vsel %vm1467_vm7, %v1451_v25, %v1273_v27  ;;  %639 = vrot.lane.b32.xlu0 %v560_v26, %s4079_s21  ;;  %860 = vrot.lane.b32.xlu1 %v781_v31, %s4081_s23  ;;  %s4017_s23 = sshll.u32 %s6512_s24, 6 }
 0x14f   : > { %3758 = vmatmul.mubr.msk.f32.gmra.mxu0 %vm1514_vm8, %v1492_v50  ;;  %2373 = vmatprep.subr.mxu0 %v6404_v6 }
 0x150   : > { %v612_v29 = vpop.permute.xlu0 %611  ;;  %1855 = vmatprep.mubr.f32.mxu0 %v6404_v6  ;;  %v833_v38 = vpop.permute.xlu1 %832  ;;  %2374 = vmatpush2.msra.mxu0 %v1964_v45 }
 0x151   : > { %v1370_v47 = vsel %vm1344_vm4, %v4053_v62, %v612_v29  ;;  %v5124_v49 = vpop.f32.mrf.mxu0  ;;  %2375 = vmatprep.subr.mxu0 %v6404_v6 }
 0x152   : > { %1081 = vrot.lane.b32.xlu0 %v1002_v42, %s4080_s22  ;;  %1302 = vrot.lane.b32.xlu1 %v1223_v63, %s4082_s28  ;;  %v1411_v53 = vsel %vm1385_vm5, %v1370_v47, %v833_v38  ;;  %s328_s28 = scalar_lea.vmem %s6402_s6, %s4017_s23 }
 0x153   : > { %2376 = vmatpush2.msra.mxu0 %v1963_v57  ;;  %v5134_v59 = vpop.f32.mrf.mxu0 }
 0x154   : > { %v1054_v13 = vpop.permute.xlu0 %1053  ;;  %v1275_v55 = vpop.permute.xlu1 %1274  ;;  %2377 = vmatprep.subr.mxu0 %v6404_v6 }
 0x155   : > { %v1452_v54 = vsel %vm1426_vm6, %v1411_v53, %v1054_v13  ;;  %2378 = vmatpush2.msra.mxu0 %v1962_v58 }
 0x156   : > { %v1493_v15 = vsel %vm1467_vm7, %v1452_v54, %v1275_v55  ;;  %2851 = vmatprep.subr.mxu0 %v6404_v6 }
 0x157   : > { %3759 = vmatmul.mubr.msk.f32.gmra.mxu0 %vm1514_vm8, %v1493_v15  ;;  %v5138_v61 = vpop.f32.mrf.mxu0 }
 0x158   : > { %v614_v60 = vpop.permute.xlu0 %613  ;;  %1861 = vmatprep.mubr.f32.mxu0 %v6404_v6  ;;  %v835_v3 = vpop.permute.xlu1 %834 }
 0x159   : > { %v1371_v30 = vsel %vm1344_vm4, %v4691_v37, %v614_v60  ;;  %v5144_v0 = vpop.f32.mrf.mxu0 }
 0x15a   : > { %v1412_v4 = vsel %vm1385_vm5, %v1371_v30, %v835_v3 }
 0x15c   : > { %v1056_v51 = vpop.permute.xlu0 %1055  ;;  %v1277_v10 = vpop.permute.xlu1 %1276 }
 0x15d   : > { %v1453_v9 = vsel %vm1426_vm6, %v1412_v4, %v1056_v51 }
 0x15e   : > { %v1494_v1 = vsel %vm1467_vm7, %v1453_v9, %v1277_v10 }
 0x15f   : > { %v5148_v24 = vpop.f32.mrf.mxu0  ;;  %3760 = vmatmul.mubr.msk.f32.gmra.mxu0 %vm1514_vm8, %v1494_v1 }
 0x160   : > { %v616_v11 = vpop.permute.xlu0 %615  ;;  %1867 = vmatprep.mubr.f32.mxu0 %v6404_v6  ;;  %v837_v12 = vpop.permute.xlu1 %836 }
 0x161   : > { %v1372_v37 = vsel %vm1344_vm4, %v4696_v44, %v616_v11  ;;  %v5154_v17 = vpop.f32.mrf.mxu0 }
 0x162   : > { %3794 = vmatprep.mubr.msk.f32.mxu1 %vm1987_vm9, %v5154_v17  ;;  %v1413_v18 = vsel %vm1385_vm5, %v1372_v37, %v837_v12 }
 0x163   : > { %2149 = vmatmul.mubr.f32.vlgmr.msra.gmra.mxu1 %v5148_v24 }
 0x164   : > { %v1058_v19 = vpop.permute.xlu0 %1057  ;;  %v1279_v28 = vpop.permute.xlu1 %1278 }
 0x165   : > { %v1454_v16 = vsel %vm1426_vm6, %v1413_v18, %v1058_v19 }
 0x166   : > { %v1495_v20 = vsel %vm1467_vm7, %v1454_v16, %v1279_v28 }
 0x167   : > { %v5162_v21 = vpop.f32.mrf.mxu0  ;;  %3761 = vmatmul.mubr.msk.f32.gmra.mxu0 %vm1514_vm8, %v1495_v20 }
 0x168   : > { %v618_v44 = vpop.permute.xlu0 %617  ;;  %1873 = vmatprep.mubr.f32.mxu0 %v6404_v6  ;;  %v839_v23 = vpop.permute.xlu1 %838 }
 0x169   : > { %v1373_v22 = vsel %vm1344_vm4, %v4760_v32, %v618_v44  ;;  %v5168_v56 = vpop.f32.mrf.mxu0 }
 0x16a   : > { %3795 = vmatprep.mubr.msk.f32.mxu1 %vm1987_vm9, %v5168_v56  ;;  %v1414_v26 = vsel %vm1385_vm5, %v1373_v22, %v839_v23 }
 0x16b   : > { %2154 = vmatmul.mubr.f32.gmra.mxu1 %v5162_v21 }
 0x16c   : > { %v1060_v31 = vpop.permute.xlu0 %1059  ;;  %v1281_v52 = vpop.permute.xlu1 %1280 }
 0x16d   : > { %v1455_v33 = vsel %vm1426_vm6, %v1414_v26, %v1060_v31 }
 0x16e   : > { %v1496_v35 = vsel %vm1467_vm7, %v1455_v33, %v1281_v52 }
 0x16f   : > { %v5176_v43 = vpop.f32.mrf.mxu0  ;;  %3762 = vmatmul.mubr.msk.f32.gmra.mxu0 %vm1514_vm8, %v1496_v35 }
 0x170   : > { %v620_v32 = vpop.permute.xlu0 %619  ;;  %1879 = vmatprep.mubr.f32.mxu0 %v6404_v6  ;;  %v841_v25 = vpop.permute.xlu1 %840 }
 0x171   : > { %v1374_v27 = vsel %vm1344_vm4, %v4765_v36, %v620_v32  ;;  %v5182_v7 = vpop.f32.mrf.mxu0 }
 0x172   : > { %3796 = vmatprep.mubr.msk.f32.mxu1 %vm1987_vm9, %v5182_v7  ;;  %v1415_v50 = vsel %vm1385_vm5, %v1374_v27, %v841_v25 }
 0x173   : > { %2159 = vmatmul.mubr.f32.gmra.mxu1 %v5176_v43 }
 0x174   : > { %v1062_v42 = vpop.permute.xlu0 %1061  ;;  %v1283_v29 = vpop.permute.xlu1 %1282 }
 0x175   : > { %v1456_v63 = vsel %vm1426_vm6, %v1415_v50, %v1062_v42 }
 0x176   : > { %v1497_v45 = vsel %vm1467_vm7, %v1456_v63, %v1283_v29 }
 0x177   : > { %v5190_v62 = vpop.f32.mrf.mxu0  ;;  %3763 = vmatmul.mubr.msk.f32.gmra.mxu0 %vm1514_vm8, %v1497_v45 }
 0x178   : > { %v622_v36 = vpop.permute.xlu0 %621  ;;  %1885 = vmatprep.mubr.f32.mxu0 %v6404_v6  ;;  %v843_v38 = vpop.permute.xlu1 %842 }
 0x179   : > { %v1375_v47 = vsel %vm1344_vm4, %v4811_v39, %v622_v36  ;;  %v5196_v57 = vpop.f32.mrf.mxu0 }
 0x17a   : > { %3797 = vmatprep.mubr.msk.f32.mxu1 %vm1987_vm9, %v5196_v57  ;;  %v1416_v53 = vsel %vm1385_vm5, %v1375_v47, %v843_v38 }
 0x17b   : > { %2164 = vmatmul.mubr.f32.gmra.mxu1 %v5190_v62 }
 0x17c   : > { %v1064_v13 = vpop.permute.xlu0 %1063  ;;  %v1285_v55 = vpop.permute.xlu1 %1284 }
 0x17d   : > { %v1457_v54 = vsel %vm1426_vm6, %v1416_v53, %v1064_v13 }
 0x17e   : > { %v1498_v58 = vsel %vm1467_vm7, %v1457_v54, %v1285_v55 }
 0x17f   : > { %v5204_v15 = vpop.f32.mrf.mxu0  ;;  %3764 = vmatmul.mubr.msk.f32.gmra.mxu0 %vm1514_vm8, %v1498_v58 }
 0x180   : > { %v624_v39 = vpop.permute.xlu0 %623  ;;  %1891 = vmatprep.mubr.f32.mxu0 %v6404_v6  ;;  %v845_v30 = vpop.permute.xlu1 %844 }
 0x181   : > { %v1376_v60 = vsel %vm1344_vm4, %v4816_v14, %v624_v39  ;;  %v5210_v3 = vpop.f32.mrf.mxu0 }
 0x182   : > { %3798 = vmatprep.mubr.msk.f32.mxu1 %vm1987_vm9, %v5210_v3  ;;  %v1417_v4 = vsel %vm1385_vm5, %v1376_v60, %v845_v30 }
 0x183   : > { %2169 = vmatmul.mubr.f32.gmra.mxu1 %v5204_v15 }
 0x184   : > { %v1066_v51 = vpop.permute.xlu0 %1065  ;;  %v1287_v10 = vpop.permute.xlu1 %1286 }
 0x185   : > { %v1458_v9 = vsel %vm1426_vm6, %v1417_v4, %v1066_v51 }
 0x186   : > { %v1499_v1 = vsel %vm1467_vm7, %v1458_v9, %v1287_v10 }
 0x187   : > { %v5218_v11 = vpop.f32.mrf.mxu0  ;;  %3765 = vmatmul.mubr.msk.f32.gmra.mxu0 %vm1514_vm8, %v1499_v1 }
 0x188   : > { %v626_v14 = vpop.permute.xlu0 %625  ;;  %1897 = vmatprep.mubr.f32.mxu0 %v6404_v6  ;;  %v847_v12 = vpop.permute.xlu1 %846 }
 0x189   : > { %v1377_v37 = vsel %vm1344_vm4, %v4856_v2, %v626_v14  ;;  %v5224_v18 = vpop.f32.mrf.mxu0 }
 0x18a   : > { %3799 = vmatprep.mubr.msk.f32.mxu1 %vm1987_vm9, %v5224_v18  ;;  %v1418_v19 = vsel %vm1385_vm5, %v1377_v37, %v847_v12 }
 0x18b   : > { %2174 = vmatmul.mubr.f32.gmra.mxu1 %v5218_v11 }
 0x18c   : > { %v1068_v16 = vpop.permute.xlu0 %1067  ;;  %v1289_v20 = vpop.permute.xlu1 %1288 }
 0x18d   : > { %v1459_v28 = vsel %vm1426_vm6, %v1418_v19, %v1068_v16 }
 0x18e   : > { %v1500_v44 = vsel %vm1467_vm7, %v1459_v28, %v1289_v20 }
 0x18f   : > { %v5232_v22 = vpop.f32.mrf.mxu0  ;;  %3766 = vmatmul.mubr.msk.f32.gmra.mxu0 %vm1514_vm8, %v1500_v44 }
 0x190   : > { %v628_v2 = vpop.permute.xlu0 %627  ;;  %1903 = vmatprep.mubr.f32.mxu0 %v6404_v6  ;;  %v849_v26 = vpop.permute.xlu1 %848 }
 0x191   : > { %v1378_v23 = vsel %vm1344_vm4, %v4861_v5, %v628_v2  ;;  %v5238_v31 = vpop.f32.mrf.mxu0 }
 0x192   : > { %3800 = vmatprep.mubr.msk.f32.mxu1 %vm1987_vm9, %v5238_v31  ;;  %v1419_v33 = vsel %vm1385_vm5, %v1378_v23, %v849_v26 }
 0x193   : > { %2179 = vmatmul.mubr.f32.gmra.mxu1 %v5232_v22 }
 0x194   : > { %v1070_v52 = vpop.permute.xlu0 %1069  ;;  %v1291_v32 = vpop.permute.xlu1 %1290 }
 0x195   : > { %v1460_v35 = vsel %vm1426_vm6, %v1419_v33, %v1070_v52 }
 0x196   : > { %v1501_v27 = vsel %vm1467_vm7, %v1460_v35, %v1291_v32 }
 0x197   : > { %v5246_v25 = vpop.f32.mrf.mxu0  ;;  %3767 = vmatmul.mubr.msk.f32.gmra.mxu0 %vm1514_vm8, %v1501_v27 }
 0x198   : > { %v630_v5 = vpop.permute.xlu0 %629  ;;  %1909 = vmatprep.mubr.f32.mxu0 %v6404_v6  ;;  %v851_v42 = vpop.permute.xlu1 %850 }
 0x199   : > { %v1379_v50 = vsel %vm1344_vm4, %v4901_v48, %v630_v5  ;;  %v5252_v63 = vpop.f32.mrf.mxu0 }
 0x19a   : > { %v1420_v29 = vsel %vm1385_vm5, %v1379_v50, %v851_v42  ;;  %3801 = vmatprep.mubr.msk.f32.mxu1 %vm1987_vm9, %v5252_v63 }
 0x19b   : > { %2184 = vmatmul.mubr.f32.gmra.mxu1 %v5246_v25 }
 0x19c   : > { %v1072_v45 = vpop.permute.xlu0 %1071  ;;  %v1293_v47 = vpop.permute.xlu1 %1292 }
 0x19d   : > { %v1461_v36 = vsel %vm1426_vm6, %v1420_v29, %v1072_v45  ;;  %v3872_v29 = vld [vmem:[%s6398_s2 + $0x1b0] sm:$0xff] }
 0x19e   : > { %v1502_v38 = vsel %vm1467_vm7, %v1461_v36, %v1293_v47 }
 0x19f   : > { %v5260_v53 = vpop.f32.mrf.mxu0  ;;  %3768 = vmatmul.mubr.msk.f32.gmra.mxu0 %vm1514_vm8, %v1502_v38 }
 0x1a0   : > { %6418 = vst [vmem:[#allocation2_spill] sm:$0xff] %v5260_v53  ;;  %v632_v48 = vpop.permute.xlu0 %631  ;;  %1915 = vmatprep.mubr.f32.mxu0 %v6404_v6  ;;  %v853_v54 = vpop.permute.xlu1 %852 }
 0x1a1   : > { %v1380_v13 = vsel %vm1344_vm4, %v4906_v8, %v632_v48  ;;  %v5266_v55 = vpop.f32.mrf.mxu0  ;;  %v3870_v48 = vld [vmem:[%s6398_s2 + $0x1a0] sm:$0xff] }
 0x1a2   : > { %v1421_v58 = vsel %vm1385_vm5, %v1380_v13, %v853_v54  ;;  %3802 = vmatprep.mubr.msk.f32.mxu1 %vm1987_vm9, %v5266_v55 }
 0x1a3   : > { %2189 = vmatmul.mubr.f32.gmra.mxu1 %v5260_v53 }
 0x1a4   : > { %v1074_v39 = vpop.permute.xlu0 %1073  ;;  %v1295_v30 = vpop.permute.xlu1 %1294 }
 0x1a5   : > { %v1462_v60 = vsel %vm1426_vm6, %v1421_v58, %v1074_v39  ;;  %v3869_v58 = vld [vmem:[%s6398_s2 + $0x198] sm:$0xff] }
 0x1a6   : > { %v1503_v4 = vsel %vm1467_vm7, %v1462_v60, %v1295_v30 }
 0x1a7   : > { %v5274_v51 = vpop.f32.mrf.mxu0  ;;  %3769 = vmatmul.mubr.msk.f32.gmra.mxu0 %vm1514_vm8, %v1503_v4 }
 0x1a8   : > { %6419 = vst [vmem:[#allocation3_spill] sm:$0xff] %v5274_v51  ;;  %v634_v8 = vpop.permute.xlu0 %633  ;;  %1921 = vmatprep.mubr.f32.mxu0 %v6404_v6  ;;  %v855_v10 = vpop.permute.xlu1 %854 }
 0x1a9   : > { %v1381_v9 = vsel %vm1344_vm4, %v4957_v40, %v634_v8  ;;  %v5280_v1 = vpop.f32.mrf.mxu0  ;;  %v3868_v8 = vld [vmem:[%s6398_s2 + $0x190] sm:$0xff] }
 0x1aa   : > { %6420 = vst [vmem:[#allocation4_spill] sm:$0xff] %v5280_v1  ;;  %v1422_v14 = vsel %vm1385_vm5, %v1381_v9, %v855_v10  ;;  %3803 = vmatprep.mubr.msk.f32.mxu1 %vm1987_vm9, %v5280_v1 }
 0x1ab   : > { %2194 = vmatmul.mubr.f32.gmra.mxu1 %v5274_v51 }
 0x1ac   : > { %v1076_v37 = vpop.permute.xlu0 %1075  ;;  %v1297_v19 = vpop.permute.xlu1 %1296 }
 0x1ad   : > { %v1463_v12 = vsel %vm1426_vm6, %v1422_v14, %v1076_v37 }
 0x1ae   : > { %v1504_v16 = vsel %vm1467_vm7, %v1463_v12, %v1297_v19  ;;  %v3866_v12 = vld [vmem:[%s6398_s2 + $0x180] sm:$0xff] }
 0x1af   : > { %v5288_v28 = vpop.f32.mrf.mxu0  ;;  %3770 = vmatmul.mubr.msk.f32.gmra.mxu0 %vm1514_vm8, %v1504_v16 }
 0x1b0   : > { %6421 = vst [vmem:[#allocation5_spill] sm:$0xff] %v5288_v28  ;;  %v636_v40 = vpop.permute.xlu0 %635  ;;  %1927 = vmatprep.mubr.f32.mxu0 %v6404_v6  ;;  %v857_v44 = vpop.permute.xlu1 %856 }
 0x1b1   : > { %v1382_v20 = vsel %vm1344_vm4, %v4965_v46, %v636_v40  ;;  %v5294_v2 = vpop.f32.mrf.mxu0  ;;  %v3873_v46 = vld [vmem:[%s6398_s2 + $0x1b8] sm:$0xff] }
 0x1b2   : > { %v1423_v23 = vsel %vm1385_vm5, %v1382_v20, %v857_v44  ;;  %3804 = vmatprep.mubr.msk.f32.mxu1 %vm1987_vm9, %v5294_v2  ;;  %2568 = vmatpush1.msra.mxu1 %v3873_v46  ;;  %v3865_v40 = vld [vmem:[%s6398_s2 + $0x178] sm:$0xff]  ;;  %v3920_v46 = vld [vmem:[%s6398_s2 + $0x230] sm:$0xff] }
 0x1b3   : > { %2199 = vmatmul.mubr.f32.gmra.mxu1 %v5288_v28  ;;  %2569 = vmatprep.subr.mxu1 %v6404_v6  ;;  %v3925_v44 = vld [vmem:[%s6398_s2 + $0x258] sm:$0xff] }
 0x1b4   : > { %v1078_v26 = vpop.permute.xlu0 %1077  ;;  %v1299_v52 = vpop.permute.xlu1 %1298  ;;  %2570 = vmatpush1.msra.mxu1 %v3872_v29  ;;  %v3917_v29 = vld [vmem:[%s6398_s2 + $0x218] sm:$0xff] }
 0x1b5   : > { %v1464_v33 = vsel %vm1426_vm6, %v1423_v23, %v1078_v26  ;;  %2571 = vmatprep.subr.mxu1 %v6404_v6  ;;  %v3864_v23 = vld [vmem:[%s6398_s2 + $0x170] sm:$0xff]  ;;  %v3863_v26 = vld [vmem:[%s6398_s2 + $0x168] sm:$0xff] }
 0x1b6   : > { %v1505_v35 = vsel %vm1467_vm7, %v1464_v33, %v1299_v52  ;;  %v3923_v33 = vld [vmem:[%s6398_s2 + $0x248] sm:$0xff] }
 0x1b7   : > { %v5302_v32 = vpop.f32.mrf.mxu0  ;;  %3771 = vmatmul.mubr.msk.f32.gmra.mxu0 %vm1514_vm8, %v1505_v35  ;;  %v3862_v35 = vld [vmem:[%s6398_s2 + $0x160] sm:$0xff] }
 0x1b8   : > { %v638_v27 = vpop.permute.xlu0 %637  ;;  %1933 = vmatprep.mubr.f32.mxu0 %v6404_v6  ;;  %v859_v50 = vpop.permute.xlu1 %858 }
 0x1b9   : > { %v1383_v5 = vsel %vm1344_vm4, %v5026_v34, %v638_v27  ;;  %v5311_v42 = vpop.f32.mrf.mxu0  ;;  %v3871_v34 = vld [vmem:[%s6398_s2 + $0x1a8] sm:$0xff] }
 0x1ba   : > { %6422 = vst [vmem:[#allocation6_spill] sm:$0xff] %v5311_v42  ;;  %v1424_v45 = vsel %vm1385_vm5, %v1383_v5, %v859_v50  ;;  %3805 = vmatprep.mubr.msk.f32.mxu1 %vm1987_vm9, %v5311_v42  ;;  %2572 = vmatpush1.msra.mxu1 %v3871_v34  ;;  %v3860_v5 = vld [vmem:[%s6398_s2 + $0x150] sm:$0xff]  ;;  %v3859_v50 = vld [vmem:[%s6398_s2 + $0x148] sm:$0xff] }
 0x1bb   : > { %2204 = vmatmul.mubr.f32.gmra.mxu1 %v5302_v32  ;;  %2573 = vmatprep.subr.mxu1 %v6404_v6  ;;  %v3916_v34 = vld [vmem:[%s6398_s2 + $0x210] sm:$0xff] }
 0x1bc   : > { %v1080_v36 = vpop.permute.xlu0 %1079  ;;  %v1301_v38 = vpop.permute.xlu1 %1300  ;;  %2574 = vmatpush1.msra.mxu1 %v3870_v48  ;;  %v3877_v48 = vld [vmem:[%s6398_s2 + $0x1d8] sm:$0xff] }
 0x1bd   : > { %v1465_v47 = vsel %vm1426_vm6, %v1424_v45, %v1080_v36  ;;  %2575 = vmatprep.subr.mxu1 %v6404_v6 }
 0x1be   : > { %v1506_v13 = vsel %vm1467_vm7, %v1465_v47, %v1301_v38  ;;  %2576 = vmatpush1.msra.mxu1 %v3869_v58  ;;  %v3915_v47 = vld [vmem:[%s6398_s2 + $0x208] sm:$0xff]  ;;  %v3858_v38 = vld [vmem:[%s6398_s2 + $0x140] sm:$0xff] }
 0x1bf   : > { %v5331_v54 = vpop.f32.mrf.mxu0  ;;  %3772 = vmatmul.mubr.msk.f32.gmra.mxu0 %vm1514_vm8, %v1506_v13  ;;  %2577 = vmatprep.subr.mxu1 %v6404_v6  ;;  %v3914_v13 = vld [vmem:[%s6398_s2 + $0x200] sm:$0xff] }
 0x1c0   : > { %v640_v39 = vpop.permute.xlu0 %639  ;;  %1939 = vmatprep.mubr.f32.mxu0 %v6404_v6  ;;  %v861_v30 = vpop.permute.xlu1 %860  ;;  %2578 = vmatpush1.msra.mxu1 %v3868_v8  ;;  %v3876_v8 = vld [vmem:[%s6398_s2 + $0x1d0] sm:$0xff] }
 0x1c1   : > { %v1384_v60 = vsel %vm1344_vm4, %v5034_v41, %v640_v39  ;;  %v5341_v4 = vpop.f32.mrf.mxu0  ;;  %2579 = vmatprep.subr.mxu1 %v6404_v6  ;;  %v3867_v41 = vld [vmem:[%s6398_s2 + $0x188] sm:$0xff]  ;;  %v3913_v39 = vld [vmem:[%s6398_s2 + $0x1f8] sm:$0xff] }
 0x1c2   : > { %v1425_v9 = vsel %vm1385_vm5, %v1384_v60, %v861_v30  ;;  %3806 = vmatprep.mubr.msk.f32.mxu1 %vm1987_vm9, %v5341_v4  ;;  %2580 = vmatpush1.msra.mxu1 %v3867_v41  ;;  %v3912_v30 = vld [vmem:[%s6398_s2 + $0x1f0] sm:$0xff]  ;;  %v3911_v41 = vld [vmem:[%s6398_s2 + $0x1e8] sm:$0xff] }
 0x1c3   : > { %2209 = vmatmul.mubr.f32.gmra.mxu1 %v5331_v54  ;;  %2581 = vmatprep.subr.mxu1 %v6404_v6 }
 0x1c4   : > { %v1082_v10 = vpop.permute.xlu0 %1081  ;;  %v1303_v37 = vpop.permute.xlu1 %1302  ;;  %2582 = vmatpush1.msra.mxu1 %v3866_v12  ;;  %v3929_v12 = vld [vmem:[%s6398_s2 + $0x278] sm:$0xff] }
 0x1c5   : > { %v1466_v14 = vsel %vm1426_vm6, %v1425_v9, %v1082_v10  ;;  %2583 = vmatprep.subr.mxu1 %v6404_v6  ;;  %v3875_v9 = vld [vmem:[%s6398_s2 + $0x1c8] sm:$0xff] }
 0x1c6   : > { %v1507_v19 = vsel %vm1467_vm7, %v1466_v14, %v1303_v37  ;;  %2584 = vmatpush1.msra.mxu1 %v3865_v40  ;;  %v3910_v14 = vld [vmem:[%s6398_s2 + $0x1e0] sm:$0xff]  ;;  %v3928_v40 = vld [vmem:[%s6398_s2 + $0x270] sm:$0xff] }
 0x1c7   : > { %v5361_v16 = vpop.f32.mrf.mxu0  ;;  %3773 = vmatmul.mubr.msk.f32.gmra.mxu0 %vm1514_vm8, %v1507_v19  ;;  %2585 = vmatprep.subr.mxu1 %v6404_v6  ;;  %v3874_v19 = vld [vmem:[%s6398_s2 + $0x1c0] sm:$0xff] }
 0x1c8   : > { %3826 = vmatprep.mubr.msk.f32.mxu0 %vm1987_vm9, %v5134_v59  ;;  %2586 = vmatpush1.msra.mxu1 %v3864_v23  ;;  %v3924_v59 = vld [vmem:[%s6398_s2 + $0x250] sm:$0xff]  ;;  %v3927_v23 = vld [vmem:[%s6398_s2 + $0x268] sm:$0xff] }
 0x1c9   : > { %v5370_v20 = vpop.f32.mrf.mxu0  ;;  %2587 = vmatprep.subr.mxu1 %v6404_v6 }
 0x1ca   : > { %6423 = vst [vmem:[#allocation7_spill] sm:$0xff] %v5370_v20  ;;  %3807 = vmatprep.mubr.msk.f32.mxu1 %vm1987_vm9, %v5370_v20  ;;  %2588 = vmatpush1.msra.mxu1 %v3863_v26  ;;  %v3926_v26 = vld [vmem:[%s6398_s2 + $0x260] sm:$0xff] }
 0x1cb   : > { %2214 = vmatmul.mubr.f32.gmra.mxu1 %v5361_v16  ;;  %2380 = vmatmul.mubr.f32.vlgmr.msra.gmra.mxu0 %v5124_v49 }
 0x1cc   : > { %3827 = vmatprep.mubr.msk.f32.mxu0 %vm1987_vm9, %v5144_v0  ;;  %2852 = vmatpush1.msra.mxu0 %v3925_v44  ;;  %v3922_v0 = vld [vmem:[%s6398_s2 + $0x240] sm:$0xff] }
 0x1cd   : > { %2853 = vmatprep.subr.mxu0 %v6404_v6  ;;  %2589 = vmatprep.subr.mxu1 %v6404_v6 }
 0x1ce   : > { %2854 = vmatpush1.msra.mxu0 %v3924_v59  ;;  %2590 = vmatpush1.msra.mxu1 %v3862_v35 }
 0x1cf   : > { %v5396_v49 = vpop.f32.mrf.mxu0  ;;  %2385 = vmatmul.mubr.f32.gmra.mxu0 %v5138_v61  ;;  %2855 = vmatprep.subr.mxu0 %v6404_v6  ;;  %v3921_v61 = vld [vmem:[%s6398_s2 + $0x238] sm:$0xff] }
 0x1d0   : > { %3828 = vmatprep.mubr.msk.f32.mxu0 %vm1987_vm9, %v5154_v17  ;;  %2856 = vmatpush1.msra.mxu0 %v3923_v33  ;;  %v3861_v17 = vld [vmem:[%s6398_s2 + $0x158] sm:$0xff] }
 0x1d1   : > { %v5405_v52 = vpop.f32.mrf.mxu0  ;;  %2857 = vmatprep.subr.mxu0 %v6404_v6  ;;  %2591 = vmatprep.subr.mxu1 %v6404_v6 }
 0x1d2   : > { %3808 = vmatprep.mubr.msk.f32.mxu1 %vm1987_vm9, %v5405_v52  ;;  %2858 = vmatpush1.msra.mxu0 %v3922_v0 }
 0x1d3   : > { %2219 = vmatmul.mubr.f32.gmra.mxu1 %v5396_v49  ;;  %2390 = vmatmul.mubr.f32.gmra.mxu0 %v5148_v24 }
 0x1d4   : > { %3829 = vmatprep.mubr.msk.f32.mxu0 %vm1987_vm9, %v5168_v56  ;;  %2859 = vmatprep.subr.mxu0 %v6404_v6  ;;  %v3919_v56 = vld [vmem:[%s6398_s2 + $0x228] sm:$0xff] }
 0x1d5   : > { %2860 = vmatpush1.msra.mxu0 %v3921_v61  ;;  %2592 = vmatpush1.msra.mxu1 %v3861_v17 }
 0x1d6   : > { %2861 = vmatprep.subr.mxu0 %v6404_v6  ;;  %2593 = vmatprep.subr.mxu1 %v6404_v6 }
 0x1d7   : > { %v5430_v24 = vpop.f32.mrf.mxu0  ;;  %2395 = vmatmul.mubr.f32.gmra.mxu0 %v5162_v21  ;;  %v3918_v21 = vld [vmem:[%s6398_s2 + $0x220] sm:$0xff]  ;;  %2594 = vmatpush1.msra.mxu1 %v3860_v5 }
 0x1d8   : > { %3830 = vmatprep.mubr.msk.f32.mxu0 %vm1987_vm9, %v5182_v7  ;;  %2862 = vmatpush1.msra.mxu0 %v3920_v46 }
 0x1d9   : > { %v5438_v27 = vpop.f32.mrf.mxu0  ;;  %2863 = vmatprep.subr.mxu0 %v6404_v6  ;;  %2595 = vmatprep.subr.mxu1 %v6404_v6 }
 0x1da   : > { %6424 = vst [vmem:[#allocation8_spill] sm:$0xff] %v5438_v27  ;;  %3809 = vmatprep.mubr.msk.f32.mxu1 %vm1987_vm9, %v5438_v27  ;;  %2864 = vmatpush1.msra.mxu0 %v3919_v56 }
 0x1db   : > { %2224 = vmatmul.mubr.f32.gmra.mxu1 %v5430_v24  ;;  %2400 = vmatmul.mubr.f32.gmra.mxu0 %v5176_v43 }
 0x1dc   : > { %3831 = vmatprep.mubr.msk.f32.mxu0 %vm1987_vm9, %v5196_v57  ;;  %2865 = vmatprep.subr.mxu0 %v6404_v6 }
 0x1dd   : > { %2866 = vmatpush1.msra.mxu0 %v3918_v21  ;;  %2596 = vmatpush1.msra.mxu1 %v3859_v50 }
 0x1de   : > { %2867 = vmatprep.subr.mxu0 %v6404_v6  ;;  %2597 = vmatprep.subr.mxu1 %v6404_v6 }
 0x1df   : > { %v5463_v45 = vpop.f32.mrf.mxu0  ;;  %2405 = vmatmul.mubr.f32.gmra.mxu0 %v5190_v62  ;;  %2598 = vmatpush1.msra.mxu1 %v3858_v38 }
 0x1e0   : > { %3832 = vmatprep.mubr.msk.f32.mxu0 %vm1987_vm9, %v5210_v3  ;;  %2868 = vmatpush1.msra.mxu0 %v3917_v29 }
 0x1e1   : > { %v5471_v36 = vpop.f32.mrf.mxu0  ;;  %2869 = vmatprep.subr.mxu0 %v6404_v6  ;;  %2623 = vmatprep.subr.mxu1 %v6404_v6 }
 0x1e2   : > { %3810 = vmatprep.mubr.msk.f32.mxu1 %vm1987_vm9, %v5471_v36  ;;  %2870 = vmatpush1.msra.mxu0 %v3916_v34 }
 0x1e3   : > { %2229 = vmatmul.mubr.f32.gmra.mxu1 %v5463_v45  ;;  %2410 = vmatmul.mubr.f32.gmra.mxu0 %v5204_v15 }
 0x1e4   : > { %3833 = vmatprep.mubr.msk.f32.mxu0 %vm1987_vm9, %v5224_v18  ;;  %2871 = vmatprep.subr.mxu0 %v6404_v6 }
 0x1e5   : > { %2872 = vmatpush1.msra.mxu0 %v3915_v47  ;;  %2624 = vmatpush2.msra.mxu1 %v3877_v48 }
 0x1e6   : > { %2873 = vmatprep.subr.mxu0 %v6404_v6  ;;  %2625 = vmatprep.subr.mxu1 %v6404_v6 }
 0x1e7   : > { %v5496_v58 = vpop.f32.mrf.mxu0  ;;  %2415 = vmatmul.mubr.f32.gmra.mxu0 %v5218_v11  ;;  %2626 = vmatpush2.msra.mxu1 %v3876_v8 }
 0x1e8   : > { %3834 = vmatprep.mubr.msk.f32.mxu0 %vm1987_vm9, %v5238_v31  ;;  %2874 = vmatpush1.msra.mxu0 %v3914_v13 }
 0x1e9   : > { %v5504_v60 = vpop.f32.mrf.mxu0  ;;  %2875 = vmatprep.subr.mxu0 %v6404_v6  ;;  %2627 = vmatprep.subr.mxu1 %v6404_v6 }
 0x1ea   : > { %6425 = vst [vmem:[#allocation9_spill] sm:$0xff] %v5504_v60  ;;  %3811 = vmatprep.mubr.msk.f32.mxu1 %vm1987_vm9, %v5504_v60  ;;  %2876 = vmatpush1.msra.mxu0 %v3913_v39 }
 0x1eb   : > { %2234 = vmatmul.mubr.f32.gmra.mxu1 %v5496_v58  ;;  %2420 = vmatmul.mubr.f32.gmra.mxu0 %v5232_v22 }
 0x1ec   : > { %3835 = vmatprep.mubr.msk.f32.mxu0 %vm1987_vm9, %v5252_v63  ;;  %2877 = vmatprep.subr.mxu0 %v6404_v6 }
 0x1ed   : > { %2878 = vmatpush1.msra.mxu0 %v3912_v30  ;;  %2628 = vmatpush2.msra.mxu1 %v3875_v9 }
 0x1ee   : > { %2879 = vmatprep.subr.mxu0 %v6404_v6  ;;  %2629 = vmatprep.subr.mxu1 %v6404_v6 }
 0x1ef   : > { %v5529_v10 = vpop.f32.mrf.mxu0  ;;  %2425 = vmatmul.mubr.f32.gmra.mxu0 %v5246_v25  ;;  %2630 = vmatpush2.msra.mxu1 %v3874_v19 }
 0x1f0   : > { %3836 = vmatprep.mubr.msk.f32.mxu0 %vm1987_vm9, %v5266_v55  ;;  %2880 = vmatpush1.msra.mxu0 %v3911_v41 }
 0x1f1   : > { %v5537_v37 = vpop.f32.mrf.mxu0  ;;  %2881 = vmatprep.subr.mxu0 %v6404_v6  ;;  %3135 = vmatprep.subr.mxu1 %v6404_v6 }
 0x1f2   : > { %3812 = vmatprep.mubr.msk.f32.mxu1 %vm1987_vm9, %v5537_v37  ;;  %2882 = vmatpush1.msra.mxu0 %v3910_v14 }
 0x1f3   : > { %2239 = vmatmul.mubr.f32.gmra.mxu1 %v5529_v10  ;;  %2430 = vmatmul.mubr.f32.gmra.mxu0 %v5260_v53 }
 0x1f4   : > { %3837 = vmatprep.mubr.msk.f32.mxu0 %vm1987_vm9, %v5280_v1  ;;  %2907 = vmatprep.subr.mxu0 %v6404_v6 }
 0x1f5   : > { %2908 = vmatpush2.msra.mxu0 %v3929_v12 }
 0x1f6   : > { %2909 = vmatprep.subr.mxu0 %v6404_v6 }
 0x1f7   : > { %v5559_v44 = vpop.f32.mrf.mxu0  ;;  %2435 = vmatmul.mubr.f32.gmra.mxu0 %v5274_v51 }
 0x1f8   : > { %3838 = vmatprep.mubr.msk.f32.mxu0 %vm1987_vm9, %v5294_v2  ;;  %2910 = vmatpush2.msra.mxu0 %v3928_v40 }
 0x1f9   : > { %v5567_v59 = vpop.f32.mrf.mxu0  ;;  %2911 = vmatprep.subr.mxu0 %v6404_v6 }
 0x1fa   : > { %6426 = vst [vmem:[#allocation10_spill] sm:$0xff] %v5567_v59  ;;  %3813 = vmatprep.mubr.msk.f32.mxu1 %vm1987_vm9, %v5567_v59  ;;  %2912 = vmatpush2.msra.mxu0 %v3927_v23 }
 0x1fb   : > { %2244 = vmatmul.mubr.f32.gmra.mxu1 %v5559_v44  ;;  %2440 = vmatmul.mubr.f32.gmra.mxu0 %v5288_v28 }
 0x1fc   : > { %3839 = vmatprep.mubr.msk.f32.mxu0 %vm1987_vm9, %v5311_v42  ;;  %2913 = vmatprep.subr.mxu0 %v6404_v6 }
 0x1fd   : > { %2914 = vmatpush2.msra.mxu0 %v3926_v26 }
 0x1ff   : > { %v5580_v33 = vpop.f32.mrf.mxu0  ;;  %2445 = vmatmul.mubr.f32.gmra.mxu0 %v5302_v32 }
 0x200   : > { %3840 = vmatprep.mubr.msk.f32.mxu0 %vm1987_vm9, %v5341_v4 }
 0x201   : > { %v5585_v0 = vpop.f32.mrf.mxu0 }
 0x202   : > { %3814 = vmatprep.mubr.msk.f32.mxu1 %vm1987_vm9, %v5585_v0 }
 0x203   : > { %2249 = vmatmul.mubr.f32.gmra.mxu1 %v5580_v33  ;;  %2450 = vmatmul.mubr.f32.gmra.mxu0 %v5331_v54 }
 0x204   : > { %3841 = vmatprep.mubr.msk.f32.mxu0 %vm1987_vm9, %v5370_v20 }
 0x207   : > { %v5593_v61 = vpop.f32.mrf.mxu0  ;;  %2455 = vmatmul.mubr.f32.gmra.mxu0 %v5361_v16 }
 0x208   : > { %6427 = vst [vmem:[#allocation11_spill] sm:$0xff] %v5593_v61  ;;  %3842 = vmatprep.mubr.msk.f32.mxu0 %vm1987_vm9, %v5405_v52 }
 0x209   : > { %v5598_v35 = vpop.f32.mrf.mxu0 }
 0x20a   : > { %6428 = vst [vmem:[#allocation12_spill] sm:$0xff] %v5598_v35  ;;  %3815 = vmatprep.mubr.msk.f32.mxu1 %vm1987_vm9, %v5598_v35 }
 0x20b   : > { %2254 = vmatmul.mubr.f32.gmra.mxu1 %v5593_v61  ;;  %2460 = vmatmul.mubr.f32.gmra.mxu0 %v5396_v49 }
 0x20c   : > { %3843 = vmatprep.mubr.msk.f32.mxu0 %vm1987_vm9, %v5438_v27 }
 0x20f   : > { %v5606_v17 = vpop.f32.mrf.mxu0  ;;  %2465 = vmatmul.mubr.f32.gmra.mxu0 %v5430_v24 }
 0x210   : > { %3844 = vmatprep.mubr.msk.f32.mxu0 %vm1987_vm9, %v5471_v36 }
 0x211   : > { %v5611_v46 = vpop.f32.mrf.mxu0 }
 0x212   : > { %6429 = vst [vmem:[#allocation13_spill] sm:$0xff] %v5611_v46  ;;  %3816 = vmatprep.mubr.msk.f32.mxu1 %vm1987_vm9, %v5611_v46 }
 0x213   : > { %2259 = vmatmul.mubr.f32.gmra.mxu1 %v5606_v17  ;;  %2470 = vmatmul.mubr.f32.gmra.mxu0 %v5463_v45 }
 0x214   : > { %3845 = vmatprep.mubr.msk.f32.mxu0 %vm1987_vm9, %v5504_v60 }
 0x217   : > { %v5619_v56 = vpop.f32.mrf.mxu0  ;;  %2475 = vmatmul.mubr.f32.gmra.mxu0 %v5496_v58 }
 0x218   : > { %3846 = vmatprep.mubr.msk.f32.mxu0 %vm1987_vm9, %v5537_v37 }
 0x219   : > { %v5624_v21 = vpop.f32.mrf.mxu0 }
 0x21a   : > { %3817 = vmatprep.mubr.msk.f32.mxu1 %vm1987_vm9, %v5624_v21 }
 0x21b   : > { %2264 = vmatmul.mubr.f32.gmra.mxu1 %v5619_v56  ;;  %2480 = vmatmul.mubr.f32.gmra.mxu0 %v5529_v10 }
 0x21c   : > { %3847 = vmatprep.mubr.msk.f32.mxu0 %vm1987_vm9, %v5567_v59 }
 0x21f   : > { %v5632_v5 = vpop.f32.mrf.mxu0  ;;  %2485 = vmatmul.mubr.f32.gmra.mxu0 %v5559_v44 }
 0x220   : > { %3848 = vmatprep.mubr.msk.f32.mxu0 %vm1987_vm9, %v5585_v0 }
 0x221   : > { %v5637_v50 = vpop.f32.mrf.mxu0 }
 0x222   : > { %3818 = vmatprep.mubr.msk.f32.mxu1 %vm1987_vm9, %v5637_v50 }
 0x223   : > { %v5641_v29 = vpop.f32.mrf.mxu1  ;;  %2269 = vmatmul.mubr.f32.gmra.mxu1 %v5632_v5  ;;  %2490 = vmatmul.mubr.f32.gmra.mxu0 %v5580_v33 }
 0x224   : > { %6430 = vst [vmem:[#allocation14_spill] sm:$0xff] %v5641_v29  ;;  %3849 = vmatprep.mubr.msk.f32.mxu0 %vm1987_vm9, %v5598_v35 }
 0x225   : > { %v2152_v34 = vpop.f32.mrf.mxu1 }
 0x227   : > { %v5647_v47 = vpop.f32.mrf.mxu0  ;;  %2495 = vmatmul.mubr.f32.gmra.mxu0 %v5593_v61 }
 0x228   : > { %3850 = vmatprep.mubr.msk.f32.mxu0 %vm1987_vm9, %v5611_v46 }
 0x229   : > { %v5652_v38 = vpop.f32.mrf.mxu0 }
 0x22a   : > { %3819 = vmatprep.mubr.msk.f32.mxu1 %vm1987_vm9, %v5652_v38 }
 0x22b   : > { %v5656_v48 = vpop.f32.mrf.mxu1  ;;  %2274 = vmatmul.mubr.f32.gmra.mxu1 %v5647_v47  ;;  %2500 = vmatmul.mubr.f32.gmra.mxu0 %v5606_v17 }
 0x22c   : > { %6431 = vst [vmem:[#allocation15_spill] sm:$0xff] %v5656_v48  ;;  %3851 = vmatprep.mubr.msk.f32.mxu0 %vm1987_vm9, %v5624_v21  ;;  %v3977_v48 = vld [vmem:[%s6398_s2 + $0x2f8] sm:$0xff] }
 0x22d   : > { %v2157_v13 = vpop.f32.mrf.mxu1 }
 0x22f   : > { %v5662_v39 = vpop.f32.mrf.mxu0  ;;  %2505 = vmatmul.mubr.f32.gmra.mxu0 %v5619_v56 }
 0x230   : > { %3852 = vmatprep.mubr.msk.f32.mxu0 %vm1987_vm9, %v5637_v50 }
 0x231   : > { %v5667_v30 = vpop.f32.mrf.mxu0 }
 0x232   : > { %3820 = vmatprep.mubr.msk.f32.mxu1 %vm1987_vm9, %v5667_v30 }
 0x233   : > { %v5671_v8 = vpop.f32.mrf.mxu1  ;;  %2279 = vmatmul.mubr.f32.gmra.mxu1 %v5662_v39  ;;  %2510 = vmatmul.mubr.f32.gmra.mxu0 %v5632_v5 }
 0x234   : > { %6432 = vst [vmem:[#allocation16_spill] sm:$0xff] %v5671_v8  ;;  %3853 = vmatprep.mubr.msk.f32.mxu0 %vm1987_vm9, %v5652_v38 }
 0x235   : > { %v2162_v9 = vpop.f32.mrf.mxu1 }
 0x237   : > { %v5677_v41 = vpop.f32.mrf.mxu0  ;;  %2515 = vmatmul.mubr.f32.gmra.mxu0 %v5647_v47 }
 0x238   : > { %3854 = vmatprep.mubr.msk.f32.mxu0 %vm1987_vm9, %v5667_v30 }
 0x239   : > { %v5682_v14 = vpop.f32.mrf.mxu0 }
 0x23a   : > { %3821 = vmatprep.mubr.msk.f32.mxu1 %vm1987_vm9, %v5682_v14 }
 0x23b   : > { %v5686_v12 = vpop.f32.mrf.mxu1  ;;  %2284 = vmatmul.mubr.f32.gmra.mxu1 %v5677_v41  ;;  %2520 = vmatmul.mubr.f32.gmra.mxu0 %v5662_v39 }
 0x23c   : > { %6433 = vst [vmem:[#allocation17_spill] sm:$0xff] %v5686_v12  ;;  %3855 = vmatprep.mubr.msk.f32.mxu0 %vm1987_vm9, %v5682_v14 }
 0x23d   : > { %v2167_v19 = vpop.f32.mrf.mxu1 }
 0x23f   : > { %v5692_v40 = vpop.f32.mrf.mxu0  ;;  %2525 = vmatmul.mubr.f32.gmra.mxu0 %v5677_v41 }
 0x241   : > { %v5695_v23 = vpop.f32.mrf.mxu0 }
 0x242   : > { %3822 = vmatprep.mubr.msk.f32.mxu1 %vm1987_vm9, %v5695_v23  ;;  %3856 = vmatprep.mubr.msk.f32.mxu0 %vm1987_vm9, %v5695_v23 }
 0x243   : > { %v5701_v26 = vpop.f32.mrf.mxu1  ;;  %2289 = vmatmul.mubr.f32.gmra.mxu1 %v5692_v40  ;;  %2530 = vmatmul.mubr.f32.gmra.mxu0 %v5692_v40 }
 0x244   : > { %6434 = vst [vmem:[#allocation18_spill] sm:$0xff] %v5701_v26 }
 0x245   : > { %v2172_v34 = vpop.f32.mrf.mxu1 }
 0x247   : > { %v5705_v13 = vpop.f32.mrf.mxu0 }
 0x249   : > { %v5707_v9 = vpop.f32.mrf.mxu0 }
 0x24a   : > { %3823 = vmatprep.mubr.msk.f32.mxu1 %vm1987_vm9, %v5707_v9  ;;  %3857 = vmatprep.mubr.msk.f32.mxu0 %vm1987_vm9, %v5707_v9 }
 0x24b   : > { %v5713_v19 = vpop.f32.mrf.mxu1  ;;  %2294 = vmatmul.mubr.f32.gmra.mxu1 %v5705_v13  ;;  %2535 = vmatmul.mubr.f32.gmra.mxu0 %v5705_v13 }
 0x24c   : > { %6435 = vst [vmem:[#allocation19_spill] sm:$0xff] %v5713_v19  ;;  %3930 = vmatprep.mubr.msk.f32.mxu0 %vm1987_vm9, %v5210_v3 }
 0x24d   : > { %v2177_v34 = vpop.f32.mrf.mxu1 }
 0x24f   : > { %v5719_v6 = vpop.f32.mrf.mxu0  ;;  %2916 = vmatmul.mubr.f32.vlgmr.msra.gmra.mxu0 %v5204_v15 }
 0x250   : > { %3931 = vmatprep.mubr.msk.f32.mxu0 %vm1987_vm9, %v5224_v18 }
 0x251   : > { %v5724_v26 = vpop.f32.mrf.mxu0 }
 0x252   : > { %3824 = vmatprep.mubr.msk.f32.mxu1 %vm1987_vm9, %v5724_v26 }
 0x253   : > { %v5728_v19 = vpop.f32.mrf.mxu1  ;;  %2299 = vmatmul.mubr.f32.gmra.mxu1 %v5719_v6  ;;  %2921 = vmatmul.mubr.f32.gmra.mxu0 %v5218_v11 }
 0x254   : > { %6436 = vst [vmem:[#allocation20_spill] sm:$0xff] %v5728_v19  ;;  %3932 = vmatprep.mubr.msk.f32.mxu0 %vm1987_vm9, %v5238_v31 }
 0x255   : > { %v2182_v34 = vpop.f32.mrf.mxu1 }
 0x257   : > { %v5734_v12 = vpop.f32.mrf.mxu0  ;;  %2926 = vmatmul.mubr.f32.gmra.mxu0 %v5232_v22 }
 0x258   : > { %3933 = vmatprep.mubr.msk.f32.mxu0 %vm1987_vm9, %v5252_v63 }
 0x259   : > { %v5739_v8 = vpop.f32.mrf.mxu0 }
 0x25a   : > { %3825 = vmatprep.mubr.msk.f32.mxu1 %vm1987_vm9, %v5739_v8 }
 0x25b   : > { %v5743_v19 = vpop.f32.mrf.mxu1  ;;  %2304 = vmatmul.mubr.f32.gmra.mxu1 %v5734_v12  ;;  %2931 = vmatmul.mubr.f32.gmra.mxu0 %v5246_v25 }
 0x25c   : > { %6437 = vst [vmem:[#allocation21_spill] sm:$0xff] %v5743_v19  ;;  %3878 = vmatprep.mubr.msk.f32.mxu1 %vm1987_vm9, %v5182_v7  ;;  %3934 = vmatprep.mubr.msk.f32.mxu0 %vm1987_vm9, %v5266_v55  ;;  %v6438_v7 = vmov 0.0  }
 0x25d   : > { %v2187_v34 = vpop.f32.mrf.mxu1 }
 0x25e   : > { %v3976_v34 = vld [vmem:[%s6398_s2 + $0x2f0] sm:$0xff] }
 0x25f   : > { %2632 = vmatmul.mubr.f32.vlgmr.msra.gmra.mxu1 %v5176_v43  ;;  %2936 = vmatmul.mubr.f32.gmra.mxu0 %v5260_v53  ;;  %v5756_v19 = vpop.f32.mrf.mxu0 }
 0x260   : > { %3879 = vmatprep.mubr.msk.f32.mxu1 %vm1987_vm9, %v5196_v57  ;;  %3935 = vmatprep.mubr.msk.f32.mxu0 %vm1987_vm9, %v5280_v1 }
 0x261   : > { %3136 = vmatpush1.msra.mxu1 %v3977_v48  ;;  %v5770_v43 = vpop.f32.mrf.mxu0  ;;  %v3975_v48 = vld [vmem:[%s6398_s2 + $0x2e8] sm:$0xff] }
 0x262   : > { %3137 = vmatprep.subr.mxu1 %v6438_v7 }
 0x263   : > { %v5766_v29 = vpop.f32.mrf.mxu1  ;;  %2637 = vmatmul.mubr.f32.gmra.mxu1 %v5190_v62  ;;  %2941 = vmatmul.mubr.f32.gmra.mxu0 %v5274_v51 }
 0x264   : > { %6439 = vst [vmem:[#allocation22_spill] sm:$0xff] %v5766_v29  ;;  %3880 = vmatprep.mubr.msk.f32.mxu1 %vm1987_vm9, %v5210_v3  ;;  %3936 = vmatprep.mubr.msk.f32.mxu0 %vm1987_vm9, %v5294_v2  ;;  %v3974_v3 = vld [vmem:[%s6398_s2 + $0x2e0] sm:$0xff] }
 0x265   : > { %v2192_v57 = vpop.f32.mrf.mxu1  ;;  %3138 = vmatpush1.msra.mxu1 %v3976_v34 }
 0x266   : > { %3139 = vmatprep.subr.mxu1 %v6438_v7  ;;  %v3973_v57 = vld [vmem:[%s6398_s2 + $0x2d8] sm:$0xff] }
 0x267   : > { %2642 = vmatmul.mubr.f32.gmra.mxu1 %v5204_v15  ;;  %2946 = vmatmul.mubr.f32.gmra.mxu0 %v5288_v28  ;;  %v5782_v62 = vpop.f32.mrf.mxu0 }
 0x268   : > { %3881 = vmatprep.mubr.msk.f32.mxu1 %vm1987_vm9, %v5224_v18  ;;  %3937 = vmatprep.mubr.msk.f32.mxu0 %vm1987_vm9, %v5311_v42 }
 0x269   : > { %3140 = vmatpush1.msra.mxu1 %v3975_v48  ;;  %v5796_v15 = vpop.f32.mrf.mxu0  ;;  %v3972_v48 = vld [vmem:[%s6398_s2 + $0x2d0] sm:$0xff] }
 0x26a   : > { %3141 = vmatprep.subr.mxu1 %v6438_v7 }
 0x26b   : > { %v5792_v34 = vpop.f32.mrf.mxu1  ;;  %2647 = vmatmul.mubr.f32.gmra.mxu1 %v5218_v11  ;;  %2951 = vmatmul.mubr.f32.gmra.mxu0 %v5302_v32 }
 0x26c   : > { %6440 = vst [vmem:[#allocation23_spill] sm:$0xff] %v5792_v34  ;;  %3882 = vmatprep.mubr.msk.f32.mxu1 %vm1987_vm9, %v5238_v31  ;;  %3938 = vmatprep.mubr.msk.f32.mxu0 %vm1987_vm9, %v5341_v4  ;;  %v3971_v34 = vld [vmem:[%s6398_s2 + $0x2c8] sm:$0xff] }
 0x26d   : > { %v2197_v18 = vpop.f32.mrf.mxu1  ;;  %3142 = vmatpush1.msra.mxu1 %v3974_v3 }
 0x26e   : > { %3143 = vmatprep.subr.mxu1 %v6438_v7 }
 0x26f   : > { %2652 = vmatmul.mubr.f32.gmra.mxu1 %v5232_v22  ;;  %2956 = vmatmul.mubr.f32.gmra.mxu0 %v5331_v54  ;;  %v5808_v11 = vpop.f32.mrf.mxu0 }
 0x270   : > { %3883 = vmatprep.mubr.msk.f32.mxu1 %vm1987_vm9, %v5252_v63  ;;  %3939 = vmatprep.mubr.msk.f32.mxu0 %vm1987_vm9, %v5370_v20 }
 0x271   : > { %3144 = vmatpush1.msra.mxu1 %v3973_v57  ;;  %v5822_v18 = vpop.f32.mrf.mxu0 }
 0x272   : > { %3145 = vmatprep.subr.mxu1 %v6438_v7 }
 0x273   : > { %v5818_v3 = vpop.f32.mrf.mxu1  ;;  %2657 = vmatmul.mubr.f32.gmra.mxu1 %v5246_v25  ;;  %2961 = vmatmul.mubr.f32.gmra.mxu0 %v5361_v16 }
 0x274   : > { %3884 = vmatprep.mubr.msk.f32.mxu1 %vm1987_vm9, %v5266_v55  ;;  %3940 = vmatprep.mubr.msk.f32.mxu0 %vm1987_vm9, %v5405_v52 }
 0x275   : > { %v2202_v57 = vpop.f32.mrf.mxu1  ;;  %3146 = vmatpush1.msra.mxu1 %v3972_v48  ;;  %v3970_v48 = vld [vmem:[%s6398_s2 + $0x2c0] sm:$0xff] }
 0x276   : > { %3147 = vmatprep.subr.mxu1 %v6438_v7 }
 0x277   : > { %2662 = vmatmul.mubr.f32.gmra.mxu1 %v5260_v53  ;;  %2966 = vmatmul.mubr.f32.gmra.mxu0 %v5396_v49  ;;  %v5834_v29 = vpop.f32.mrf.mxu0 }
 0x278   : > { %3885 = vmatprep.mubr.msk.f32.mxu1 %vm1987_vm9, %v5280_v1  ;;  %3941 = vmatprep.mubr.msk.f32.mxu0 %vm1987_vm9, %v5438_v27  ;;  %v3969_v1 = vld [vmem:[%s6398_s2 + $0x2b8] sm:$0xff] }
 0x279   : > { %3148 = vmatpush1.msra.mxu1 %v3971_v34  ;;  %v5848_v53 = vpop.f32.mrf.mxu0 }
 0x27a   : > { %3149 = vmatprep.subr.mxu1 %v6438_v7 }
 0x27b   : > { %v5844_v57 = vpop.f32.mrf.mxu1  ;;  %2667 = vmatmul.mubr.f32.gmra.mxu1 %v5274_v51  ;;  %2971 = vmatmul.mubr.f32.gmra.mxu0 %v5430_v24 }
 0x27c   : > { %3886 = vmatprep.mubr.msk.f32.mxu1 %vm1987_vm9, %v5294_v2  ;;  %3942 = vmatprep.mubr.msk.f32.mxu0 %vm1987_vm9, %v5471_v36 }
 0x27d   : > { %v2207_v34 = vpop.f32.mrf.mxu1  ;;  %3150 = vmatpush1.msra.mxu1 %v3970_v48  ;;  %v3968_v48 = vld [vmem:[%s6398_s2 + $0x2b0] sm:$0xff] }
 0x27e   : > { %3151 = vmatprep.subr.mxu1 %v6438_v7 }
 0x27f   : > { %2672 = vmatmul.mubr.f32.gmra.mxu1 %v5288_v28  ;;  %2976 = vmatmul.mubr.f32.gmra.mxu0 %v5463_v45  ;;  %v5860_v51 = vpop.f32.mrf.mxu0 }
 0x280   : > { %6441 = vst [vmem:[#allocation24_spill] sm:$0xff] %v5860_v51  ;;  %3887 = vmatprep.mubr.msk.f32.mxu1 %vm1987_vm9, %v5311_v42  ;;  %3943 = vmatprep.mubr.msk.f32.mxu0 %vm1987_vm9, %v5504_v60  ;;  %v3967_v42 = vld [vmem:[%s6398_s2 + $0x2a8] sm:$0xff] }
 0x281   : > { %3152 = vmatpush1.msra.mxu1 %v3969_v1  ;;  %v5874_v51 = vpop.f32.mrf.mxu0 }
 0x282   : > { %3153 = vmatprep.subr.mxu1 %v6438_v7  ;;  %6442 = vst [vmem:[#allocation25_spill] sm:$0xff] %v5874_v51 }
 0x283   : > { %v5870_v34 = vpop.f32.mrf.mxu1  ;;  %2677 = vmatmul.mubr.f32.gmra.mxu1 %v5302_v32  ;;  %2981 = vmatmul.mubr.f32.gmra.mxu0 %v5496_v58 }
 0x284   : > { %3888 = vmatprep.mubr.msk.f32.mxu1 %vm1987_vm9, %v5341_v4  ;;  %3944 = vmatprep.mubr.msk.f32.mxu0 %vm1987_vm9, %v5537_v37 }
 0x285   : > { %v2212_v1 = vpop.f32.mrf.mxu1  ;;  %3154 = vmatpush1.msra.mxu1 %v3968_v48  ;;  %v3966_v48 = vld [vmem:[%s6398_s2 + $0x2a0] sm:$0xff] }
 0x286   : > { %3155 = vmatprep.subr.mxu1 %v6438_v7 }
 0x287   : > { %v5884_v28 = vpop.f32.mrf.mxu0  ;;  %2682 = vmatmul.mubr.f32.gmra.mxu1 %v5331_v54  ;;  %2986 = vmatmul.mubr.f32.gmra.mxu0 %v5529_v10 }
 0x288   : > { %6443 = vst [vmem:[#allocation26_spill] sm:$0xff] %v5884_v28  ;;  %3889 = vmatprep.mubr.msk.f32.mxu1 %vm1987_vm9, %v5370_v20  ;;  %3945 = vmatprep.mubr.msk.f32.mxu0 %vm1987_vm9, %v5567_v59  ;;  %v3965_v20 = vld [vmem:[%s6398_s2 + $0x298] sm:$0xff] }
 0x289   : > { %v5892_v1 = vpop.f32.mrf.mxu0  ;;  %3156 = vmatpush1.msra.mxu1 %v3967_v42 }
 0x28a   : > { %6444 = vst [vmem:[#allocation27_spill] sm:$0xff] %v5892_v1  ;;  %3157 = vmatprep.subr.mxu1 %v6438_v7 }
 0x28b   : > { %v5898_v28 = vpop.f32.mrf.mxu1  ;;  %v5900_v51 = vpop.f32.mrf.mxu0  ;;  %2687 = vmatmul.mubr.f32.gmra.mxu1 %v5361_v16  ;;  %2991 = vmatmul.mubr.f32.gmra.mxu0 %v5559_v44 }
 0x28c   : > { %6445 = vst [vmem:[#allocation28_spill] sm:$0xff] %v5900_v51  ;;  %3890 = vmatprep.mubr.msk.f32.mxu1 %vm1987_vm9, %v5405_v52  ;;  %3946 = vmatprep.mubr.msk.f32.mxu0 %vm1987_vm9, %v5585_v0 }
 0x28d   : > { %v2217_v42 = vpop.f32.mrf.mxu1  ;;  %v2383_v1 = vpop.f32.mrf.mxu0  ;;  %3158 = vmatpush1.msra.mxu1 %v3966_v48  ;;  %v3964_v48 = vld [vmem:[%s6398_s2 + $0x290] sm:$0xff] }
 0x28e   : > { %3159 = vmatprep.subr.mxu1 %v6438_v7 }
 0x28f   : > { %v5912_v51 = vpop.f32.mrf.mxu0  ;;  %2692 = vmatmul.mubr.f32.gmra.mxu1 %v5396_v49  ;;  %2996 = vmatmul.mubr.f32.gmra.mxu0 %v5580_v33 }
 0x290   : > { %6446 = vst [vmem:[#allocation29_spill] sm:$0xff] %v5912_v51  ;;  %3891 = vmatprep.mubr.msk.f32.mxu1 %vm1987_vm9, %v5438_v27  ;;  %3947 = vmatprep.mubr.msk.f32.mxu0 %vm1987_vm9, %v5598_v35  ;;  %v3963_v27 = vld [vmem:[%s6398_s2 + $0x288] sm:$0xff] }
 0x291   : > { %v2388_v1 = vpop.f32.mrf.mxu0  ;;  %3160 = vmatpush1.msra.mxu1 %v3965_v20 }
 0x292   : > { %3161 = vmatprep.subr.mxu1 %v6438_v7 }
 0x293   : > { %v5924_v42 = vpop.f32.mrf.mxu1  ;;  %v5926_v51 = vpop.f32.mrf.mxu0  ;;  %2697 = vmatmul.mubr.f32.gmra.mxu1 %v5430_v24  ;;  %3001 = vmatmul.mubr.f32.gmra.mxu0 %v5593_v61 }
 0x294   : > { %6447 = vst [vmem:[#allocation30_spill] sm:$0xff] %v5926_v51  ;;  %3892 = vmatprep.mubr.msk.f32.mxu1 %vm1987_vm9, %v5471_v36  ;;  %3948 = vmatprep.mubr.msk.f32.mxu0 %vm1987_vm9, %v5611_v46 }
 0x295   : > { %v2222_v20 = vpop.f32.mrf.mxu1  ;;  %v2393_v1 = vpop.f32.mrf.mxu0  ;;  %3162 = vmatpush1.msra.mxu1 %v3964_v48  ;;  %v3962_v48 = vld [vmem:[%s6398_s2 + $0x280] sm:$0xff] }
 0x296   : > { %3163 = vmatprep.subr.mxu1 %v6438_v7 }
 0x297   : > { %v5938_v51 = vpop.f32.mrf.mxu0  ;;  %2702 = vmatmul.mubr.f32.gmra.mxu1 %v5463_v45  ;;  %3006 = vmatmul.mubr.f32.gmra.mxu0 %v5606_v17 }
 0x298   : > { %6448 = vst [vmem:[#allocation31_spill] sm:$0xff] %v5938_v51  ;;  %3893 = vmatprep.mubr.msk.f32.mxu1 %vm1987_vm9, %v5504_v60  ;;  %3949 = vmatprep.mubr.msk.f32.mxu0 %vm1987_vm9, %v5624_v21  ;;  %v3981_v60 = vld [vmem:[%s6398_s2 + $0x318] sm:$0xff] }
 0x299   : > { %v2398_v20 = vpop.f32.mrf.mxu0  ;;  %3164 = vmatpush1.msra.mxu1 %v3963_v27 }
 0x29a   : > { %3165 = vmatprep.subr.mxu1 %v6438_v7 }
 0x29b   : > { %v5950_v1 = vpop.f32.mrf.mxu1  ;;  %v5952_v51 = vpop.f32.mrf.mxu0  ;;  %2707 = vmatmul.mubr.f32.gmra.mxu1 %v5496_v58  ;;  %3011 = vmatmul.mubr.f32.gmra.mxu0 %v5619_v56 }
 0x29c   : > { %6449 = vst [vmem:[#allocation32_spill] sm:$0xff] %v5952_v51  ;;  %3894 = vmatprep.mubr.msk.f32.mxu1 %vm1987_vm9, %v5537_v37  ;;  %3950 = vmatprep.mubr.msk.f32.mxu0 %vm1987_vm9, %v5637_v50 }
 0x29d   : > { %v2227_v27 = vpop.f32.mrf.mxu1  ;;  %v2403_v20 = vpop.f32.mrf.mxu0  ;;  %3166 = vmatpush1.msra.mxu1 %v3962_v48  ;;  %v3980_v48 = vld [vmem:[%s6398_s2 + $0x310] sm:$0xff] }
 0x29e   : > { %3191 = vmatprep.subr.mxu1 %v6438_v7 }
 0x29f   : > { %v5964_v51 = vpop.f32.mrf.mxu0  ;;  %2712 = vmatmul.mubr.f32.gmra.mxu1 %v5529_v10  ;;  %3016 = vmatmul.mubr.f32.gmra.mxu0 %v5632_v5 }
 0x2a0   : > { %6450 = vst [vmem:[#allocation33_spill] sm:$0xff] %v5964_v51  ;;  %3895 = vmatprep.mubr.msk.f32.mxu1 %vm1987_vm9, %v5567_v59  ;;  %3951 = vmatprep.mubr.msk.f32.mxu0 %vm1987_vm9, %v5652_v38  ;;  %v3979_v59 = vld [vmem:[%s6398_s2 + $0x308] sm:$0xff] }
 0x2a1   : > { %v2408_v27 = vpop.f32.mrf.mxu0  ;;  %3192 = vmatpush2.msra.mxu1 %v3981_v60 }
 0x2a2   : > { %3193 = vmatprep.subr.mxu1 %v6438_v7 }
 0x2a3   : > { %v5976_v20 = vpop.f32.mrf.mxu1  ;;  %v5978_v51 = vpop.f32.mrf.mxu0  ;;  %2717 = vmatmul.mubr.f32.gmra.mxu1 %v5559_v44  ;;  %3021 = vmatmul.mubr.f32.gmra.mxu0 %v5647_v47 }
 0x2a4   : > { %6451 = vst [vmem:[#allocation34_spill] sm:$0xff] %v5978_v51  ;;  %3896 = vmatprep.mubr.msk.f32.mxu1 %vm1987_vm9, %v5585_v0  ;;  %3952 = vmatprep.mubr.msk.f32.mxu0 %vm1987_vm9, %v5667_v30 }
 0x2a5   : > { %v2232_v60 = vpop.f32.mrf.mxu1  ;;  %v2413_v27 = vpop.f32.mrf.mxu0  ;;  %3194 = vmatpush2.msra.mxu1 %v3980_v48  ;;  %v3978_v48 = vld [vmem:[%s6398_s2 + $0x300] sm:$0xff] }
 0x2a6   : > { %3195 = vmatprep.subr.mxu1 %v6438_v7 }
 0x2a7   : > { %v5990_v51 = vpop.f32.mrf.mxu0  ;;  %2722 = vmatmul.mubr.f32.gmra.mxu1 %v5580_v33  ;;  %3026 = vmatmul.mubr.f32.gmra.mxu0 %v5662_v39 }
 0x2a8   : > { %6452 = vst [vmem:[#allocation35_spill] sm:$0xff] %v5990_v51  ;;  %3897 = vmatprep.mubr.msk.f32.mxu1 %vm1987_vm9, %v5598_v35  ;;  %3953 = vmatprep.mubr.msk.f32.mxu0 %vm1987_vm9, %v5682_v14 }
 0x2a9   : > { %v2418_v60 = vpop.f32.mrf.mxu0  ;;  %3196 = vmatpush2.msra.mxu1 %v3979_v59 }
 0x2aa   : > { %3197 = vmatprep.subr.mxu1 %v6438_v7 }
 0x2ab   : > { %v6002_v27 = vpop.f32.mrf.mxu1  ;;  %v6004_v51 = vpop.f32.mrf.mxu0  ;;  %2727 = vmatmul.mubr.f32.gmra.mxu1 %v5593_v61  ;;  %3031 = vmatmul.mubr.f32.gmra.mxu0 %v5677_v41 }
 0x2ac   : > { %6453 = vst [vmem:[#allocation36_spill] sm:$0xff] %v6004_v51  ;;  %3898 = vmatprep.mubr.msk.f32.mxu1 %vm1987_vm9, %v5611_v46  ;;  %3954 = vmatprep.mubr.msk.f32.mxu0 %vm1987_vm9, %v5695_v23 }
 0x2ad   : > { %v2237_v59 = vpop.f32.mrf.mxu1  ;;  %v2423_v60 = vpop.f32.mrf.mxu0  ;;  %3198 = vmatpush2.msra.mxu1 %v3978_v48 }
 0x2af   : > { %v6012_v35 = vpop.f32.mrf.mxu0  ;;  %2732 = vmatmul.mubr.f32.gmra.mxu1 %v5606_v17  ;;  %3036 = vmatmul.mubr.f32.gmra.mxu0 %v5692_v40 }
 0x2b0   : > { %6454 = vst [vmem:[#allocation37_spill] sm:$0xff] %v6012_v35  ;;  %3899 = vmatprep.mubr.msk.f32.mxu1 %vm1987_vm9, %v5624_v21  ;;  %3955 = vmatprep.mubr.msk.f32.mxu0 %vm1987_vm9, %v5707_v9 }
 0x2b1   : > { %v2428_v51 = vpop.f32.mrf.mxu0 }
 0x2b3   : > { %v6020_v46 = vpop.f32.mrf.mxu1  ;;  %v2431_v61 = vpop.f32.mrf.mxu0  ;;  %2737 = vmatmul.mubr.f32.gmra.mxu1 %v5619_v56  ;;  %3041 = vmatmul.mubr.f32.gmra.mxu0 %v5705_v13 }
 0x2b4   : > { %v6025_v48 = vadd.f32 %v2431_v61, %v5818_v3  ;;  %3900 = vmatprep.mubr.msk.f32.mxu1 %vm1987_vm9, %v5637_v50  ;;  %3956 = vmatprep.mubr.msk.f32.mxu0 %vm1987_vm9, %v5724_v26 }
 0x2b5   : > { %v2242_v59 = vpop.f32.mrf.mxu1  ;;  %v2433_v60 = vpop.f32.mrf.mxu0 }
 0x2b6   : > { %6455 = vst [vmem:[#allocation38_spill] sm:$0xff] %v6025_v48 }
 0x2b7   : > { %v2436_v35 = vpop.f32.mrf.mxu0  ;;  %2742 = vmatmul.mubr.f32.gmra.mxu1 %v5632_v5  ;;  %3046 = vmatmul.mubr.f32.gmra.mxu0 %v5719_v6 }
 0x2b8   : > { %v6034_v51 = vadd.f32 %v2436_v35, %v5844_v57  ;;  %3901 = vmatprep.mubr.msk.f32.mxu1 %vm1987_vm9, %v5652_v38  ;;  %3957 = vmatprep.mubr.msk.f32.mxu0 %vm1987_vm9, %v5739_v8 }
 0x2b9   : > { %v2438_v61 = vpop.f32.mrf.mxu0 }
 0x2bb   : > { %v2245_v3 = vpop.f32.mrf.mxu1  ;;  %v2441_v48 = vpop.f32.mrf.mxu0  ;;  %2747 = vmatmul.mubr.f32.gmra.mxu1 %v5647_v47  ;;  %3051 = vmatmul.mubr.f32.gmra.mxu0 %v5734_v12 }
 0x2bc   : > { %v6043_v59 = vadd.f32 %v2441_v48, %v5870_v34  ;;  %3902 = vmatprep.mubr.msk.f32.mxu1 %vm1987_vm9, %v5667_v30  ;;  %3958 = vmatprep.mubr.msk.f32.mxu0 %vm1987_vm9, %v5770_v43 }
 0x2bd   : > { %v2247_v35 = vpop.f32.mrf.mxu1  ;;  %v2443_v57 = vpop.f32.mrf.mxu0 }
 0x2be   : > { %6456 = vst [vmem:[#allocation39_spill] sm:$0xff] %v6043_v59 }
 0x2bf   : > { %v2446_v60 = vpop.f32.mrf.mxu0  ;;  %2752 = vmatmul.mubr.f32.gmra.mxu1 %v5662_v39  ;;  %3056 = vmatmul.mubr.f32.gmra.mxu0 %v5756_v19 }
 0x2c0   : > { %v6052_v61 = vadd.f32 %v2446_v60, %v5898_v28  ;;  %3903 = vmatprep.mubr.msk.f32.mxu1 %vm1987_vm9, %v5682_v14  ;;  %3959 = vmatprep.mubr.msk.f32.mxu0 %vm1987_vm9, %v5796_v15 }
 0x2c1   : > { %v2448_v34 = vpop.f32.mrf.mxu0 }
 0x2c2   : > { %6457 = vst [vmem:[#allocation40_spill] sm:$0xff] %v6052_v61 }
 0x2c3   : > { %v2250_v48 = vpop.f32.mrf.mxu1  ;;  %v2451_v59 = vpop.f32.mrf.mxu0  ;;  %2757 = vmatmul.mubr.f32.gmra.mxu1 %v5677_v41  ;;  %3061 = vmatmul.mubr.f32.gmra.mxu0 %v5782_v62 }
 0x2c4   : > { %v6061_v35 = vadd.f32 %v2451_v59, %v5924_v42  ;;  %3904 = vmatprep.mubr.msk.f32.mxu1 %vm1987_vm9, %v5695_v23  ;;  %3960 = vmatprep.mubr.msk.f32.mxu0 %vm1987_vm9, %v5822_v18 }
 0x2c5   : > { %v2252_v28 = vpop.f32.mrf.mxu1  ;;  %v2453_v57 = vpop.f32.mrf.mxu0 }
 0x2c6   : > { %6458 = vst [vmem:[#allocation41_spill] sm:$0xff] %v6061_v35 }
 0x2c7   : > { %v2456_v60 = vpop.f32.mrf.mxu0  ;;  %2762 = vmatmul.mubr.f32.gmra.mxu1 %v5692_v40  ;;  %3066 = vmatmul.mubr.f32.gmra.mxu0 %v5808_v11 }
 0x2c8   : > { %v6070_v34 = vadd.f32 %v2456_v60, %v5950_v1  ;;  %3905 = vmatprep.mubr.msk.f32.mxu1 %vm1987_vm9, %v5707_v9  ;;  %3961 = vmatprep.mubr.msk.f32.mxu0 %vm1987_vm9, %v5848_v53 }
 0x2c9   : > { %v2458_v42 = vpop.f32.mrf.mxu0 }
 0x2ca   : > { %6459 = vst [vmem:[#allocation42_spill] sm:$0xff] %v6070_v34 }
 0x2cb   : > { %v2255_v59 = vpop.f32.mrf.mxu1  ;;  %v2461_v35 = vpop.f32.mrf.mxu0  ;;  %2767 = vmatmul.mubr.f32.gmra.mxu1 %v5705_v13  ;;  %3071 = vmatmul.mubr.f32.gmra.mxu0 %v5834_v29 }
 0x2cc   : > { %v6079_v28 = vadd.f32 %v2461_v35, %v5976_v20  ;;  %3906 = vmatprep.mubr.msk.f32.mxu1 %vm1987_vm9, %v5724_v26  ;;  %3570 = vmatprep.mubr.f32.mxu0 %v6438_v7 }
 0x2cd   : > { %v2257_v1 = vpop.f32.mrf.mxu1  ;;  %v2463_v57 = vpop.f32.mrf.mxu0 }
 0x2cf   : > { %v2466_v60 = vpop.f32.mrf.mxu0  ;;  %2772 = vmatmul.mubr.f32.gmra.mxu1 %v5719_v6 }
 0x2d0   : > { %v6086_v42 = vadd.f32 %v2466_v60, %v6002_v27  ;;  %3907 = vmatprep.mubr.msk.f32.mxu1 %vm1987_vm9, %v5739_v8 }
 0x2d1   : > { %v2468_v34 = vpop.f32.mrf.mxu0 }
 0x2d2   : > { %6460 = vst [vmem:[#allocation43_spill] sm:$0xff] %v6086_v42 }
 0x2d3   : > { %v2260_v61 = vpop.f32.mrf.mxu1  ;;  %v2471_v20 = vpop.f32.mrf.mxu0  ;;  %2777 = vmatmul.mubr.f32.gmra.mxu1 %v5734_v12 }
 0x2d4   : > { %v6092_v35 = vadd.f32 %v2471_v20, %v6020_v46  ;;  %3908 = vmatprep.mubr.msk.f32.mxu1 %vm1987_vm9, %v5770_v43 }
 0x2d5   : > { %v2262_v7 = vpop.f32.mrf.mxu1  ;;  %v2473_v1 = vpop.f32.mrf.mxu0 }
 0x2d7   : > { %v2476_v57 = vpop.f32.mrf.mxu0  ;;  %2782 = vmatmul.mubr.f32.gmra.mxu1 %v5756_v19 }
 0x2d8   : > { %v6097_v27 = vadd.f32 %v2476_v57, %v2245_v3  ;;  %3909 = vmatprep.mubr.msk.f32.mxu1 %vm1987_vm9, %v5796_v15 }
 0x2d9   : > { %v2478_v34 = vpop.f32.mrf.mxu0 }
 0x2da   : > { %6461 = vst [vmem:[#allocation44_spill] sm:$0xff] %v6097_v27 }
 0x2db   : > { %v2265_v60 = vpop.f32.mrf.mxu1  ;;  %v2481_v42 = vpop.f32.mrf.mxu0  ;;  %2787 = vmatmul.mubr.f32.gmra.mxu1 %v5782_v62 }
 0x2dc   : > { %v6102_v46 = vadd.f32 %v2481_v42, %v2250_v48  ;;  %3982 = vmatprep.mubr.msk.f32.mxu1 %vm1987_vm9, %v5238_v31 }
 0x2dd   : > { %v2267_v20 = vpop.f32.mrf.mxu1  ;;  %v2483_v7 = vpop.f32.mrf.mxu0 }
 0x2de   : > { %v6463_v7 = vld [vmem:[#allocation2_spill] sm:$0xff] }
 0x2df   : > { %v2486_v1 = vpop.f32.mrf.mxu0  ;;  %3200 = vmatmul.mubr.f32.vlgmr.msra.gmra.mxu1 %v5232_v22 }
 0x2e0   : > { %v6107_v3 = vadd.f32 %v2486_v1, %v2255_v59  ;;  %3983 = vmatprep.mubr.msk.f32.mxu1 %vm1987_vm9, %v5252_v63  ;;  %v6464_v59 = vld [vmem:[#allocation4_spill] sm:$0xff] }
 0x2e1   : > { %v2488_v57 = vpop.f32.mrf.mxu0 }
 0x2e2   : > { %6462 = vst [vmem:[#allocation45_spill] sm:$0xff] %v6107_v3  ;;  %v6465_v3 = vld [vmem:[#allocation3_spill] sm:$0xff] }
 0x2e3   : > { %v2270_v34 = vpop.f32.mrf.mxu1  ;;  %v2491_v27 = vpop.f32.mrf.mxu0  ;;  %3205 = vmatmul.mubr.f32.gmra.mxu1 %v5246_v25 }
 0x2e4   : > { %v6112_v48 = vadd.f32 %v2491_v27, %v2260_v61  ;;  %3984 = vmatprep.mubr.msk.f32.mxu1 %vm1987_vm9, %v5266_v55 }
 0x2e5   : > { %v2272_v31 = vpop.f32.mrf.mxu1  ;;  %v2493_v42 = vpop.f32.mrf.mxu0 }
 0x2e6   : > { %v6466_v31 = vld [vmem:[#allocation5_spill] sm:$0xff]  ;;  %v6467_v42 = vld [vmem:[#allocation6_spill] sm:$0xff] }
 0x2e7   : > { %v2496_v20 = vpop.f32.mrf.mxu0  ;;  %3210 = vmatmul.mubr.f32.gmra.mxu1 %v6463_v7 }
 0x2e8   : > { %v6117_v22 = vadd.f32 %v2496_v20, %v2265_v60  ;;  %3985 = vmatprep.mubr.msk.f32.mxu1 %vm1987_vm9, %v6464_v59 }
 0x2e9   : > { %v2498_v63 = vpop.f32.mrf.mxu0 }
 0x2eb   : > { %v2275_v1 = vpop.f32.mrf.mxu1  ;;  %v2501_v57 = vpop.f32.mrf.mxu0  ;;  %3215 = vmatmul.mubr.f32.gmra.mxu1 %v6465_v3 }
 0x2ec   : > { %v6122_v25 = vadd.f32 %v2501_v57, %v2270_v34  ;;  %3986 = vmatprep.mubr.msk.f32.mxu1 %vm1987_vm9, %v5294_v2 }
 0x2ed   : > { %v2277_v55 = vpop.f32.mrf.mxu1  ;;  %v2503_v61 = vpop.f32.mrf.mxu0 }
 0x2ef   : > { %v2506_v27 = vpop.f32.mrf.mxu0  ;;  %3220 = vmatmul.mubr.f32.gmra.mxu1 %v6466_v31  ;;  %v4083_v31 = vmov 0  }
 0x2f0   : > { %v6127_v60 = vadd.f32 %v2506_v27, %v2275_v1  ;;  %3987 = vmatprep.mubr.msk.f32.mxu1 %vm1987_vm9, %v6467_v42  ;;  %v6468_v1 = vld [vmem:[#allocation7_spill] sm:$0xff]  ;;  %4050 = vset.pattern.permute.xlu0 %v4083_v31 }
 0x2f1   : > { %v2508_v20 = vpop.f32.mrf.mxu0  ;;  %4051 = vset.pattern.permute.xlu1 %v4083_v31 }
 0x2f2   : > { %v6469_v20 = vld [vmem:[#allocation8_spill] sm:$0xff] }
 0x2f3   : > { %v2280_v7 = vpop.f32.mrf.mxu1  ;;  %v2511_v59 = vpop.f32.mrf.mxu0  ;;  %3225 = vmatmul.mubr.f32.gmra.mxu1 %v5302_v32 }
 0x2f4   : > { %v6132_v3 = vadd.f32 %v2511_v59, %v2280_v7  ;;  %3988 = vmatprep.mubr.msk.f32.mxu1 %vm1987_vm9, %v5341_v4 }
 0x2f5   : > { %v2282_v2 = vpop.f32.mrf.mxu1  ;;  %v2513_v34 = vpop.f32.mrf.mxu0 }
 0x2f7   : > { %v2516_v63 = vpop.f32.mrf.mxu0  ;;  %3230 = vmatmul.mubr.f32.gmra.mxu1 %v5331_v54  ;;  %v3459_v54 = vld [vmem:[%s6399_s3 + $0x18] sm:$0xff] }
 0x2f8   : > { %3989 = vmatprep.mubr.msk.f32.mxu1 %vm1987_vm9, %v6468_v1  ;;  %3477 = vperm.xlu0 %4050, %v3459_v54  }
 0x2f9   : > { %v2518_v57 = vpop.f32.mrf.mxu0 }
 0x2fb   : > { %v2285_v55 = vpop.f32.mrf.mxu1  ;;  %v2521_v61 = vpop.f32.mrf.mxu0  ;;  %3235 = vmatmul.mubr.f32.gmra.mxu1 %v5361_v16 }
 0x2fc   : > { %v6140_v27 = vadd.f32 %v2516_v63, %v2285_v55  ;;  %3990 = vmatprep.mubr.msk.f32.mxu1 %vm1987_vm9, %v5405_v52  ;;  %v3456_v52 = vld [vmem:[%s6399_s3] sm:$0xff]  ;;  %v6470_v63 = vld [vmem:[#allocation9_spill] sm:$0xff] }
 0x2fd   : > { %v2287_v32 = vpop.f32.mrf.mxu1  ;;  %v2523_v4 = vpop.f32.mrf.mxu0  ;;  %3462 = vperm.xlu0 %4050, %v3456_v52   ;;  %v6473_v52 = vld [vmem:[#allocation11_spill] sm:$0xff] }
 0x2fe   : > { %v6471_v32 = vld [vmem:[#allocation10_spill] sm:$0xff] }
 0x2ff   : > { %v2526_v42 = vpop.f32.mrf.mxu0  ;;  %3240 = vmatmul.mubr.f32.gmra.mxu1 %v5396_v49 }
 0x300   : > { %3991 = vmatprep.mubr.msk.f32.mxu1 %vm1987_vm9, %v6469_v20  ;;  %v6472_v20 = vld [vmem:[#allocation12_spill] sm:$0xff] }
 0x301   : > { %v2528_v16 = vpop.f32.mrf.mxu0 }
 0x303   : > { %v2290_v7 = vpop.f32.mrf.mxu1  ;;  %v2531_v59 = vpop.f32.mrf.mxu0  ;;  %3245 = vmatmul.mubr.f32.gmra.mxu1 %v5430_v24 }
 0x304   : > { %v6154_v2 = vadd.f32 %v2521_v61, %v2290_v7  ;;  %3992 = vmatprep.mubr.msk.f32.mxu1 %vm1987_vm9, %v5471_v36 }
 0x305   : > { %v2292_v49 = vpop.f32.mrf.mxu1  ;;  %v2533_v34 = vpop.f32.mrf.mxu0 }
 0x306   : > { %v6475_v34 = vld [vmem:[#allocation14_spill] sm:$0xff] }
 0x307   : > { %3250 = vmatmul.mubr.f32.gmra.mxu1 %v5463_v45 }
 0x308   : > { %3993 = vmatprep.mubr.msk.f32.mxu1 %vm1987_vm9, %v6470_v63  ;;  %v6476_v63 = vld [vmem:[#allocation28_spill] sm:$0xff] }
 0x30b   : > { %v2295_v1 = vpop.f32.mrf.mxu1  ;;  %v2536_v57 = vpop.f32.mrf.mxu0  ;;  %3255 = vmatmul.mubr.f32.gmra.mxu1 %v5496_v58 }
 0x30c   : > { %v6162_v24 = vadd.f32 %v2526_v42, %v2295_v1  ;;  %3994 = vmatprep.mubr.msk.f32.mxu1 %vm1987_vm9, %v5537_v37  ;;  %v2382_v1 = vadd.f32 %v6476_v63, %v6475_v34 }
 0x30d   : > { %v2297_v55 = vpop.f32.mrf.mxu1  ;;  %v2538_v61 = vpop.f32.mrf.mxu0 }
 0x30f   : > { %v2917_v36 = vpop.f32.mrf.mxu0  ;;  %3260 = vmatmul.mubr.f32.gmra.mxu1 %v5529_v10 }
 0x310   : > { %3995 = vmatprep.mubr.msk.f32.mxu1 %vm1987_vm9, %v6471_v32 }
 0x311   : > { %v2919_v45 = vpop.f32.mrf.mxu0 }
 0x313   : > { %v2300_v4 = vpop.f32.mrf.mxu1  ;;  %v2922_v31 = vpop.f32.mrf.mxu0  ;;  %3265 = vmatmul.mubr.f32.gmra.mxu1 %v5559_v44  ;;  %v6474_v44 = vld [vmem:[#allocation13_spill] sm:$0xff] }
 0x314   : > { %v6170_v54 = vadd.f32 %v2531_v59, %v2300_v4  ;;  %3996 = vmatprep.mubr.msk.f32.mxu1 %vm1987_vm9, %v5585_v0  ;;  %v6478_v4 = vld [vmem:[#allocation29_spill] sm:$0xff] }
 0x315   : > { %v2302_v58 = vpop.f32.mrf.mxu1  ;;  %v2924_v37 = vpop.f32.mrf.mxu0 }
 0x317   : > { %v2927_v42 = vpop.f32.mrf.mxu0  ;;  %3270 = vmatmul.mubr.f32.gmra.mxu1 %v5580_v33 }
 0x318   : > { %3997 = vmatprep.mubr.msk.f32.mxu1 %vm1987_vm9, %v6472_v20 }
 0x319   : > { %v2929_v10 = vpop.f32.mrf.mxu0 }
 0x31b   : > { %v2305_v16 = vpop.f32.mrf.mxu1  ;;  %v2932_v7 = vpop.f32.mrf.mxu0  ;;  %3275 = vmatmul.mubr.f32.gmra.mxu1 %v6473_v52 }
 0x31c   : > { %v6178_v49 = vadd.f32 %v2536_v57, %v2305_v16  ;;  %3998 = vmatprep.mubr.msk.f32.mxu1 %vm1987_vm9, %v6474_v44  ;;  %v6477_v57 = vld [vmem:[#allocation15_spill] sm:$0xff]  ;;  %v6479_v44 = vld [vmem:[#allocation16_spill] sm:$0xff] }
 0x31d   : > { %v2307_v59 = vpop.f32.mrf.mxu1  ;;  %v2934_v0 = vpop.f32.mrf.mxu0  ;;  %v2387_v58 = vadd.f32 %v6478_v4, %v6477_v57 }
 0x31e   : > { %v6480_v59 = vld [vmem:[#allocation30_spill] sm:$0xff] }
 0x31f   : > { %v2633_v55 = vpop.f32.mrf.mxu1  ;;  %v2937_v33 = vpop.f32.mrf.mxu0  ;;  %3280 = vmatmul.mubr.f32.gmra.mxu1 %v5606_v17 }
 0x320   : > { %v2792_v61 = vadd.f32 %v2633_v55, %v2382_v1  ;;  %3999 = vmatprep.mubr.msk.f32.mxu1 %vm1987_vm9, %v5624_v21  ;;  %v2392_v21 = vadd.f32 %v6480_v59, %v6479_v44  ;;  %v6481_v55 = vld [vmem:[#allocation17_spill] sm:$0xff]  ;;  %v6485_v59 = vld [vmem:[#allocation19_spill] sm:$0xff] }
 0x321   : > { %v2635_v32 = vpop.f32.mrf.mxu1  ;;  %v2939_v45 = vpop.f32.mrf.mxu0 }
 0x322   : > { %v6189_v37 = vadd.f32 %v2917_v36, %v2792_v61  ;;  %v6482_v61 = vld [vmem:[#allocation31_spill] sm:$0xff] }
 0x323   : > { %v2638_v20 = vpop.f32.mrf.mxu1  ;;  %v2942_v10 = vpop.f32.mrf.mxu0  ;;  %3285 = vmatmul.mubr.f32.gmra.mxu1 %v5619_v56 }
 0x324   : > { %v2793_v16 = vadd.f32 %v2638_v20, %v2387_v58  ;;  %4000 = vmatprep.mubr.msk.f32.mxu1 %vm1987_vm9, %v5637_v50  ;;  %v2397_v50 = vadd.f32 %v6482_v61, %v6481_v55  ;;  %v6483_v58 = vld [vmem:[#allocation18_spill] sm:$0xff]  ;;  %v6484_v20 = vld [vmem:[#allocation32_spill] sm:$0xff] }
 0x325   : > { %v2640_v17 = vpop.f32.mrf.mxu1  ;;  %v2944_v52 = vpop.f32.mrf.mxu0  ;;  %v6487_v61 = vld [vmem:[#allocation20_spill] sm:$0xff] }
 0x326   : > { %v6196_v0 = vadd.f32 %v2922_v31, %v2793_v16 }
 0x327   : > { %v2643_v34 = vpop.f32.mrf.mxu1  ;;  %v2947_v63 = vpop.f32.mrf.mxu0  ;;  %3290 = vmatmul.mubr.f32.gmra.mxu1 %v5632_v5 }
 0x328   : > { %v2794_v36 = vadd.f32 %v2643_v34, %v2392_v21  ;;  %4001 = vmatprep.mubr.msk.f32.mxu1 %vm1987_vm9, %v5652_v38  ;;  %v2402_v38 = vadd.f32 %v6484_v20, %v6483_v58  ;;  %v6486_v21 = vld [vmem:[#allocation33_spill] sm:$0xff]  ;;  %v6490_v20 = vld [vmem:[#allocation35_spill] sm:$0xff] }
 0x329   : > { %v2645_v56 = vpop.f32.mrf.mxu1  ;;  %v2949_v1 = vpop.f32.mrf.mxu0  ;;  %v2407_v34 = vadd.f32 %v6486_v21, %v6485_v59  ;;  %v6489_v58 = vld [vmem:[#allocation21_spill] sm:$0xff]  ;;  %v6492_v59 = vld [vmem:[#allocation36_spill] sm:$0xff] }
 0x32a   : > { %v6203_v32 = vadd.f32 %v2927_v42, %v2794_v36 }
 0x32b   : > { %v2648_v45 = vpop.f32.mrf.mxu1  ;;  %v2952_v57 = vpop.f32.mrf.mxu0  ;;  %3295 = vmatmul.mubr.f32.gmra.mxu1 %v5647_v47  ;;  %v3458_v47 = vld [vmem:[%s6399_s3 + $0x10] sm:$0xff] }
 0x32c   : > { %v2795_v31 = vadd.f32 %v2648_v45, %v2397_v50  ;;  %4002 = vmatprep.mubr.msk.f32.mxu1 %vm1987_vm9, %v5667_v30  ;;  %3472 = vperm.xlu1 %4051, %v3458_v47   ;;  %v6488_v50 = vld [vmem:[#allocation34_spill] sm:$0xff] }
 0x32d   : > { %v2650_v5 = vpop.f32.mrf.mxu1  ;;  %v2954_v4 = vpop.f32.mrf.mxu0  ;;  %v2412_v45 = vadd.f32 %v6488_v50, %v6487_v61 }
 0x32e   : > { %v6210_v16 = vadd.f32 %v2932_v7, %v2795_v31 }
 0x32f   : > { %v2653_v17 = vpop.f32.mrf.mxu1  ;;  %v2957_v52 = vpop.f32.mrf.mxu0  ;;  %3300 = vmatmul.mubr.f32.gmra.mxu1 %v5662_v39 }
 0x330   : > { %v2796_v42 = vadd.f32 %v2653_v17, %v2402_v38  ;;  %4003 = vmatprep.mubr.msk.f32.mxu1 %vm1987_vm9, %v5682_v14  ;;  %v3457_v14 = vld [vmem:[%s6399_s3 + $0x8] sm:$0xff]  ;;  %v2417_v38 = vadd.f32 %v6490_v20, %v6489_v58 }
 0x331   : > { %v2655_v30 = vpop.f32.mrf.mxu1  ;;  %v2959_v44 = vpop.f32.mrf.mxu0  ;;  %3467 = vperm.xlu1 %4051, %v3457_v14   ;;  %v6493_v14 = vld [vmem:[#allocation23_spill] sm:$0xff] }
 0x332   : > { %v6220_v7 = vadd.f32 %v2937_v33, %v2796_v42  ;;  %v6491_v44 = vld [vmem:[#allocation22_spill] sm:$0xff] }
 0x333   : > { %v2658_v36 = vpop.f32.mrf.mxu1  ;;  %v2962_v56 = vpop.f32.mrf.mxu0  ;;  %3305 = vmatmul.mubr.f32.gmra.mxu1 %v5677_v41 }
 0x334   : > { %v2797_v39 = vadd.f32 %v2658_v36, %v2407_v34  ;;  %4004 = vmatprep.mubr.msk.f32.mxu1 %vm1987_vm9, %v5695_v23 }
 0x335   : > { %v2660_v1 = vpop.f32.mrf.mxu1  ;;  %v2964_v55 = vpop.f32.mrf.mxu0 }
 0x336   : > { %v6230_v33 = vadd.f32 %v2942_v10, %v2797_v39  ;;  %v6494_v1 = vld [vmem:[#allocation37_spill] sm:$0xff] }
 0x337   : > { %v2663_v31 = vpop.f32.mrf.mxu1  ;;  %v2967_v5 = vpop.f32.mrf.mxu0  ;;  %3310 = vmatmul.mubr.f32.gmra.mxu1 %v5692_v40 }
 0x338   : > { %v2798_v41 = vadd.f32 %v2663_v31, %v2412_v45  ;;  %4005 = vmatprep.mubr.msk.f32.mxu1 %vm1987_vm9, %v5707_v9  ;;  %v2422_v9 = vadd.f32 %v6492_v59, %v6491_v44 }
 0x339   : > { %v2665_v23 = vpop.f32.mrf.mxu1  ;;  %v2969_v4 = vpop.f32.mrf.mxu0 }
 0x33a   : > { %v6237_v17 = vadd.f32 %v2947_v63, %v2798_v41  ;;  %v6495_v23 = vld [vmem:[#allocation38_spill] sm:$0xff] }
 0x33b   : > { %v2668_v42 = vpop.f32.mrf.mxu1  ;;  %v2972_v47 = vpop.f32.mrf.mxu0  ;;  %3315 = vmatmul.mubr.f32.gmra.mxu1 %v5705_v13 }
 0x33c   : > { %v2799_v10 = vadd.f32 %v2668_v42, %v2417_v38  ;;  %4006 = vmatprep.mubr.msk.f32.mxu1 %vm1987_vm9, %v5724_v26  ;;  %v2427_v26 = vadd.f32 %v6494_v1, %v6493_v14  ;;  %v6500_v14 = vld [vmem:[#allocation41_spill] sm:$0xff]  ;;  %v6501_v1 = vld [vmem:[#allocation27_spill] sm:$0xff] }
 0x33d   : > { %v2670_v40 = vpop.f32.mrf.mxu1  ;;  %v2974_v30 = vpop.f32.mrf.mxu0 }
 0x33e   : > { %v6244_v21 = vadd.f32 %v2952_v57, %v2799_v10 }
 0x33f   : > { %v2673_v34 = vpop.f32.mrf.mxu1  ;;  %v2977_v36 = vpop.f32.mrf.mxu0  ;;  %3320 = vmatmul.mubr.f32.gmra.mxu1 %v5719_v6 }
 0x340   : > { %v2800_v63 = vadd.f32 %v2673_v34, %v2422_v9  ;;  %4007 = vmatprep.mubr.msk.f32.mxu1 %vm1987_vm9, %v5739_v8  ;;  %v6498_v9 = vld [vmem:[#allocation25_spill] sm:$0xff] }
 0x341   : > { %v2675_v13 = vpop.f32.mrf.mxu1  ;;  %v2979_v39 = vpop.f32.mrf.mxu0 }
 0x342   : > { %v6251_v55 = vadd.f32 %v2957_v52, %v2800_v63 }
 0x343   : > { %v2678_v61 = vpop.f32.mrf.mxu1  ;;  %v2982_v50 = vpop.f32.mrf.mxu0  ;;  %3325 = vmatmul.mubr.f32.gmra.mxu1 %v5734_v12 }
 0x344   : > { %v2801_v57 = vadd.f32 %v2678_v61, %v2427_v26  ;;  %4008 = vmatprep.mubr.msk.f32.mxu1 %vm1987_vm9, %v5770_v43 }
 0x345   : > { %v2680_v6 = vpop.f32.mrf.mxu1  ;;  %v2984_v45 = vpop.f32.mrf.mxu0 }
 0x346   : > { %v6256_v31 = vadd.f32 %v2962_v56, %v2801_v57  ;;  %v6502_v45 = vld [vmem:[#allocation26_spill] sm:$0xff] }
 0x347   : > { %v2683_v8 = vpop.f32.mrf.mxu1  ;;  %v2987_v41 = vpop.f32.mrf.mxu0  ;;  %3330 = vmatmul.mubr.f32.gmra.mxu1 %v5756_v19 }
 0x348   : > { %v2802_v4 = vadd.f32 %v2683_v8, %v6495_v23  ;;  %4009 = vmatprep.mubr.msk.f32.mxu1 %vm1987_vm9, %v5796_v15  ;;  %v6496_v15 = vld [vmem:[#allocation39_spill] sm:$0xff]  ;;  %v6503_v8 = vld [vmem:[#allocation42_spill] sm:$0xff] }
 0x349   : > { %v2685_v52 = vpop.f32.mrf.mxu1  ;;  %v2989_v58 = vpop.f32.mrf.mxu0 }
 0x34a   : > { %v6262_v12 = vadd.f32 %v2967_v5, %v2802_v4 }
 0x34b   : > { %v2688_v20 = vpop.f32.mrf.mxu1  ;;  %v2992_v38 = vpop.f32.mrf.mxu0  ;;  %3335 = vmatmul.mubr.f32.gmra.mxu1 %v5782_v62 }
 0x34c   : > { %v2803_v43 = vadd.f32 %v2688_v20, %v6034_v51  ;;  %4010 = vmatprep.mubr.msk.f32.mxu1 %vm1987_vm9, %v5822_v18  ;;  %v6497_v18 = vld [vmem:[#allocation40_spill] sm:$0xff] }
 0x34d   : > { %v2690_v56 = vpop.f32.mrf.mxu1  ;;  %v2994_v19 = vpop.f32.mrf.mxu0 }
 0x34e   : > { %v6268_v42 = vadd.f32 %v2972_v47, %v2803_v43 }
 0x34f   : > { %v2693_v10 = vpop.f32.mrf.mxu1  ;;  %v2997_v40 = vpop.f32.mrf.mxu0  ;;  %3340 = vmatmul.mubr.f32.gmra.mxu1 %v5808_v11 }
 0x350   : > { %v2804_v5 = vadd.f32 %v2693_v10, %v6496_v15  ;;  %4011 = vmatprep.mubr.msk.f32.mxu1 %vm1987_vm9, %v5848_v53  ;;  %v6499_v53 = vld [vmem:[#allocation24_spill] sm:$0xff] }
 0x351   : > { %v2695_v30 = vpop.f32.mrf.mxu1  ;;  %v2999_v62 = vpop.f32.mrf.mxu0 }
 0x352   : > { %v6274_v44 = vadd.f32 %v2977_v36, %v2804_v5  ;;  %v6504_v5 = vld [vmem:[#allocation43_spill] sm:$0xff] }
 0x353   : > { %v2698_v51 = vpop.f32.mrf.mxu1  ;;  %v3002_v59 = vpop.f32.mrf.mxu0  ;;  %3345 = vmatmul.mubr.f32.gmra.mxu1 %v5834_v29 }
 0x354   : > { %v2805_v47 = vadd.f32 %v2698_v51, %v6497_v18  ;;  %4012 = vmatprep.mubr.msk.f32.mxu1 %vm1987_vm9, %v6498_v9 }
 0x355   : > { %v2700_v34 = vpop.f32.mrf.mxu1  ;;  %v3004_v11 = vpop.f32.mrf.mxu0 }
 0x356   : > { %v6280_v63 = vadd.f32 %v2982_v50, %v2805_v47 }
 0x357   : > { %v2703_v13 = vpop.f32.mrf.mxu1  ;;  %v3007_v39 = vpop.f32.mrf.mxu0  ;;  %3350 = vmatmul.mubr.f32.gmra.mxu1 %v6499_v53 }
 0x358   : > { %v2806_v36 = vadd.f32 %v2703_v13, %v6500_v14  ;;  %4013 = vmatprep.mubr.msk.f32.mxu1 %vm1987_vm9, %v6501_v1 }
 0x359   : > { %v2705_v26 = vpop.f32.mrf.mxu1  ;;  %v3009_v29 = vpop.f32.mrf.mxu0 }
 0x35a   : > { %v6286_v61 = vadd.f32 %v2987_v41, %v2806_v36 }
 0x35b   : > { %v2708_v57 = vpop.f32.mrf.mxu1  ;;  %v3012_v6 = vpop.f32.mrf.mxu0  ;;  %3355 = vmatmul.mubr.f32.gmra.mxu1 %v6502_v45 }
 0x35c   : > { %v2807_v50 = vadd.f32 %v2708_v57, %v6503_v8 }
 0x35d   : > { %v2710_v23 = vpop.f32.mrf.mxu1  ;;  %v3014_v4 = vpop.f32.mrf.mxu0 }
 0x35e   : > { %v6290_v52 = vadd.f32 %v2992_v38, %v2807_v50 }
 0x35f   : > { %v2713_v58 = vpop.f32.mrf.mxu1  ;;  %v3017_v20 = vpop.f32.mrf.mxu0 }
 0x360   : > { %v2808_v43 = vadd.f32 %v2713_v58, %v6079_v28 }
 0x361   : > { %v2715_v56 = vpop.f32.mrf.mxu1  ;;  %v3019_v19 = vpop.f32.mrf.mxu0 }
 0x362   : > { %v6293_v10 = vadd.f32 %v2997_v40, %v2808_v43  ;;  %v6505_v40 = vld [vmem:[#allocation44_spill] sm:$0xff] }
 0x363   : > { %v2718_v41 = vpop.f32.mrf.mxu1  ;;  %v3022_v15 = vpop.f32.mrf.mxu0 }
 0x364   : > { %v2809_v30 = vadd.f32 %v2718_v41, %v6504_v5 }
 0x365   : > { %v2720_v62 = vpop.f32.mrf.mxu1  ;;  %v3024_v51 = vpop.f32.mrf.mxu0 }
 0x366   : > { %v6296_v18 = vadd.f32 %v3002_v59, %v2809_v30 }
 0x367   : > { %v2723_v47 = vpop.f32.mrf.mxu1  ;;  %v3027_v9 = vpop.f32.mrf.mxu0 }
 0x368   : > { %v2810_v38 = vadd.f32 %v2723_v47, %v6092_v35 }
 0x369   : > { %v2725_v34 = vpop.f32.mrf.mxu1  ;;  %v3029_v11 = vpop.f32.mrf.mxu0 }
 0x36a   : > { %v6299_v13 = vadd.f32 %v3007_v39, %v2810_v38  ;;  %v6506_v39 = vld [vmem:[#allocation45_spill] sm:$0xff] }
 0x36b   : > { %v2728_v28 = vpop.f32.mrf.mxu1  ;;  %v3032_v53 = vpop.f32.mrf.mxu0 }
 0x36c   : > { %v2811_v14 = vadd.f32 %v2728_v28, %v6505_v40 }
 0x36d   : > { %v2730_v36 = vpop.f32.mrf.mxu1  ;;  %v3034_v1 = vpop.f32.mrf.mxu0 }
 0x36e   : > { %v6302_v26 = vadd.f32 %v3012_v6, %v2811_v14 }
 0x36f   : > { %v2733_v29 = vpop.f32.mrf.mxu1  ;;  %v3037_v57 = vpop.f32.mrf.mxu0 }
 0x370   : > { %v2812_v59 = vadd.f32 %v2733_v29, %v6102_v46 }
 0x371   : > { %v2735_v45 = vpop.f32.mrf.mxu1  ;;  %v3039_v8 = vpop.f32.mrf.mxu0 }
 0x372   : > { %v6305_v50 = vadd.f32 %v3017_v20, %v2812_v59 }
 0x373   : > { %v2738_v35 = vpop.f32.mrf.mxu1  ;;  %v3042_v23 = vpop.f32.mrf.mxu0 }
 0x374   : > { %v2813_v4 = vadd.f32 %v2738_v35, %v6506_v39 }
 0x375   : > { %v2740_v58 = vpop.f32.mrf.mxu1  ;;  %v3044_v43 = vpop.f32.mrf.mxu0 }
 0x376   : > { %v6308_v56 = vadd.f32 %v3022_v15, %v2813_v4 }
 0x377   : > { %v2743_v19 = vpop.f32.mrf.mxu1  ;;  %v3047_v41 = vpop.f32.mrf.mxu0 }
 0x378   : > { %v2814_v6 = vadd.f32 %v2743_v19, %v6112_v48 }
 0x379   : > { %v2745_v5 = vpop.f32.mrf.mxu1  ;;  %v3049_v30 = vpop.f32.mrf.mxu0 }
 0x37a   : > { %v6311_v62 = vadd.f32 %v3027_v9, %v2814_v6 }
 0x37b   : > { %v2748_v46 = vpop.f32.mrf.mxu1  ;;  %v3052_v51 = vpop.f32.mrf.mxu0 }
 0x37c   : > { %v2815_v20 = vadd.f32 %v2748_v46, %v6117_v22 }
 0x37d   : > { %v2750_v47 = vpop.f32.mrf.mxu1  ;;  %v3054_v38 = vpop.f32.mrf.mxu0 }
 0x37e   : > { %v6314_v34 = vadd.f32 %v3032_v53, %v2815_v20 }
 0x37f   : > { %v2753_v11 = vpop.f32.mrf.mxu1  ;;  %v3057_v28 = vpop.f32.mrf.mxu0 }
 0x380   : > { %v2816_v15 = vadd.f32 %v2753_v11, %v6122_v25 }
 0x381   : > { %v2755_v40 = vpop.f32.mrf.mxu1  ;;  %v3059_v14 = vpop.f32.mrf.mxu0 }
 0x382   : > { %v6317_v36 = vadd.f32 %v3037_v57, %v2816_v15 }
 0x383   : > { %v2758_v48 = vpop.f32.mrf.mxu1  ;;  %v3062_v1 = vpop.f32.mrf.mxu0 }
 0x384   : > { %v2817_v9 = vadd.f32 %v2758_v48, %v6127_v60 }
 0x385   : > { %v2760_v29 = vpop.f32.mrf.mxu1  ;;  %v3064_v59 = vpop.f32.mrf.mxu0 }
 0x386   : > { %v6320_v45 = vadd.f32 %v3042_v23, %v2817_v9 }
 0x387   : > { %v2763_v22 = vpop.f32.mrf.mxu1  ;;  %v3067_v8 = vpop.f32.mrf.mxu0 }
 0x388   : > { %v2818_v53 = vadd.f32 %v2763_v22, %v6132_v3 }
 0x389   : > { %v2765_v35 = vpop.f32.mrf.mxu1  ;;  %v3069_v39 = vpop.f32.mrf.mxu0 }
 0x38a   : > { %v6323_v4 = vadd.f32 %v3047_v41, %v2818_v53 }
 0x38b   : > { %v2768_v25 = vpop.f32.mrf.mxu1  ;;  %v3072_v58 = vpop.f32.mrf.mxu0 }
 0x38c   : > { %v2819_v57 = vadd.f32 %v2768_v25, %v6140_v27 }
 0x38d   : > { %v2770_v43 = vpop.f32.mrf.mxu1  ;;  %v3074_v19 = vpop.f32.mrf.mxu0 }
 0x38e   : > { %v6326_v6 = vadd.f32 %v3052_v51, %v2819_v57 }
 0x38f   : > { %v2773_v60 = vpop.f32.mrf.mxu1 }
 0x390   : > { %v2820_v23 = vadd.f32 %v2773_v60, %v6154_v2 }
 0x391   : > { %v2775_v5 = vpop.f32.mrf.mxu1 }
 0x392   : > { %v6329_v30 = vadd.f32 %v3057_v28, %v2820_v23 }
 0x393   : > { %v2778_v46 = vpop.f32.mrf.mxu1 }
 0x394   : > { %v2821_v3 = vadd.f32 %v2778_v46, %v6162_v24 }
 0x395   : > { %v2780_v20 = vpop.f32.mrf.mxu1 }
 0x396   : > { %v6332_v41 = vadd.f32 %v3062_v1, %v2821_v3 }
 0x397   : > { %v2783_v47 = vpop.f32.mrf.mxu1 }
 0x398   : > { %v2822_v38 = vadd.f32 %v2783_v47, %v6170_v54 }
 0x399   : > { %v2785_v27 = vpop.f32.mrf.mxu1 }
 0x39a   : > { %v6335_v11 = vadd.f32 %v3067_v8, %v2822_v38 }
 0x39b   : > { %v2788_v51 = vpop.f32.mrf.mxu1 }
 0x39c   : > { %v2823_v15 = vadd.f32 %v2788_v51, %v6178_v49 }
 0x39d   : > { %v2790_v40 = vpop.f32.mrf.mxu1 }
 0x39e   : > { %v6338_v2 = vadd.f32 %v3072_v58, %v2823_v15 }
 0x39f   : > { %v3201_v28 = vpop.f32.mrf.mxu1 }
 0x3a0   : > { %v3360_v14 = vadd.f32 %v3201_v28, %v6189_v37 }
 0x3a1   : > { %v3203_v48 = vpop.f32.mrf.mxu1 }
 0x3a2   : > { %3392 = vxpose.xlu0.b32.start [1/16] (narrow) %v3360_v14, 32 }
 0x3a3   : > { %v3206_v24 = vpop.f32.mrf.mxu1 }
 0x3a4   : > { %v3361_v1 = vadd.f32 %v3206_v24, %v6196_v0 }
 0x3a5   : > { %v3208_v9 = vpop.f32.mrf.mxu1 }
 0x3a6   : > { %3393 = vxpose.xlu0.b32.cont [2/16] (narrow) %v3361_v1, 32 }
 0x3a7   : > { %v3211_v54 = vpop.f32.mrf.mxu1 }
 0x3a8   : > { %v3362_v29 = vadd.f32 %v3211_v54, %v6203_v32 }
 0x3a9   : > { %v3213_v59 = vpop.f32.mrf.mxu1 }
 0x3aa   : > { %3394 = vxpose.xlu0.b32.cont [3/16] (narrow) %v3362_v29, 32 }
 0x3ab   : > { %v3216_v22 = vpop.f32.mrf.mxu1 }
 0x3ac   : > { %v3363_v49 = vadd.f32 %v3216_v22, %v6210_v16 }
 0x3ad   : > { %v3218_v8 = vpop.f32.mrf.mxu1 }
 0x3ae   : > { %3395 = vxpose.xlu0.b32.cont [4/16] (narrow) %v3363_v49, 32 }
 0x3af   : > { %v3221_v53 = vpop.f32.mrf.mxu1 }
 0x3b0   : > { %v3364_v37 = vadd.f32 %v3221_v53, %v6220_v7 }
 0x3b1   : > { %v3223_v35 = vpop.f32.mrf.mxu1 }
 0x3b2   : > { %3396 = vxpose.xlu0.b32.cont [5/16] (narrow) %v3364_v37, 32 }
 0x3b3   : > { %v3226_v39 = vpop.f32.mrf.mxu1 }
 0x3b4   : > { %v3365_v0 = vadd.f32 %v3226_v39, %v6230_v33 }
 0x3b5   : > { %v3228_v25 = vpop.f32.mrf.mxu1 }
 0x3b6   : > { %3397 = vxpose.xlu0.b32.cont [6/16] (narrow) %v3365_v0, 32 }
 0x3b7   : > { %v3231_v58 = vpop.f32.mrf.mxu1 }
 0x3b8   : > { %v3366_v32 = vadd.f32 %v3231_v58, %v6237_v17 }
 0x3b9   : > { %v3233_v57 = vpop.f32.mrf.mxu1 }
 0x3ba   : > { %3398 = vxpose.xlu0.b32.cont [7/16] (narrow) %v3366_v32, 32 }
 0x3bb   : > { %v3236_v43 = vpop.f32.mrf.mxu1 }
 0x3bc   : > { %v3367_v16 = vadd.f32 %v3236_v43, %v6244_v21 }
 0x3bd   : > { %v3238_v19 = vpop.f32.mrf.mxu1 }
 0x3be   : > { %3399 = vxpose.xlu0.b32.cont [8/16] (narrow) %v3367_v16, 32  ;;  %v3497_v19 = vld [vmem:[%s6401_s5] sm:$0x7] }
 0x3bf   : > { %v3241_v60 = vpop.f32.mrf.mxu1 }
 0x3c0   : > { %v3368_v7 = vadd.f32 %v3241_v60, %v6251_v55 }
 0x3c1   : > { %v3243_v23 = vpop.f32.mrf.mxu1 }
 0x3c2   : > { %3400 = vxpose.xlu0.b32.cont [9/16] (narrow) %v3368_v7, 32 }
 0x3c3   : > { %v3246_v5 = vpop.f32.mrf.mxu1 }
 0x3c4   : > { %v3369_v33 = vadd.f32 %v3246_v5, %v6256_v31 }
 0x3c5   : > { %v3248_v46 = vpop.f32.mrf.mxu1 }
 0x3c6   : > { %3401 = vxpose.xlu0.b32.cont [10/16] (narrow) %v3369_v33, 32 }
 0x3c7   : > { %v3251_v3 = vpop.f32.mrf.mxu1 }
 0x3c8   : > { %v3370_v17 = vadd.f32 %v3251_v3, %v6262_v12  ;;  %v3478_v3 = vpop.permute.xlu0 %3477 }
 0x3c9   : > { %v3253_v20 = vpop.f32.mrf.mxu1 }
 0x3ca   : > { %3402 = vxpose.xlu0.b32.cont [11/16] (narrow) %v3370_v17, 32 }
 0x3cb   : > { %v3256_v47 = vpop.f32.mrf.mxu1 }
 0x3cc   : > { %v3371_v21 = vadd.f32 %v3256_v47, %v6268_v42 }
 0x3cd   : > { %v3258_v38 = vpop.f32.mrf.mxu1 }
 0x3ce   : > { %3403 = vxpose.xlu0.b32.cont [12/16] (narrow) %v3371_v21, 32  ;;  %v3463_v38 = vpop.permute.xlu0 %3462 }
 0x3cf   : > { %v3261_v27 = vpop.f32.mrf.mxu1 }
 0x3d0   : > { %v3372_v55 = vadd.f32 %v3261_v27, %v6274_v44 }
 0x3d1   : > { %v3263_v51 = vpop.f32.mrf.mxu1 }
 0x3d2   : > { %3404 = vxpose.xlu0.b32.cont [13/16] (narrow) %v3372_v55, 32 }
 0x3d3   : > { %v3266_v15 = vpop.f32.mrf.mxu1 }
 0x3d4   : > { %v3373_v31 = vadd.f32 %v3266_v15, %v6280_v63 }
 0x3d5   : > { %v3268_v40 = vpop.f32.mrf.mxu1 }
 0x3d6   : > { %3405 = vxpose.xlu0.b32.cont [14/16] (narrow) %v3373_v31, 32 }
 0x3d7   : > { %v3271_v28 = vpop.f32.mrf.mxu1 }
 0x3d8   : > { %v3374_v12 = vadd.f32 %v3271_v28, %v6286_v61 }
 0x3d9   : > { %v3273_v14 = vpop.f32.mrf.mxu1 }
 0x3da   : > { %3406 = vxpose.xlu0.b32.cont [15/16] (narrow) %v3374_v12, 32 }
 0x3db   : > { %v3276_v48 = vpop.f32.mrf.mxu1 }
 0x3dc   : > { %v3375_v42 = vadd.f32 %v3276_v48, %v6290_v52 }
 0x3dd   : > { %v3278_v24 = vpop.f32.mrf.mxu1 }
 0x3de   : > { %3407 = vxpose.xlu0.b32.end [16/16] (narrow) %v3375_v42, 32 }
 0x3df   : > { %v3281_v1 = vpop.f32.mrf.mxu1 }
 0x3e0   : > { %v3376_v44 = vadd.f32 %v3281_v1, %v6293_v10 }
 0x3e1   : > { %v3283_v9 = vpop.f32.mrf.mxu1 }
 0x3e2   : > { %3424 = vxpose.xlu1.b32.start [1/16] (narrow) %v3376_v44, 32 }
 0x3e3   : > { %v3286_v54 = vpop.f32.mrf.mxu1 }
 0x3e4   : > { %v3377_v63 = vadd.f32 %v3286_v54, %v6296_v18 }
 0x3e5   : > { %v3288_v29 = vpop.f32.mrf.mxu1 }
 0x3e6   : > { %3425 = vxpose.xlu1.b32.cont [2/16] (narrow) %v3377_v63, 32  ;;  %v3496_v29 = vld [vmem:[%s6400_s4] sm:$0x7] }
 0x3e7   : > { %v3291_v59 = vpop.f32.mrf.mxu1 }
 0x3e8   : > { %v3378_v61 = vadd.f32 %v3291_v59, %v6299_v13 }
 0x3e9   : > { %v3293_v22 = vpop.f32.mrf.mxu1 }
 0x3ea   : > { %3426 = vxpose.xlu1.b32.cont [3/16] (narrow) %v3378_v61, 32 }
 0x3eb   : > { %v3296_v49 = vpop.f32.mrf.mxu1 }
 0x3ec   : > { %v3379_v52 = vadd.f32 %v3296_v49, %v6302_v26 }
 0x3ed   : > { %v3298_v8 = vpop.f32.mrf.mxu1 }
 0x3ee   : > { %3427 = vxpose.xlu1.b32.cont [4/16] (narrow) %v3379_v52, 32 }
 0x3ef   : > { %v3301_v53 = vpop.f32.mrf.mxu1 }
 0x3f0   : > { %v3380_v10 = vadd.f32 %v3301_v53, %v6305_v50 }
 0x3f1   : > { %v3303_v37 = vpop.f32.mrf.mxu1 }
 0x3f2   : > { %3428 = vxpose.xlu1.b32.cont [5/16] (narrow) %v3380_v10, 32 }
 0x3f3   : > { %v3306_v35 = vpop.f32.mrf.mxu1 }
 0x3f4   : > { %v3381_v18 = vadd.f32 %v3306_v35, %v6308_v56 }
 0x3f5   : > { %v3308_v39 = vpop.f32.mrf.mxu1 }
 0x3f6   : > { %3429 = vxpose.xlu1.b32.cont [6/16] (narrow) %v3381_v18, 32 }
 0x3f7   : > { %v3311_v0 = vpop.f32.mrf.mxu1 }
 0x3f8   : > { %v3382_v13 = vadd.f32 %v3311_v0, %v6311_v62 }
 0x3f9   : > { %v3313_v25 = vpop.f32.mrf.mxu1 }
 0x3fa   : > { %3430 = vxpose.xlu1.b32.cont [7/16] (narrow) %v3382_v13, 32 }
 0x3fb   : > { %v3316_v58 = vpop.f32.mrf.mxu1 }
 0x3fc   : > { %v3383_v26 = vadd.f32 %v3316_v58, %v6314_v34 }
 0x3fd   : > { %v3318_v32 = vpop.f32.mrf.mxu1 }
 0x3fe   : > { %3431 = vxpose.xlu1.b32.cont [8/16] (narrow) %v3383_v26, 32 }
 0x3ff   : > { %v3321_v57 = vpop.f32.mrf.mxu1 }
 0x400   : > { %v3384_v50 = vadd.f32 %v3321_v57, %v6317_v36 }
 0x401   : > { %v3323_v43 = vpop.f32.mrf.mxu1 }
 0x402   : > { %3432 = vxpose.xlu1.b32.cont [9/16] (narrow) %v3384_v50, 32 }
 0x403   : > { %v3326_v16 = vpop.f32.mrf.mxu1 }
 0x404   : > { %v3385_v56 = vadd.f32 %v3326_v16, %v6320_v45 }
 0x405   : > { %v3328_v62 = vpop.f32.mrf.mxu1 }
 0x406   : > { %3433 = vxpose.xlu1.b32.cont [10/16] (narrow) %v3385_v56, 32 }
 0x407   : > { %v3331_v60 = vpop.f32.mrf.mxu1  ;;  %3500 = vperm.xlu0 %4050, %v3497_v19  }
 0x408   : > { %v3386_v34 = vadd.f32 %v3331_v60, %v6323_v4 }
 0x409   : > { %v3333_v7 = vpop.f32.mrf.mxu1 }
 0x40a   : > { %3434 = vxpose.xlu1.b32.cont [11/16] (narrow) %v3386_v34, 32 }
 0x40b   : > { %v3336_v23 = vpop.f32.mrf.mxu1 }
 0x40c   : > { %v3387_v36 = vadd.f32 %v3336_v23, %v6326_v6  ;;  %v3473_v6 = vpop.permute.xlu1 %3472 }
 0x40d   : > { %v3338_v5 = vpop.f32.mrf.mxu1 }
 0x40e   : > { %3435 = vxpose.xlu1.b32.cont [12/16] (narrow) %v3387_v36, 32 }
 0x40f   : > { %v3341_v33 = vpop.f32.mrf.mxu1 }
 0x410   : > { %v3388_v45 = vadd.f32 %v3341_v33, %v6329_v30 }
 0x411   : > { %v3343_v46 = vpop.f32.mrf.mxu1 }
 0x412   : > { %3436 = vxpose.xlu1.b32.cont [13/16] (narrow) %v3388_v45, 32 }
 0x413   : > { %v3346_v17 = vpop.f32.mrf.mxu1 }
 0x414   : > { %v3389_v20 = vadd.f32 %v3346_v17, %v6332_v41  ;;  %v3468_v41 = vpop.permute.xlu1 %3467 }
 0x415   : > { %v3348_v47 = vpop.f32.mrf.mxu1 }
 0x416   : > { %3437 = vxpose.xlu1.b32.cont [14/16] (narrow) %v3389_v20, 32 }
 0x417   : > { %v3351_v4 = vpop.f32.mrf.mxu1 }
 0x418   : > { %v3390_v21 = vadd.f32 %v3351_v4, %v6335_v11 }
 0x419   : > { %v3353_v27 = vpop.f32.mrf.mxu1 }
 0x41a   : > { %3438 = vxpose.xlu1.b32.cont [15/16] (narrow) %v3390_v21, 32 }
 0x41b   : > { %v3356_v55 = vpop.f32.mrf.mxu1 }
 0x41c   : > { %v3391_v51 = vadd.f32 %v3356_v55, %v6338_v2 }
 0x41d   : > { %v3358_v30 = vpop.f32.mrf.mxu1 }
 0x41e   : > { %3439 = vxpose.xlu1.b32.end [16/16] (narrow) %v3391_v51, 32  ;;  %v3408_v15 = vpop.trf.xlu0 }
 0x41f   : > { %v3480_v31 = vadd.f32 %v3463_v38, %v3408_v15 }
 0x421   : > { %3488 = vst [vmem:[%s328_s28] sm:$0xff] %v3480_v31 }
 0x422   : > { %v3409_v40 = vpop.trf.xlu0 }
 0x423   : > { %v3482_v11 = vadd.f32 %v3468_v41, %v3409_v40 }
 0x425   : > { %3490 = vst [vmem:[%s328_s28 + $0x10] sm:$0xff] %v3482_v11 }
 0x426   : > { %v3410_v28 = vpop.trf.xlu0 }
 0x427   : > { %v3484_v12 = vadd.f32 %v3473_v6, %v3410_v28 }
 0x429   : > { %3492 = vst [vmem:[%s328_s28 + $0x20] sm:$0xff] %v3484_v12 }
 0x42a   : > { %v3411_v14 = vpop.trf.xlu0 }
 0x42b   : > { %v3486_v48 = vadd.f32 %v3478_v3, %v3411_v14 }
 0x42d   : > { %3494 = vst [vmem:[%s328_s28 + $0x30] sm:$0xff] %v3486_v48 }
 0x45e   : > { %v3440_v2 = vpop.trf.xlu1 }
 0x45f   : > { %v3481_v42 = vadd.f32 %v3463_v38, %v3440_v2 }
 0x461   : > { %3489 = vst [vmem:[%s328_s28 + $0x8] sm:$0xff] %v3481_v42 }
 0x462   : > { %v3441_v24 = vpop.trf.xlu1 }
 0x463   : > { %v3483_v1 = vadd.f32 %v3468_v41, %v3441_v24 }
 0x465   : > { %3491 = vst [vmem:[%s328_s28 + $0x18] sm:$0xff] %v3483_v1 }
 0x466   : > { %v3442_v44 = vpop.trf.xlu1 }
 0x467   : > { %v3485_v9 = vadd.f32 %v3473_v6, %v3442_v44 }
 0x469   : > { %3493 = vst [vmem:[%s328_s28 + $0x28] sm:$0xff] %v3485_v9 }
 0x46a   : > { %v3443_v54 = vpop.trf.xlu1 }
 0x46b   : > { %v3487_v63 = vadd.f32 %v3478_v3, %v3443_v54 }
 0x46d   : > { %3495 = vst [vmem:[%s328_s28 + $0x38] sm:$0xff] %v3487_v63  ;;  %3530 = vmatprep.subr.mxu0 %v3487_v63 }
 0x46e   : > { %3531 = vmatpush1.msra.mxu0 %v3486_v48 }
 0x46f   : > { %3532 = vmatprep.subr.mxu0 %v3485_v9 }
 0x470   : > { %3533 = vmatpush1.msra.mxu0 %v3484_v12 }
 0x471   : > { %3534 = vmatprep.subr.mxu0 %v3483_v1 }
 0x472   : > { %3535 = vmatpush1.msra.mxu0 %v3482_v11 }
 0x473   : > { %3536 = vmatprep.subr.mxu0 %v3481_v42 }
 0x474   : > { %3537 = vmatpush1.msra.mxu0 %v3480_v31 }
 0x475   : > { %4014 = vmatmul.mubr.msk.f32.vlgmr.msra.gmra.mxu0 %vm1987_vm9, %v3496_v29 }
 0x482   : > { %v3501_v61 = vpop.permute.xlu0 %3500 }
 0x535   : > { %v3572_v59 = vpop.f32.mrf.mxu0 }
 0x536   : > { %v3573_v49 = vadd.f32 %v3572_v59, %v3501_v61 }
 0x537   : > { %v3574_v22 = vpop.f32.mrf.mxu0 }
 0x538   : > { %v3575_v52 = vadd.f32 %v3574_v22, %v3501_v61 }
 0x53a   : > { %v3579_v8 = vcombine.low %v3573_v49, %v3575_v52 }
 0x53c   : > { %3581 = vst [vmem:[%s338_s17] sm:$0x77] %v3579_v8 }
 0x53d PF: > { %s18_s26 = sadd.s32 1, %s4076_s26   ;;  %s6507_s24 = smov %s4072_s25 }
 0x53e   : > { %p15_p5 = scmp.ge.s32.totalorder %s18_s26, 4   ;;  %s6508_s25 = smov %s6510_s27 }
 0x540   :  { %17 = sbr.rel (!%p15_p5) target bundleno = 2 (0x2), region = 90 }

</bundles_post_ra>
